<compile_context>
chip_gen: v5e
topology: v5e:2x2
jax: 0.10.0
libtpu: 0.0.40
codegen_flags: <defaults>
</compile_context>

<pallas_src>
import functools
import math

import jax
import jax.numpy as jnp
from jax import lax
from jax.experimental import pallas as pl
from jax.experimental.pallas import tpu as pltpu


_VMEM = pl.BlockSpec(memory_space=pltpu.MemorySpace.VMEM)
# 48 MiB: above the 32 MiB default scoped limit, safe on v7x's 64 MiB VMEM.
# For the real GPT-2 lm_head on v5e/v6e this can be raised to ~96-112 MiB.
_VMEM_LIMIT = 48 * 1024 * 1024


# ---------------------------------------------------------------------------
# Fused GPT-2 transformer block (one kernel per layer, grid over (batch, q-tiles))
# ---------------------------------------------------------------------------

def _gpt2_block_kernel(hf_ref, hq_ref, bias_ref,
                       ln1g_ref, ln1b_ref, attnw_ref, attnb_ref,
                       projw_ref, projb_ref, ln2g_ref, ln2b_ref,
                       fcw_ref, fcb_ref, fcpw_ref, fcpb_ref,
                       o_ref, ctx_ref, *, n_head, eps):
    f32 = jnp.float32
    bf16 = jnp.bfloat16

    h_full = hf_ref[...].astype(f32)          # (T, E)  full sequence (K/V)
    h_q = hq_ref[...].astype(f32)             # (TQ, E) this step's query rows
    T, E = h_full.shape
    TQ = h_q.shape[0]
    Dh = E // n_head
    scale = 1.0 / math.sqrt(Dh)
    q0 = pl.program_id(1) * TQ                # global row offset of the q block

    def layer_norm(x, g_ref, b_ref):
        mu = jnp.mean(x, axis=-1, keepdims=True)
        xc = x - mu
        var = jnp.mean(xc * xc, axis=-1, keepdims=True)
        return xc * lax.rsqrt(var + eps) * g_ref[...] + b_ref[...]

    # ---------------- attention block ----------------
    hn_full = layer_norm(h_full, ln1g_ref, ln1b_ref).astype(bf16)   # (T, E)
    hn_q = layer_norm(h_q, ln1g_ref, ln1b_ref).astype(bf16)         # (TQ, E)

    # K/V for the whole sequence, Q only for this block's rows.  The column
    # slices of attn_w / attn_b are 128-lane aligned (E is a multiple of 128).
    q = (jnp.dot(hn_q, attnw_ref[:, 0:E], preferred_element_type=f32)
         + attnb_ref[:, 0:E]).astype(bf16)                           # (TQ, E)
    k = (jnp.dot(hn_full, attnw_ref[:, E:2 * E], preferred_element_type=f32)
         + attnb_ref[:, E:2 * E]).astype(bf16)                       # (T, E)
    v = (jnp.dot(hn_full, attnw_ref[:, 2 * E:3 * E], preferred_element_type=f32)
         + attnb_ref[:, 2 * E:3 * E]).astype(bf16)                   # (T, E)

    # Combined causal + padding additive mask, computed ONCE (f32, VPU).
    q_ids = q0 + lax.broadcasted_iota(jnp.int32, (TQ, T), 0)
    k_ids = lax.broadcasted_iota(jnp.int32, (TQ, T), 1)
    bias2d = jnp.where(k_ids <= q_ids, 0.0, -1e30) + bias_ref[...]   # (TQ, T)

    for hh in range(n_head):                  # static unroll over heads
        lo, hi = hh * Dh, (hh + 1) * Dh
        s = lax.dot_general(q[:, lo:hi], k[:, lo:hi],
                            dimension_numbers=(((1,), (1,)), ((), ())),
                            preferred_element_type=f32) * scale + bias2d
        m = jnp.max(s, axis=-1, keepdims=True)
        p = jnp.exp(s - m)
        # guard: a fully-masked row would otherwise give 1/0 -> inf/NaN
        denom = jnp.maximum(jnp.sum(p, axis=-1, keepdims=True), 1e-30)
        p = p * pl.reciprocal(denom, approx=True)
        oh = jnp.dot(p.astype(bf16), v[:, lo:hi],
                     preferred_element_type=f32)                     # (TQ, Dh)
        # merge heads: write this head's lanes into the shared (TQ, E) buffer
        ctx_ref[:, lo:hi] = oh.astype(bf16)

    # Single full-contraction-depth output projection (head merge folded in).
    attn = jnp.dot(ctx_ref[...], projw_ref[...], preferred_element_type=f32)
    h_q = h_q + attn + projb_ref[...]

    # ---------------- MLP block ----------------
    hn2 = layer_norm(h_q, ln2g_ref, ln2b_ref)
    f = jnp.dot(hn2.astype(bf16), fcw_ref[...],
                preferred_element_type=f32) + fcb_ref[...]
    c = math.sqrt(2.0 / math.pi)                          # GPT-2 "new" gelu
    f = 0.5 * f * (1.0 + jnp.tanh(c * (f + 0.044715 * f * f * f)))
    f = jnp.dot(f.astype(bf16), fcpw_ref[...],
                preferred_element_type=f32) + fcpb_ref[...]

    o_ref[...] = (h_q + f).astype(o_ref.dtype)


def _pick_q_tile(T):
    # 128 q-rows per step when T allows it (full MXU row occupancy); else one tile.
    return 128 if T % 128 == 0 else T


def gpt2_block(h, attn_bias, layer, *, n_head, out_dtype=jnp.float32):
    """One fused transformer layer. h: (B,T,E), attn_bias: (B,1,T) f32."""
    B, T, E = h.shape
    tq = _pick_q_tile(T)
    n_qt = T // tq

    def rep(shape):  # replicated operand (same full block every grid step)
        return pl.BlockSpec(shape, lambda b, qt: (0, 0))

    in_specs = [
        pl.BlockSpec((None, T, E), lambda b, qt: (b, 0, 0)),     # h full (K/V)
        pl.BlockSpec((None, tq, E), lambda b, qt: (b, qt, 0)),   # h q-row block
        pl.BlockSpec((None, 1, T), lambda b, qt: (b, 0, 0)),     # key mask bias
        rep((1, E)), rep((1, E)),                                # ln1 g,b
        rep((E, 3 * E)), rep((1, 3 * E)),                        # attn w,b
        rep((E, E)), rep((1, E)),                                # proj w,b
        rep((1, E)), rep((1, E)),                                # ln2 g,b
        rep((E, 4 * E)), rep((1, 4 * E)),                        # fc w,b
        rep((4 * E, E)), rep((1, E)),                            # fcproj w,b
    ]
    return pl.pallas_call(
        functools.partial(_gpt2_block_kernel, n_head=n_head, eps=1e-5),
        out_shape=jax.ShapeDtypeStruct((B, T, E), out_dtype),
        grid=(B, n_qt),
        in_specs=in_specs,
        out_specs=pl.BlockSpec((None, tq, E), lambda b, qt: (b, qt, 0)),
        scratch_shapes=[pltpu.VMEM((tq, E), jnp.bfloat16)],      # merged heads
        compiler_params=pltpu.CompilerParams(
            dimension_semantics=("parallel", "parallel"),
            vmem_limit_bytes=_VMEM_LIMIT),
    )(h, h, attn_bias,
      layer["ln1_g"], layer["ln1_b"], layer["attn_w"], layer["attn_b"],
      layer["proj_w"], layer["proj_b"], layer["ln2_g"], layer["ln2_b"],
      layer["fc_w"], layer["fc_b"], layer["fcproj_w"], layer["fcproj_b"])


# ---------------------------------------------------------------------------
# Final LayerNorm (computed ONCE) + tied lm_head tiled over the vocab dim
# ---------------------------------------------------------------------------

def _final_ln_kernel(h_ref, g_ref, b_ref, o_ref, *, eps):
    x = h_ref[...].astype(jnp.float32)
    mu = jnp.mean(x, axis=-1, keepdims=True)
    xc = x - mu
    var = jnp.mean(xc * xc, axis=-1, keepdims=True)
    hn = xc * lax.rsqrt(var + eps) * g_ref[...] + b_ref[...]
    o_ref[...] = hn.astype(o_ref.dtype)


def final_layer_norm(h2d, g, b):
    M, E = h2d.shape
    return pl.pallas_call(
        functools.partial(_final_ln_kernel, eps=1e-5),
        out_shape=jax.ShapeDtypeStruct((M, E), jnp.bfloat16),
        in_specs=[_VMEM, _VMEM, _VMEM],
        out_specs=_VMEM,
        compiler_params=pltpu.CompilerParams(vmem_limit_bytes=_VMEM_LIMIT),
    )(h2d, g, b)


def _lmhead_kernel(hn_ref, wt_ref, o_ref):
    # Pure matmul per vocab tile: the LayerNorm has been hoisted out of the grid.
    o_ref[...] = jnp.dot(hn_ref[...], wt_ref[...],
                         preferred_element_type=jnp.float32).astype(o_ref.dtype)


def lm_head(hn_bf, wte_t, *, vocab, tile_v=2048):
    M, E = hn_bf.shape
    tv = min(tile_v, vocab)
    return pl.pallas_call(
        _lmhead_kernel,
        out_shape=jax.ShapeDtypeStruct((M, vocab), jnp.float32),
        grid=(pl.cdiv(vocab, tv),),
        in_specs=[pl.BlockSpec((M, E), lambda j: (0, 0)),        # hn (bf16)
                  pl.BlockSpec((E, tv), lambda j: (0, j))],      # vocab-tiled W^T
        out_specs=pl.BlockSpec((M, tv), lambda j: (0, j)),
        compiler_params=pltpu.CompilerParams(
            dimension_semantics=("parallel",),
            vmem_limit_bytes=_VMEM_LIMIT),
    )(hn_bf, wte_t)


# ---------------------------------------------------------------------------
# clip_project MLP (Linear -> Tanh -> Linear) as one fused kernel
# ---------------------------------------------------------------------------

def _clip_mlp_kernel(x_ref, w1_ref, b1_ref, w2_ref, b2_ref, o_ref):
    x = x_ref[...].astype(jnp.float32)
    h = jnp.dot(x.astype(jnp.bfloat16), w1_ref[...],
                preferred_element_type=jnp.float32) + b1_ref[...]
    h = jnp.tanh(h)
    y = jnp.dot(h.astype(jnp.bfloat16), w2_ref[...],
                preferred_element_type=jnp.float32) + b2_ref[...]
    o_ref[...] = y.astype(o_ref.dtype)


def clip_project_mlp(prefix, w1, b1, w2, b2):
    B = prefix.shape[0]
    N = w2.shape[1]
    return pl.pallas_call(
        _clip_mlp_kernel,
        out_shape=jax.ShapeDtypeStruct((B, N), jnp.float32),
        in_specs=[_VMEM] * 5,
        out_specs=_VMEM,
        compiler_params=pltpu.CompilerParams(vmem_limit_bytes=_VMEM_LIMIT),
    )(prefix, w1, b1, w2, b2)


# ---------------------------------------------------------------------------
# GPT-2 forward (glue: position-embed add; compute: fused blocks + LN + lm_head)
# ---------------------------------------------------------------------------

def gpt2_forward(gpt, inputs_embeds, attn_bias, *, carry_dtype=jnp.float32):
    B, T, E = inputs_embeds.shape
    # wpe add is tiny XLA glue; it fuses with the embedding concat under jit.
    h = (inputs_embeds + gpt["wpe"][:T][None, :, :]).astype(carry_dtype)
    for layer in gpt["layers"]:
        h = gpt2_block(h, attn_bias, layer, n_head=gpt["n_head"],
                       out_dtype=carry_dtype)
    hn = final_layer_norm(h.reshape(B * T, E), gpt["lnf_g"], gpt["lnf_b"])
    logits = lm_head(hn, gpt["wte_t"], vocab=gpt["vocab"])
    return logits.reshape(B, T, gpt["vocab"])


# ---------------------------------------------------------------------------
# ClipCaptionModel forward
# ---------------------------------------------------------------------------

def clip_caption_forward(params, tokens, prefix, mask=None, labels=None):
    gpt = params["gpt"]
    B = tokens.shape[0]
    L = params["prefix_length"]
    E = gpt["n_embd"]

    # token embedding lookup (small gather; plain JAX glue)
    embedding_text = jnp.take(gpt["wte"], tokens, axis=0).astype(jnp.float32)

    # clip_project MLP branch (prefix_length <= 10): Linear -> Tanh -> Linear
    prefix_projections = clip_project_mlp(
        prefix, params["clip_w1"], params["clip_b1"],
        params["clip_w2"], params["clip_b2"]).reshape(B, L, E)

    embedding_cat = jnp.concatenate([prefix_projections, embedding_text], axis=1)
    T = embedding_cat.shape[1]

    # HF-style additive attention mask over key positions (0 keep, -1e30 drop)
    if mask is None:
        attn_bias = jnp.zeros((B, 1, T), jnp.float32)
    else:
        attn_bias = (1.0 - mask.astype(jnp.float32)).reshape(B, 1, T) * (-1e30)

    labels_full = None
    if labels is not None:
        dummy_token = jnp.zeros((B, L), dtype=tokens.dtype)
        labels_full = jnp.concatenate([dummy_token, tokens], axis=1)

    logits = gpt2_forward(gpt, embedding_cat, attn_bias)

    loss = None
    if labels_full is not None:
        # Matches GPT2LMHeadModel's shifted mean CE: the dummy prefix labels are
        # zeros (not -100), so they are included — same as the reference forward.
        logp = jax.nn.log_softmax(logits[:, :-1, :], axis=-1)
        tgt = labels_full[:, 1:]
        nll = -jnp.take_along_axis(logp, tgt[..., None], axis=-1)[..., 0]
        loss = jnp.mean(nll)
    return logits, loss


# ---------------------------------------------------------------------------
# Deterministic parameter init (synthetic GPT-2-like weights)
#   matmul weights stored bf16 (MXU path); biases / LN params stored f32.
# ---------------------------------------------------------------------------

def init_params(key, *, vocab, n_ctx, n_embd, n_head, n_layer,
                prefix_size, prefix_length):
    ks = iter(jax.random.split(key, 8 + 4 * n_layer))
    s = 0.02

    def w(shape):
        return (jax.random.normal(next(ks), shape, jnp.float32) * s).astype(jnp.bfloat16)

    wte = w((vocab, n_embd))
    gpt = {
        "vocab": vocab, "n_embd": n_embd, "n_head": n_head,
        "wte": wte,
        "wte_t": jnp.transpose(wte),    # one-time pre-transpose for tied lm_head
        "wpe": jax.random.normal(next(ks), (n_ctx, n_embd), jnp.float32) * s,
        "lnf_g": jnp.ones((1, n_embd), jnp.float32),
        "lnf_b": jnp.zeros((1, n_embd), jnp.float32),
        "layers": [],
    }
    for _ in range(n_layer):
        gpt["layers"].append({
            "ln1_g": jnp.ones((1, n_embd), jnp.float32),
            "ln1_b": jnp.zeros((1, n_embd), jnp.float32),
            "attn_w": w((n_embd, 3 * n_embd)),
            "attn_b": jnp.zeros((1, 3 * n_embd), jnp.float32),
            "proj_w": w((n_embd, n_embd)),
            "proj_b": jnp.zeros((1, n_embd), jnp.float32),
            "ln2_g": jnp.ones((1, n_embd), jnp.float32),
            "ln2_b": jnp.zeros((1, n_embd), jnp.float32),
            "fc_w": w((n_embd, 4 * n_embd)),
            "fc_b": jnp.zeros((1, 4 * n_embd), jnp.float32),
            "fcproj_w": w((4 * n_embd, n_embd)),
            "fcproj_b": jnp.zeros((1, n_embd), jnp.float32),
        })

    assert prefix_length <= 10, "demo uses the MLP branch of clip_project"
    mid = n_embd * prefix_length // 2
    out = n_embd * prefix_length
    params = {
        "prefix_length": prefix_length,
        "gpt": gpt,
        "clip_w1": w((prefix_size, mid)),
        "clip_b1": jnp.zeros((1, mid), jnp.float32),
        "clip_w2": w((mid, out)),
        "clip_b2": jnp.zeros((1, out), jnp.float32),
    }
    return params


# ---------------------------------------------------------------------------
# Demo
# ---------------------------------------------------------------------------

if __name__ == "__main__":
    # Hardware-friendly small demo shapes: E=128 (lane-dense stores),
    # T = prefix_length + token_len = 16 (multiple of 8), vocab multiple of 128.
    VOCAB = 256
    N_CTX = 32
    N_EMBD = 128
    N_HEAD = 4
    N_LAYER = 2
    PREFIX_SIZE = 64
    PREFIX_LENGTH = 4     # <= 10  -> MLP clip_project branch
    BATCH = 2
    TOKEN_LEN = 12

    key = jax.random.PRNGKey(0)
    kp, kt, kx = jax.random.split(key, 3)

    params = init_params(
        kp, vocab=VOCAB, n_ctx=N_CTX, n_embd=N_EMBD, n_head=N_HEAD,
        n_layer=N_LAYER, prefix_size=PREFIX_SIZE, prefix_length=PREFIX_LENGTH)

    tokens = jax.random.randint(kt, (BATCH, TOKEN_LEN), 0, VOCAB, dtype=jnp.int32)
    prefix = jax.random.normal(kx, (BATCH, PREFIX_SIZE), jnp.float32)

    # jit the whole forward (params closed over) so the small glue ops
    # (gather / concat / wpe add / loss) fuse around the Pallas kernels.
    fwd = jax.jit(lambda t, p: clip_caption_forward(params, t, p,
                                                    mask=None, labels=t))
    logits, loss = fwd(tokens, prefix)
    jax.block_until_ready(logits)
    jax.block_until_ready(loss)

    expected_T = PREFIX_LENGTH + TOKEN_LEN
    assert logits.shape == (BATCH, expected_T, VOCAB), logits.shape
    assert bool(jnp.isfinite(loss)), loss
    assert bool(jnp.all(jnp.isfinite(logits))), "non-finite logits"
    print("KERNEL_OK")
</pallas_src>

<mosaic_0001>
module attributes {stable_mosaic.version = 11 : i64} {
  func.func @_clip_mlp_kernel(%arg0: memref<2x64xf32, #tpu.memory_space<vmem>>, %arg1: memref<64x256xbf16, #tpu.memory_space<vmem>>, %arg2: memref<1x256xf32, #tpu.memory_space<vmem>>, %arg3: memref<256x512xbf16, #tpu.memory_space<vmem>>, %arg4: memref<1x512xf32, #tpu.memory_space<vmem>>, %arg5: memref<2x512xf32, #tpu.memory_space<vmem>>) attributes {dimension_semantics = [], scalar_prefetch = 0 : i64, scratch_operands = 0 : i64, tpu.core_type = #tpu.core_type<tc>} {
    %c0 = arith.constant 0 : index
    %c0_0 = arith.constant 0 : index
    %0 = vector.load %arg0[%c0, %c0_0] : memref<2x64xf32, #tpu.memory_space<vmem>>, vector<2x64xf32>
    %1 = arith.truncf %0 : vector<2x64xf32> to vector<2x64xbf16>
    %c0_1 = arith.constant 0 : index
    %c0_2 = arith.constant 0 : index
    %2 = vector.load %arg1[%c0_1, %c0_2] : memref<64x256xbf16, #tpu.memory_space<vmem>>, vector<64x256xbf16>
    %cst = arith.constant dense<0.000000e+00> : vector<2x256xf32>
    %3 = tpu.matmul %1, %2, %cst {dimension_numbers = #tpu.dot_dimension_numbers<[1], [0], [0], [1], [0, 0, 1, 1], [], []>} : vector<2x64xbf16>, vector<64x256xbf16>, vector<2x256xf32> -> vector<2x256xf32>
    %c0_3 = arith.constant 0 : index
    %c0_4 = arith.constant 0 : index
    %4 = vector.load %arg2[%c0_3, %c0_4] : memref<1x256xf32, #tpu.memory_space<vmem>>, vector<1x256xf32>
    %5 = vector.broadcast %4 : vector<1x256xf32> to vector<2x256xf32>
    %6 = arith.addf %3, %5 : vector<2x256xf32>
    %7 = math.tanh %6 : vector<2x256xf32>
    %8 = arith.truncf %7 : vector<2x256xf32> to vector<2x256xbf16>
    %c0_5 = arith.constant 0 : index
    %c0_6 = arith.constant 0 : index
    %9 = vector.load %arg3[%c0_5, %c0_6] : memref<256x512xbf16, #tpu.memory_space<vmem>>, vector<256x512xbf16>
    %cst_7 = arith.constant dense<0.000000e+00> : vector<2x512xf32>
    %10 = tpu.matmul %8, %9, %cst_7 {dimension_numbers = #tpu.dot_dimension_numbers<[1], [0], [0], [1], [0, 0, 1, 1], [], []>} : vector<2x256xbf16>, vector<256x512xbf16>, vector<2x512xf32> -> vector<2x512xf32>
    %c0_8 = arith.constant 0 : index
    %c0_9 = arith.constant 0 : index
    %11 = vector.load %arg4[%c0_8, %c0_9] : memref<1x512xf32, #tpu.memory_space<vmem>>, vector<1x512xf32>
    %12 = vector.broadcast %11 : vector<1x512xf32> to vector<2x512xf32>
    %13 = arith.addf %10, %12 : vector<2x512xf32>
    %c0_10 = arith.constant 0 : index
    %c0_11 = arith.constant 0 : index
    %14 = vector.load %arg5[%c0_10, %c0_11] : memref<2x512xf32, #tpu.memory_space<vmem>>, vector<2x512xf32>
    tpu.vector_store %arg5[%c0_10, %c0_11], %13 {strides = array<i32>} : memref<2x512xf32, #tpu.memory_space<vmem>>, vector<2x512xf32>,
    return
  }
}

module attributes {stable_mosaic.version = 11 : i64} {
  func.func @_gpt2_block_kernel(%arg0: i32, %arg1: i32, %arg2: memref<1x16x128xf32, #tpu.memory_space<vmem>>, %arg3: memref<1x16x128xf32, #tpu.memory_space<vmem>>, %arg4: memref<1x1x16xf32, #tpu.memory_space<vmem>>, %arg5: memref<1x128xf32, #tpu.memory_space<vmem>>, %arg6: memref<1x128xf32, #tpu.memory_space<vmem>>, %arg7: memref<128x384xbf16, #tpu.memory_space<vmem>>, %arg8: memref<1x384xf32, #tpu.memory_space<vmem>>, %arg9: memref<128x128xbf16, #tpu.memory_space<vmem>>, %arg10: memref<1x128xf32, #tpu.memory_space<vmem>>, %arg11: memref<1x128xf32, #tpu.memory_space<vmem>>, %arg12: memref<1x128xf32, #tpu.memory_space<vmem>>, %arg13: memref<128x512xbf16, #tpu.memory_space<vmem>>, %arg14: memref<1x512xf32, #tpu.memory_space<vmem>>, %arg15: memref<512x128xbf16, #tpu.memory_space<vmem>>, %arg16: memref<1x128xf32, #tpu.memory_space<vmem>>, %arg17: memref<1x16x128xf32, #tpu.memory_space<vmem>>, %arg18: memref<16x128xbf16, #tpu.memory_space<vmem>>) attributes {dimension_semantics = [#tpu.dimension_semantics<parallel>, #tpu.dimension_semantics<parallel>], iteration_bounds = array<i64: 2, 1>, scalar_prefetch = 0 : i64, scratch_operands = 1 : i64, tpu.core_type = #tpu.core_type<tc>, window_params = [{transform_indices = @transform_0, window_bounds = array<i64: 1, 16, 128>}, {transform_indices = @transform_1, window_bounds = array<i64: 1, 16, 128>}, {transform_indices = @transform_2, window_bounds = array<i64: 1, 1, 16>}, {pipeline_mode = #tpu.pipeline_mode<synchronous>, transform_indices = @transform_3, window_bounds = array<i64: 1, 128>}, {pipeline_mode = #tpu.pipeline_mode<synchronous>, transform_indices = @transform_4, window_bounds = array<i64: 1, 128>}, {pipeline_mode = #tpu.pipeline_mode<synchronous>, transform_indices = @transform_5, window_bounds = array<i64: 128, 384>}, {pipeline_mode = #tpu.pipeline_mode<synchronous>, transform_indices = @transform_6, window_bounds = array<i64: 1, 384>}, {pipeline_mode = #tpu.pipeline_mode<synchronous>, transform_indices = @transform_7, window_bounds = array<i64: 128, 128>}, {pipeline_mode = #tpu.pipeline_mode<synchronous>, transform_indices = @transform_8, window_bounds = array<i64: 1, 128>}, {pipeline_mode = #tpu.pipeline_mode<synchronous>, transform_indices = @transform_9, window_bounds = array<i64: 1, 128>}, {pipeline_mode = #tpu.pipeline_mode<synchronous>, transform_indices = @transform_10, window_bounds = array<i64: 1, 128>}, {pipeline_mode = #tpu.pipeline_mode<synchronous>, transform_indices = @transform_11, window_bounds = array<i64: 128, 512>}, {pipeline_mode = #tpu.pipeline_mode<synchronous>, transform_indices = @transform_12, window_bounds = array<i64: 1, 512>}, {pipeline_mode = #tpu.pipeline_mode<synchronous>, transform_indices = @transform_13, window_bounds = array<i64: 512, 128>}, {pipeline_mode = #tpu.pipeline_mode<synchronous>, transform_indices = @transform_14, window_bounds = array<i64: 1, 128>}, {transform_indices = @transform_15, window_bounds = array<i64: 1, 16, 128>}]} {
    %c0 = arith.constant 0 : index
    %c0_0 = arith.constant 0 : index
    %c0_1 = arith.constant 0 : index
    %0 = vector.load %arg2[%c0, %c0_0, %c0_1] : memref<1x16x128xf32, #tpu.memory_space<vmem>>, vector<1x16x128xf32>
    %1 = vector.shape_cast %0 : vector<1x16x128xf32> to vector<16x128xf32>
    %c0_2 = arith.constant 0 : index
    %c0_3 = arith.constant 0 : index
    %c0_4 = arith.constant 0 : index
    %2 = vector.load %arg3[%c0_2, %c0_3, %c0_4] : memref<1x16x128xf32, #tpu.memory_space<vmem>>, vector<1x16x128xf32>
    %3 = vector.shape_cast %2 : vector<1x16x128xf32> to vector<16x128xf32>
    %c16_i32 = arith.constant 16 : i32
    %4 = arith.muli %arg1, %c16_i32 : i32
    %cst = arith.constant dense<0.000000e+00> : vector<16xf32>
    %5 = vector.multi_reduction <add>, %1, %cst [1] : vector<16x128xf32> to vector<16xf32>
    %6 = vector.shape_cast %5 : vector<16xf32> to vector<16x1xf32>
    %cst_5 = arith.constant 1.280000e+02 : f32
    %7 = vector.broadcast %cst_5 : f32 to vector<16x1xf32>
    %8 = arith.divf %6, %7 : vector<16x1xf32>
    %9 = vector.broadcast %8 : vector<16x1xf32> to vector<16x128xf32>
    %10 = arith.subf %1, %9 : vector<16x128xf32>
    %11 = arith.mulf %10, %10 : vector<16x128xf32>
    %cst_6 = arith.constant dense<0.000000e+00> : vector<16xf32>
    %12 = vector.multi_reduction <add>, %11, %cst_6 [1] : vector<16x128xf32> to vector<16xf32>
    %13 = vector.shape_cast %12 : vector<16xf32> to vector<16x1xf32>
    %cst_7 = arith.constant 1.280000e+02 : f32
    %14 = vector.broadcast %cst_7 : f32 to vector<16x1xf32>
    %15 = arith.divf %13, %14 : vector<16x1xf32>
    %cst_8 = arith.constant 9.99999974E-6 : f32
    %16 = vector.broadcast %cst_8 : f32 to vector<16x1xf32>
    %17 = arith.addf %15, %16 : vector<16x1xf32>
    %18 = math.rsqrt %17 : vector<16x1xf32>
    %19 = vector.broadcast %18 : vector<16x1xf32> to vector<16x128xf32>
    %20 = arith.mulf %10, %19 : vector<16x128xf32>
    %c0_9 = arith.constant 0 : index
    %c0_10 = arith.constant 0 : index
    %21 = vector.load %arg5[%c0_9, %c0_10] : memref<1x128xf32, #tpu.memory_space<vmem>>, vector<1x128xf32>
    %22 = vector.broadcast %21 : vector<1x128xf32> to vector<16x128xf32>
    %23 = arith.mulf %20, %22 : vector<16x128xf32>
    %c0_11 = arith.constant 0 : index
    %c0_12 = arith.constant 0 : index
    %24 = vector.load %arg6[%c0_11, %c0_12] : memref<1x128xf32, #tpu.memory_space<vmem>>, vector<1x128xf32>
    %25 = vector.broadcast %24 : vector<1x128xf32> to vector<16x128xf32>
    %26 = arith.addf %23, %25 : vector<16x128xf32>
    %27 = arith.truncf %26 : vector<16x128xf32> to vector<16x128xbf16>
    %cst_13 = arith.constant dense<0.000000e+00> : vector<16xf32>
    %28 = vector.multi_reduction <add>, %3, %cst_13 [1] : vector<16x128xf32> to vector<16xf32>
    %29 = vector.shape_cast %28 : vector<16xf32> to vector<16x1xf32>
    %cst_14 = arith.constant 1.280000e+02 : f32
    %30 = vector.broadcast %cst_14 : f32 to vector<16x1xf32>
    %31 = arith.divf %29, %30 : vector<16x1xf32>
    %32 = vector.broadcast %31 : vector<16x1xf32> to vector<16x128xf32>
    %33 = arith.subf %3, %32 : vector<16x128xf32>
    %34 = arith.mulf %33, %33 : vector<16x128xf32>
    %cst_15 = arith.constant dense<0.000000e+00> : vector<16xf32>
    %35 = vector.multi_reduction <add>, %34, %cst_15 [1] : vector<16x128xf32> to vector<16xf32>
    %36 = vector.shape_cast %35 : vector<16xf32> to vector<16x1xf32>
    %cst_16 = arith.constant 1.280000e+02 : f32
    %37 = vector.broadcast %cst_16 : f32 to vector<16x1xf32>
    %38 = arith.divf %36, %37 : vector<16x1xf32>
    %cst_17 = arith.constant 9.99999974E-6 : f32
    %39 = vector.broadcast %cst_17 : f32 to vector<16x1xf32>
    %40 = arith.addf %38, %39 : vector<16x1xf32>
    %41 = math.rsqrt %40 : vector<16x1xf32>
    %42 = vector.broadcast %41 : vector<16x1xf32> to vector<16x128xf32>
    %43 = arith.mulf %33, %42 : vector<16x128xf32>
    %c0_18 = arith.constant 0 : index
    %c0_19 = arith.constant 0 : index
    %44 = vector.load %arg5[%c0_18, %c0_19] : memref<1x128xf32, #tpu.memory_space<vmem>>, vector<1x128xf32>
    %45 = vector.broadcast %44 : vector<1x128xf32> to vector<16x128xf32>
    %46 = arith.mulf %43, %45 : vector<16x128xf32>
    %c0_20 = arith.constant 0 : index
    %c0_21 = arith.constant 0 : index
    %47 = vector.load %arg6[%c0_20, %c0_21] : memref<1x128xf32, #tpu.memory_space<vmem>>, vector<1x128xf32>
    %48 = vector.broadcast %47 : vector<1x128xf32> to vector<16x128xf32>
    %49 = arith.addf %46, %48 : vector<16x128xf32>
    %50 = arith.truncf %49 : vector<16x128xf32> to vector<16x128xbf16>
    %c0_22 = arith.constant 0 : index
    %c0_23 = arith.constant 0 : index
    %51 = vector.load %arg7[%c0_22, %c0_23] : memref<128x384xbf16, #tpu.memory_space<vmem>>, vector<128x128xbf16>
    %cst_24 = arith.constant dense<0.000000e+00> : vector<16x128xf32>
    %52 = tpu.matmul %50, %51, %cst_24 {dimension_numbers = #tpu.dot_dimension_numbers<[1], [0], [0], [1], [0, 0, 1, 1], [], []>} : vector<16x128xbf16>, vector<128x128xbf16>, vector<16x128xf32> -> vector<16x128xf32>
    %c0_25 = arith.constant 0 : index
    %c0_26 = arith.constant 0 : index
    %53 = vector.load %arg8[%c0_25, %c0_26] : memref<1x384xf32, #tpu.memory_space<vmem>>, vector<1x128xf32>
    %54 = vector.broadcast %53 : vector<1x128xf32> to vector<16x128xf32>
    %55 = arith.addf %52, %54 : vector<16x128xf32>
    %56 = arith.truncf %55 : vector<16x128xf32> to vector<16x128xbf16>
    %c0_27 = arith.constant 0 : index
    %c128 = arith.constant 128 : index
    %57 = vector.load %arg7[%c0_27, %c128] : memref<128x384xbf16, #tpu.memory_space<vmem>>, vector<128x128xbf16>
    %cst_28 = arith.constant dense<0.000000e+00> : vector<16x128xf32>
    %58 = tpu.matmul %27, %57, %cst_28 {dimension_numbers = #tpu.dot_dimension_numbers<[1], [0], [0], [1], [0, 0, 1, 1], [], []>} : vector<16x128xbf16>, vector<128x128xbf16>, vector<16x128xf32> -> vector<16x128xf32>
    %c0_29 = arith.constant 0 : index
    %c128_30 = arith.constant 128 : index
    %59 = vector.load %arg8[%c0_29, %c128_30] : memref<1x384xf32, #tpu.memory_space<vmem>>, vector<1x128xf32>
    %60 = vector.broadcast %59 : vector<1x128xf32> to vector<16x128xf32>
    %61 = arith.addf %58, %60 : vector<16x128xf32>
    %62 = arith.truncf %61 : vector<16x128xf32> to vector<16x128xbf16>
    %c0_31 = arith.constant 0 : index
    %c256 = arith.constant 256 : index
    %63 = vector.load %arg7[%c0_31, %c256] : memref<128x384xbf16, #tpu.memory_space<vmem>>, vector<128x128xbf16>
    %cst_32 = arith.constant dense<0.000000e+00> : vector<16x128xf32>
    %64 = tpu.matmul %27, %63, %cst_32 {dimension_numbers = #tpu.dot_dimension_numbers<[1], [0], [0], [1], [0, 0, 1, 1], [], []>} : vector<16x128xbf16>, vector<128x128xbf16>, vector<16x128xf32> -> vector<16x128xf32>
    %c0_33 = arith.constant 0 : index
    %c256_34 = arith.constant 256 : index
    %65 = vector.load %arg8[%c0_33, %c256_34] : memref<1x384xf32, #tpu.memory_space<vmem>>, vector<1x128xf32>
    %66 = vector.broadcast %65 : vector<1x128xf32> to vector<16x128xf32>
    %67 = arith.addf %64, %66 : vector<16x128xf32>
    %68 = arith.truncf %67 : vector<16x128xf32> to vector<16x128xbf16>
    %69 = tpu.iota {dimensions = array<i32: 0>} : vector<16x16xi32>
    %70 = vector.broadcast %4 : i32 to vector<16x16xi32>
    %71 = arith.addi %70, %69 : vector<16x16xi32>
    %72 = tpu.iota {dimensions = array<i32: 1>} : vector<16x16xi32>
    %73 = arith.cmpi sle, %72, %71 : vector<16x16xi32>
    %cst_35 = arith.constant 0.000000e+00 : f32
    %cst_36 = arith.constant -1.000000e+30 : f32
    %74 = vector.broadcast %cst_35 : f32 to vector<16x16xf32>
    %75 = vector.broadcast %cst_36 : f32 to vector<16x16xf32>
    %76 = arith.select %73, %74, %75 : vector<16x16xi1>, vector<16x16xf32>
    %c0_37 = arith.constant 0 : index
    %c0_38 = arith.constant 0 : index
    %c0_39 = arith.constant 0 : index
    %77 = vector.load %arg4[%c0_37, %c0_38, %c0_39] : memref<1x1x16xf32, #tpu.memory_space<vmem>>, vector<1x1x16xf32>
    %78 = vector.shape_cast %77 : vector<1x1x16xf32> to vector<1x16xf32>
    %79 = vector.broadcast %78 : vector<1x16xf32> to vector<16x16xf32>
    %80 = arith.addf %76, %79 : vector<16x16xf32>
    %81 = vector.extract_strided_slice %56 {offsets = [0, 0], sizes = [16, 32], strides = [1, 1]} : vector<16x128xbf16> to vector<16x32xbf16>
    %82 = vector.extract_strided_slice %62 {offsets = [0, 0], sizes = [16, 32], strides = [1, 1]} : vector<16x128xbf16> to vector<16x32xbf16>
    %cst_40 = arith.constant dense<0.000000e+00> : vector<16x16xf32>
    %83 = tpu.matmul %81, %82, %cst_40 {dimension_numbers = #tpu.dot_dimension_numbers<[1], [1], [0], [0], [0, 0, 1, 0], [], []>} : vector<16x32xbf16>, vector<16x32xbf16>, vector<16x16xf32> -> vector<16x16xf32>
    %cst_41 = arith.constant 0.176776692 : f32
    %84 = vector.broadcast %cst_41 : f32 to vector<16x16xf32>
    %85 = arith.mulf %83, %84 : vector<16x16xf32>
    %86 = arith.addf %85, %80 : vector<16x16xf32>
    %cst_42 = arith.constant dense<0xFF800000> : vector<16xf32>
    %87 = vector.multi_reduction <maximumf>, %86, %cst_42 [1] : vector<16x16xf32> to vector<16xf32>
    %88 = vector.shape_cast %87 : vector<16xf32> to vector<16x1xf32>
    %89 = vector.broadcast %88 : vector<16x1xf32> to vector<16x16xf32>
    %90 = arith.subf %86, %89 : vector<16x16xf32>
    %91 = math.exp %90 : vector<16x16xf32>
    %cst_43 = arith.constant dense<0.000000e+00> : vector<16xf32>
    %92 = vector.multi_reduction <add>, %91, %cst_43 [1] : vector<16x16xf32> to vector<16xf32>
    %93 = vector.shape_cast %92 : vector<16xf32> to vector<16x1xf32>
    %cst_44 = arith.constant 1.000000e-30 : f32
    %94 = vector.broadcast %cst_44 : f32 to vector<16x1xf32>
    %95 = arith.maximumf %93, %94 : vector<16x1xf32>
    %96 = tpu.reciprocal %95 {approx = true} : vector<16x1xf32> -> vector<16x1xf32>
    %97 = vector.broadcast %96 : vector<16x1xf32> to vector<16x16xf32>
    %98 = arith.mulf %91, %97 : vector<16x16xf32>
    %99 = arith.truncf %98 : vector<16x16xf32> to vector<16x16xbf16>
    %100 = vector.extract_strided_slice %68 {offsets = [0, 0], sizes = [16, 32], strides = [1, 1]} : vector<16x128xbf16> to vector<16x32xbf16>
    %cst_45 = arith.constant dense<0.000000e+00> : vector<16x32xf32>
    %101 = tpu.matmul %99, %100, %cst_45 {dimension_numbers = #tpu.dot_dimension_numbers<[1], [0], [0], [1], [0, 0, 1, 1], [], []>} : vector<16x16xbf16>, vector<16x32xbf16>, vector<16x32xf32> -> vector<16x32xf32>
    %102 = arith.truncf %101 : vector<16x32xf32> to vector<16x32xbf16>
    %c0_46 = arith.constant 0 : index
    %c0_47 = arith.constant 0 : index
    %103 = vector.load %arg18[%c0_46, %c0_47] : memref<16x128xbf16, #tpu.memory_space<vmem>>, vector<16x32xbf16>
    tpu.vector_store %arg18[%c0_46, %c0_47], %102 {strides = array<i32>} : memref<16x128xbf16, #tpu.memory_space<vmem>>, vector<16x32xbf16>,
    %104 = vector.extract_strided_slice %56 {offsets = [0, 32], sizes = [16, 32], strides = [1, 1]} : vector<16x128xbf16> to vector<16x32xbf16>
    %105 = vector.extract_strided_slice %62 {offsets = [0, 32], sizes = [16, 32], strides = [1, 1]} : vector<16x128xbf16> to vector<16x32xbf16>
    %cst_48 = arith.constant dense<0.000000e+00> : vector<16x16xf32>
    %106 = tpu.matmul %104, %105, %cst_48 {dimension_numbers = #tpu.dot_dimension_numbers<[1], [1], [0], [0], [0, 0, 1, 0], [], []>} : vector<16x32xbf16>, vector<16x32xbf16>, vector<16x16xf32> -> vector<16x16xf32>
    %cst_49 = arith.constant 0.176776692 : f32
    %107 = vector.broadcast %cst_49 : f32 to vector<16x16xf32>
    %108 = arith.mulf %106, %107 : vector<16x16xf32>
    %109 = arith.addf %108, %80 : vector<16x16xf32>
    %cst_50 = arith.constant dense<0xFF800000> : vector<16xf32>
    %110 = vector.multi_reduction <maximumf>, %109, %cst_50 [1] : vector<16x16xf32> to vector<16xf32>
    %111 = vector.shape_cast %110 : vector<16xf32> to vector<16x1xf32>
    %112 = vector.broadcast %111 : vector<16x1xf32> to vector<16x16xf32>
    %113 = arith.subf %109, %112 : vector<16x16xf32>
    %114 = math.exp %113 : vector<16x16xf32>
    %cst_51 = arith.constant dense<0.000000e+00> : vector<16xf32>
    %115 = vector.multi_reduction <add>, %114, %cst_51 [1] : vector<16x16xf32> to vector<16xf32>
    %116 = vector.shape_cast %115 : vector<16xf32> to vector<16x1xf32>
    %cst_52 = arith.constant 1.000000e-30 : f32
    %117 = vector.broadcast %cst_52 : f32 to vector<16x1xf32>
    %118 = arith.maximumf %116, %117 : vector<16x1xf32>
    %119 = tpu.reciprocal %118 {approx = true} : vector<16x1xf32> -> vector<16x1xf32>
    %120 = vector.broadcast %119 : vector<16x1xf32> to vector<16x16xf32>
    %121 = arith.mulf %114, %120 : vector<16x16xf32>
    %122 = arith.truncf %121 : vector<16x16xf32> to vector<16x16xbf16>
    %123 = vector.extract_strided_slice %68 {offsets = [0, 32], sizes = [16, 32], strides = [1, 1]} : vector<16x128xbf16> to vector<16x32xbf16>
    %cst_53 = arith.constant dense<0.000000e+00> : vector<16x32xf32>
    %124 = tpu.matmul %122, %123, %cst_53 {dimension_numbers = #tpu.dot_dimension_numbers<[1], [0], [0], [1], [0, 0, 1, 1], [], []>} : vector<16x16xbf16>, vector<16x32xbf16>, vector<16x32xf32> -> vector<16x32xf32>
    %125 = arith.truncf %124 : vector<16x32xf32> to vector<16x32xbf16>
    %c0_54 = arith.constant 0 : index
    %c32 = arith.constant 32 : index
    %126 = vector.load %arg18[%c0_54, %c32] : memref<16x128xbf16, #tpu.memory_space<vmem>>, vector<16x32xbf16>
    tpu.vector_store %arg18[%c0_54, %c32], %125 {strides = array<i32>} : memref<16x128xbf16, #tpu.memory_space<vmem>>, vector<16x32xbf16>,
    %127 = vector.extract_strided_slice %56 {offsets = [0, 64], sizes = [16, 32], strides = [1, 1]} : vector<16x128xbf16> to vector<16x32xbf16>
    %128 = vector.extract_strided_slice %62 {offsets = [0, 64], sizes = [16, 32], strides = [1, 1]} : vector<16x128xbf16> to vector<16x32xbf16>
    %cst_55 = arith.constant dense<0.000000e+00> : vector<16x16xf32>
    %129 = tpu.matmul %127, %128, %cst_55 {dimension_numbers = #tpu.dot_dimension_numbers<[1], [1], [0], [0], [0, 0, 1, 0], [], []>} : vector<16x32xbf16>, vector<16x32xbf16>, vector<16x16xf32> -> vector<16x16xf32>
    %cst_56 = arith.constant 0.176776692 : f32
    %130 = vector.broadcast %cst_56 : f32 to vector<16x16xf32>
    %131 = arith.mulf %129, %130 : vector<16x16xf32>
    %132 = arith.addf %131, %80 : vector<16x16xf32>
    %cst_57 = arith.constant dense<0xFF800000> : vector<16xf32>
    %133 = vector.multi_reduction <maximumf>, %132, %cst_57 [1] : vector<16x16xf32> to vector<16xf32>
    %134 = vector.shape_cast %133 : vector<16xf32> to vector<16x1xf32>
    %135 = vector.broadcast %134 : vector<16x1xf32> to vector<16x16xf32>
    %136 = arith.subf %132, %135 : vector<16x16xf32>
    %137 = math.exp %136 : vector<16x16xf32>
    %cst_58 = arith.constant dense<0.000000e+00> : vector<16xf32>
    %138 = vector.multi_reduction <add>, %137, %cst_58 [1] : vector<16x16xf32> to vector<16xf32>
    %139 = vector.shape_cast %138 : vector<16xf32> to vector<16x1xf32>
    %cst_59 = arith.constant 1.000000e-30 : f32
    %140 = vector.broadcast %cst_59 : f32 to vector<16x1xf32>
    %141 = arith.maximumf %139, %140 : vector<16x1xf32>
    %142 = tpu.reciprocal %141 {approx = true} : vector<16x1xf32> -> vector<16x1xf32>
    %143 = vector.broadcast %142 : vector<16x1xf32> to vector<16x16xf32>
    %144 = arith.mulf %137, %143 : vector<16x16xf32>
    %145 = arith.truncf %144 : vector<16x16xf32> to vector<16x16xbf16>
    %146 = vector.extract_strided_slice %68 {offsets = [0, 64], sizes = [16, 32], strides = [1, 1]} : vector<16x128xbf16> to vector<16x32xbf16>
    %cst_60 = arith.constant dense<0.000000e+00> : vector<16x32xf32>
    %147 = tpu.matmul %145, %146, %cst_60 {dimension_numbers = #tpu.dot_dimension_numbers<[1], [0], [0], [1], [0, 0, 1, 1], [], []>} : vector<16x16xbf16>, vector<16x32xbf16>, vector<16x32xf32> -> vector<16x32xf32>
    %148 = arith.truncf %147 : vector<16x32xf32> to vector<16x32xbf16>
    %c0_61 = arith.constant 0 : index
    %c64 = arith.constant 64 : index
    %149 = vector.load %arg18[%c0_61, %c64] : memref<16x128xbf16, #tpu.memory_space<vmem>>, vector<16x32xbf16>
    tpu.vector_store %arg18[%c0_61, %c64], %148 {strides = array<i32>} : memref<16x128xbf16, #tpu.memory_space<vmem>>, vector<16x32xbf16>,
    %150 = vector.extract_strided_slice %56 {offsets = [0, 96], sizes = [16, 32], strides = [1, 1]} : vector<16x128xbf16> to vector<16x32xbf16>
    %151 = vector.extract_strided_slice %62 {offsets = [0, 96], sizes = [16, 32], strides = [1, 1]} : vector<16x128xbf16> to vector<16x32xbf16>
    %cst_62 = arith.constant dense<0.000000e+00> : vector<16x16xf32>
    %152 = tpu.matmul %150, %151, %cst_62 {dimension_numbers = #tpu.dot_dimension_numbers<[1], [1], [0], [0], [0, 0, 1, 0], [], []>} : vector<16x32xbf16>, vector<16x32xbf16>, vector<16x16xf32> -> vector<16x16xf32>
    %cst_63 = arith.constant 0.176776692 : f32
    %153 = vector.broadcast %cst_63 : f32 to vector<16x16xf32>
    %154 = arith.mulf %152, %153 : vector<16x16xf32>
    %155 = arith.addf %154, %80 : vector<16x16xf32>
    %cst_64 = arith.constant dense<0xFF800000> : vector<16xf32>
    %156 = vector.multi_reduction <maximumf>, %155, %cst_64 [1] : vector<16x16xf32> to vector<16xf32>
    %157 = vector.shape_cast %156 : vector<16xf32> to vector<16x1xf32>
    %158 = vector.broadcast %157 : vector<16x1xf32> to vector<16x16xf32>
    %159 = arith.subf %155, %158 : vector<16x16xf32>
    %160 = math.exp %159 : vector<16x16xf32>
    %cst_65 = arith.constant dense<0.000000e+00> : vector<16xf32>
    %161 = vector.multi_reduction <add>, %160, %cst_65 [1] : vector<16x16xf32> to vector<16xf32>
    %162 = vector.shape_cast %161 : vector<16xf32> to vector<16x1xf32>
    %cst_66 = arith.constant 1.000000e-30 : f32
    %163 = vector.broadcast %cst_66 : f32 to vector<16x1xf32>
    %164 = arith.maximumf %162, %163 : vector<16x1xf32>
    %165 = tpu.reciprocal %164 {approx = true} : vector<16x1xf32> -> vector<16x1xf32>
    %166 = vector.broadcast %165 : vector<16x1xf32> to vector<16x16xf32>
    %167 = arith.mulf %160, %166 : vector<16x16xf32>
    %168 = arith.truncf %167 : vector<16x16xf32> to vector<16x16xbf16>
    %169 = vector.extract_strided_slice %68 {offsets = [0, 96], sizes = [16, 32], strides = [1, 1]} : vector<16x128xbf16> to vector<16x32xbf16>
    %cst_67 = arith.constant dense<0.000000e+00> : vector<16x32xf32>
    %170 = tpu.matmul %168, %169, %cst_67 {dimension_numbers = #tpu.dot_dimension_numbers<[1], [0], [0], [1], [0, 0, 1, 1], [], []>} : vector<16x16xbf16>, vector<16x32xbf16>, vector<16x32xf32> -> vector<16x32xf32>
    %171 = arith.truncf %170 : vector<16x32xf32> to vector<16x32xbf16>
    %c0_68 = arith.constant 0 : index
    %c96 = arith.constant 96 : index
    %172 = vector.load %arg18[%c0_68, %c96] : memref<16x128xbf16, #tpu.memory_space<vmem>>, vector<16x32xbf16>
    tpu.vector_store %arg18[%c0_68, %c96], %171 {strides = array<i32>} : memref<16x128xbf16, #tpu.memory_space<vmem>>, vector<16x32xbf16>,
    %c0_69 = arith.constant 0 : index
    %c0_70 = arith.constant 0 : index
    %173 = vector.load %arg18[%c0_69, %c0_70] : memref<16x128xbf16, #tpu.memory_space<vmem>>, vector<16x128xbf16>
    %c0_71 = arith.constant 0 : index
    %c0_72 = arith.constant 0 : index
    %174 = vector.load %arg9[%c0_71, %c0_72] : memref<128x128xbf16, #tpu.memory_space<vmem>>, vector<128x128xbf16>
    %cst_73 = arith.constant dense<0.000000e+00> : vector<16x128xf32>
    %175 = tpu.matmul %173, %174, %cst_73 {dimension_numbers = #tpu.dot_dimension_numbers<[1], [0], [0], [1], [0, 0, 1, 1], [], []>} : vector<16x128xbf16>, vector<128x128xbf16>, vector<16x128xf32> -> vector<16x128xf32>
    %176 = arith.addf %3, %175 : vector<16x128xf32>
    %c0_74 = arith.constant 0 : index
    %c0_75 = arith.constant 0 : index
    %177 = vector.load %arg10[%c0_74, %c0_75] : memref<1x128xf32, #tpu.memory_space<vmem>>, vector<1x128xf32>
    %178 = vector.broadcast %177 : vector<1x128xf32> to vector<16x128xf32>
    %179 = arith.addf %176, %178 : vector<16x128xf32>
    %cst_76 = arith.constant dense<0.000000e+00> : vector<16xf32>
    %180 = vector.multi_reduction <add>, %179, %cst_76 [1] : vector<16x128xf32> to vector<16xf32>
    %181 = vector.shape_cast %180 : vector<16xf32> to vector<16x1xf32>
    %cst_77 = arith.constant 1.280000e+02 : f32
    %182 = vector.broadcast %cst_77 : f32 to vector<16x1xf32>
    %183 = arith.divf %181, %182 : vector<16x1xf32>
    %184 = vector.broadcast %183 : vector<16x1xf32> to vector<16x128xf32>
    %185 = arith.subf %179, %184 : vector<16x128xf32>
    %186 = arith.mulf %185, %185 : vector<16x128xf32>
    %cst_78 = arith.constant dense<0.000000e+00> : vector<16xf32>
    %187 = vector.multi_reduction <add>, %186, %cst_78 [1] : vector<16x128xf32> to vector<16xf32>
    %188 = vector.shape_cast %187 : vector<16xf32> to vector<16x1xf32>
    %cst_79 = arith.constant 1.280000e+02 : f32
    %189 = vector.broadcast %cst_79 : f32 to vector<16x1xf32>
    %190 = arith.divf %188, %189 : vector<16x1xf32>
    %cst_80 = arith.constant 9.99999974E-6 : f32
    %191 = vector.broadcast %cst_80 : f32 to vector<16x1xf32>
    %192 = arith.addf %190, %191 : vector<16x1xf32>
    %193 = math.rsqrt %192 : vector<16x1xf32>
    %194 = vector.broadcast %193 : vector<16x1xf32> to vector<16x128xf32>
    %195 = arith.mulf %185, %194 : vector<16x128xf32>
    %c0_81 = arith.constant 0 : index
    %c0_82 = arith.constant 0 : index
    %196 = vector.load %arg11[%c0_81, %c0_82] : memref<1x128xf32, #tpu.memory_space<vmem>>, vector<1x128xf32>
    %197 = vector.broadcast %196 : vector<1x128xf32> to vector<16x128xf32>
    %198 = arith.mulf %195, %197 : vector<16x128xf32>
    %c0_83 = arith.constant 0 : index
    %c0_84 = arith.constant 0 : index
    %199 = vector.load %arg12[%c0_83, %c0_84] : memref<1x128xf32, #tpu.memory_space<vmem>>, vector<1x128xf32>
    %200 = vector.broadcast %199 : vector<1x128xf32> to vector<16x128xf32>
    %201 = arith.addf %198, %200 : vector<16x128xf32>
    %202 = arith.truncf %201 : vector<16x128xf32> to vector<16x128xbf16>
    %c0_85 = arith.constant 0 : index
    %c0_86 = arith.constant 0 : index
    %203 = vector.load %arg13[%c0_85, %c0_86] : memref<128x512xbf16, #tpu.memory_space<vmem>>, vector<128x512xbf16>
    %cst_87 = arith.constant dense<0.000000e+00> : vector<16x512xf32>
    %204 = tpu.matmul %202, %203, %cst_87 {dimension_numbers = #tpu.dot_dimension_numbers<[1], [0], [0], [1], [0, 0, 1, 1], [], []>} : vector<16x128xbf16>, vector<128x512xbf16>, vector<16x512xf32> -> vector<16x512xf32>
    %c0_88 = arith.constant 0 : index
    %c0_89 = arith.constant 0 : index
    %205 = vector.load %arg14[%c0_88, %c0_89] : memref<1x512xf32, #tpu.memory_space<vmem>>, vector<1x512xf32>
    %206 = vector.broadcast %205 : vector<1x512xf32> to vector<16x512xf32>
    %207 = arith.addf %204, %206 : vector<16x512xf32>
    %cst_90 = arith.constant 5.000000e-01 : f32
    %208 = vector.broadcast %cst_90 : f32 to vector<16x512xf32>
    %209 = arith.mulf %208, %207 : vector<16x512xf32>
    %cst_91 = arith.constant 4.471500e-02 : f32
    %210 = vector.broadcast %cst_91 : f32 to vector<16x512xf32>
    %211 = arith.mulf %210, %207 : vector<16x512xf32>
    %212 = arith.mulf %211, %207 : vector<16x512xf32>
    %213 = arith.mulf %212, %207 : vector<16x512xf32>
    %214 = arith.addf %207, %213 : vector<16x512xf32>
    %cst_92 = arith.constant 0.797884583 : f32
    %215 = vector.broadcast %cst_92 : f32 to vector<16x512xf32>
    %216 = arith.mulf %215, %214 : vector<16x512xf32>
    %217 = math.tanh %216 : vector<16x512xf32>
    %cst_93 = arith.constant 1.000000e+00 : f32
    %218 = vector.broadcast %cst_93 : f32 to vector<16x512xf32>
    %219 = arith.addf %218, %217 : vector<16x512xf32>
    %220 = arith.mulf %209, %219 : vector<16x512xf32>
    %221 = arith.truncf %220 : vector<16x512xf32> to vector<16x512xbf16>
    %c0_94 = arith.constant 0 : index
    %c0_95 = arith.constant 0 : index
    %222 = vector.load %arg15[%c0_94, %c0_95] : memref<512x128xbf16, #tpu.memory_space<vmem>>, vector<512x128xbf16>
    %cst_96 = arith.constant dense<0.000000e+00> : vector<16x128xf32>
    %223 = tpu.matmul %221, %222, %cst_96 {dimension_numbers = #tpu.dot_dimension_numbers<[1], [0], [0], [1], [0, 0, 1, 1], [], []>} : vector<16x512xbf16>, vector<512x128xbf16>, vector<16x128xf32> -> vector<16x128xf32>
    %c0_97 = arith.constant 0 : index
    %c0_98 = arith.constant 0 : index
    %224 = vector.load %arg16[%c0_97, %c0_98] : memref<1x128xf32, #tpu.memory_space<vmem>>, vector<1x128xf32>
    %225 = vector.broadcast %224 : vector<1x128xf32> to vector<16x128xf32>
    %226 = arith.addf %223, %225 : vector<16x128xf32>
    %227 = arith.addf %179, %226 : vector<16x128xf32>
    %c0_99 = arith.constant 0 : index
    %c0_100 = arith.constant 0 : index
    %c0_101 = arith.constant 0 : index
    %228 = vector.load %arg17[%c0_99, %c0_100, %c0_101] : memref<1x16x128xf32, #tpu.memory_space<vmem>>, vector<1x16x128xf32>
    %229 = vector.shape_cast %228 : vector<1x16x128xf32> to vector<16x128xf32>
    %230 = vector.shape_cast %227 : vector<16x128xf32> to vector<1x16x128xf32>
    tpu.vector_store %arg17[%c0_99, %c0_100, %c0_101], %230 {strides = array<i32>} : memref<1x16x128xf32, #tpu.memory_space<vmem>>, vector<1x16x128xf32>,
    return
  }
  func.func @transform_0(%arg0: i32, %arg1: i32) -> (i32, i32, i32) {
    %c0_i32 = arith.constant 0 : i32
    %c0_i32_0 = arith.constant 0 : i32
    %c0_i32_1 = arith.constant 0 : i32
    return %arg0, %c0_i32, %c0_i32_0 : i32, i32, i32
  }
  func.func @transform_1(%arg0: i32, %arg1: i32) -> (i32, i32, i32) {
    %c0_i32 = arith.constant 0 : i32
    %c0_i32_0 = arith.constant 0 : i32
    return %arg0, %arg1, %c0_i32 : i32, i32, i32
  }
  func.func @transform_2(%arg0: i32, %arg1: i32) -> (i32, i32, i32) {
    %c0_i32 = arith.constant 0 : i32
    %c0_i32_0 = arith.constant 0 : i32
    %c0_i32_1 = arith.constant 0 : i32
    return %arg0, %c0_i32, %c0_i32_0 : i32, i32, i32
  }
  func.func @transform_3(%arg0: i32, %arg1: i32) -> (i32, i32) {
    %c0_i32 = arith.constant 0 : i32
    %c0_i32_0 = arith.constant 0 : i32
    %c0_i32_1 = arith.constant 0 : i32
    return %c0_i32, %c0_i32_0 : i32, i32
  }
  func.func @transform_4(%arg0: i32, %arg1: i32) -> (i32, i32) {
    %c0_i32 = arith.constant 0 : i32
    %c0_i32_0 = arith.constant 0 : i32
    %c0_i32_1 = arith.constant 0 : i32
    return %c0_i32, %c0_i32_0 : i32, i32
  }
  func.func @transform_5(%arg0: i32, %arg1: i32) -> (i32, i32) {
    %c0_i32 = arith.constant 0 : i32
    %c0_i32_0 = arith.constant 0 : i32
    %c0_i32_1 = arith.constant 0 : i32
    return %c0_i32, %c0_i32_0 : i32, i32
  }
  func.func @transform_6(%arg0: i32, %arg1: i32) -> (i32, i32) {
    %c0_i32 = arith.constant 0 : i32
    %c0_i32_0 = arith.constant 0 : i32
    %c0_i32_1 = arith.constant 0 : i32
    return %c0_i32, %c0_i32_0 : i32, i32
  }
  func.func @transform_7(%arg0: i32, %arg1: i32) -> (i32, i32) {
    %c0_i32 = arith.constant 0 : i32
    %c0_i32_0 = arith.constant 0 : i32
    %c0_i32_1 = arith.constant 0 : i32
    return %c0_i32, %c0_i32_0 : i32, i32
  }
  func.func @transform_8(%arg0: i32, %arg1: i32) -> (i32, i32) {
    %c0_i32 = arith.constant 0 : i32
    %c0_i32_0 = arith.constant 0 : i32
    %c0_i32_1 = arith.constant 0 : i32
    return %c0_i32, %c0_i32_0 : i32, i32
  }
  func.func @transform_9(%arg0: i32, %arg1: i32) -> (i32, i32) {
    %c0_i32 = arith.constant 0 : i32
    %c0_i32_0 = arith.constant 0 : i32
    %c0_i32_1 = arith.constant 0 : i32
    return %c0_i32, %c0_i32_0 : i32, i32
  }
  func.func @transform_10(%arg0: i32, %arg1: i32) -> (i32, i32) {
    %c0_i32 = arith.constant 0 : i32
    %c0_i32_0 = arith.constant 0 : i32
    %c0_i32_1 = arith.constant 0 : i32
    return %c0_i32, %c0_i32_0 : i32, i32
  }
  func.func @transform_11(%arg0: i32, %arg1: i32) -> (i32, i32) {
    %c0_i32 = arith.constant 0 : i32
    %c0_i32_0 = arith.constant 0 : i32
    %c0_i32_1 = arith.constant 0 : i32
    return %c0_i32, %c0_i32_0 : i32, i32
  }
  func.func @transform_12(%arg0: i32, %arg1: i32) -> (i32, i32) {
    %c0_i32 = arith.constant 0 : i32
    %c0_i32_0 = arith.constant 0 : i32
    %c0_i32_1 = arith.constant 0 : i32
    return %c0_i32, %c0_i32_0 : i32, i32
  }
  func.func @transform_13(%arg0: i32, %arg1: i32) -> (i32, i32) {
    %c0_i32 = arith.constant 0 : i32
    %c0_i32_0 = arith.constant 0 : i32
    %c0_i32_1 = arith.constant 0 : i32
    return %c0_i32, %c0_i32_0 : i32, i32
  }
  func.func @transform_14(%arg0: i32, %arg1: i32) -> (i32, i32) {
    %c0_i32 = arith.constant 0 : i32
    %c0_i32_0 = arith.constant 0 : i32
    %c0_i32_1 = arith.constant 0 : i32
    return %c0_i32, %c0_i32_0 : i32, i32
  }
  func.func @transform_15(%arg0: i32, %arg1: i32) -> (i32, i32, i32) {
    %c0_i32 = arith.constant 0 : i32
    %c0_i32_0 = arith.constant 0 : i32
    return %arg0, %arg1, %c0_i32 : i32, i32, i32
  }
}

module attributes {stable_mosaic.version = 11 : i64} {
  func.func @_final_ln_kernel(%arg0: memref<32x128xf32, #tpu.memory_space<vmem>>, %arg1: memref<1x128xf32, #tpu.memory_space<vmem>>, %arg2: memref<1x128xf32, #tpu.memory_space<vmem>>, %arg3: memref<32x128xbf16, #tpu.memory_space<vmem>>) attributes {dimension_semantics = [], scalar_prefetch = 0 : i64, scratch_operands = 0 : i64, tpu.core_type = #tpu.core_type<tc>} {
    %c0 = arith.constant 0 : index
    %c0_0 = arith.constant 0 : index
    %0 = vector.load %arg0[%c0, %c0_0] : memref<32x128xf32, #tpu.memory_space<vmem>>, vector<32x128xf32>
    %cst = arith.constant dense<0.000000e+00> : vector<32xf32>
    %1 = vector.multi_reduction <add>, %0, %cst [1] : vector<32x128xf32> to vector<32xf32>
    %2 = vector.shape_cast %1 : vector<32xf32> to vector<32x1xf32>
    %cst_1 = arith.constant 1.280000e+02 : f32
    %3 = vector.broadcast %cst_1 : f32 to vector<32x1xf32>
    %4 = arith.divf %2, %3 : vector<32x1xf32>
    %5 = vector.broadcast %4 : vector<32x1xf32> to vector<32x128xf32>
    %6 = arith.subf %0, %5 : vector<32x128xf32>
    %7 = arith.mulf %6, %6 : vector<32x128xf32>
    %cst_2 = arith.constant dense<0.000000e+00> : vector<32xf32>
    %8 = vector.multi_reduction <add>, %7, %cst_2 [1] : vector<32x128xf32> to vector<32xf32>
    %9 = vector.shape_cast %8 : vector<32xf32> to vector<32x1xf32>
    %cst_3 = arith.constant 1.280000e+02 : f32
    %10 = vector.broadcast %cst_3 : f32 to vector<32x1xf32>
    %11 = arith.divf %9, %10 : vector<32x1xf32>
    %cst_4 = arith.constant 9.99999974E-6 : f32
    %12 = vector.broadcast %cst_4 : f32 to vector<32x1xf32>
    %13 = arith.addf %11, %12 : vector<32x1xf32>
    %14 = math.rsqrt %13 : vector<32x1xf32>
    %15 = vector.broadcast %14 : vector<32x1xf32> to vector<32x128xf32>
    %16 = arith.mulf %6, %15 : vector<32x128xf32>
    %c0_5 = arith.constant 0 : index
    %c0_6 = arith.constant 0 : index
    %17 = vector.load %arg1[%c0_5, %c0_6] : memref<1x128xf32, #tpu.memory_space<vmem>>, vector<1x128xf32>
    %18 = vector.broadcast %17 : vector<1x128xf32> to vector<32x128xf32>
    %19 = arith.mulf %16, %18 : vector<32x128xf32>
    %c0_7 = arith.constant 0 : index
    %c0_8 = arith.constant 0 : index
    %20 = vector.load %arg2[%c0_7, %c0_8] : memref<1x128xf32, #tpu.memory_space<vmem>>, vector<1x128xf32>
    %21 = vector.broadcast %20 : vector<1x128xf32> to vector<32x128xf32>
    %22 = arith.addf %19, %21 : vector<32x128xf32>
    %23 = arith.truncf %22 : vector<32x128xf32> to vector<32x128xbf16>
    %c0_9 = arith.constant 0 : index
    %c0_10 = arith.constant 0 : index
    %24 = vector.load %arg3[%c0_9, %c0_10] : memref<32x128xbf16, #tpu.memory_space<vmem>>, vector<32x128xbf16>
    tpu.vector_store %arg3[%c0_9, %c0_10], %23 {strides = array<i32>} : memref<32x128xbf16, #tpu.memory_space<vmem>>, vector<32x128xbf16>,
    return
  }
}

module attributes {stable_mosaic.version = 11 : i64} {
  func.func @_gpt2_block_kernel(%arg0: i32, %arg1: i32, %arg2: memref<1x16x128xf32, #tpu.memory_space<vmem>>, %arg3: memref<1x16x128xf32, #tpu.memory_space<vmem>>, %arg4: memref<1x1x16xf32, #tpu.memory_space<vmem>>, %arg5: memref<1x128xf32, #tpu.memory_space<vmem>>, %arg6: memref<1x128xf32, #tpu.memory_space<vmem>>, %arg7: memref<128x384xbf16, #tpu.memory_space<vmem>>, %arg8: memref<1x384xf32, #tpu.memory_space<vmem>>, %arg9: memref<128x128xbf16, #tpu.memory_space<vmem>>, %arg10: memref<1x128xf32, #tpu.memory_space<vmem>>, %arg11: memref<1x128xf32, #tpu.memory_space<vmem>>, %arg12: memref<1x128xf32, #tpu.memory_space<vmem>>, %arg13: memref<128x512xbf16, #tpu.memory_space<vmem>>, %arg14: memref<1x512xf32, #tpu.memory_space<vmem>>, %arg15: memref<512x128xbf16, #tpu.memory_space<vmem>>, %arg16: memref<1x128xf32, #tpu.memory_space<vmem>>, %arg17: memref<1x16x128xf32, #tpu.memory_space<vmem>>, %arg18: memref<16x128xbf16, #tpu.memory_space<vmem>>) attributes {dimension_semantics = [#tpu.dimension_semantics<parallel>, #tpu.dimension_semantics<parallel>], iteration_bounds = array<i64: 2, 1>, scalar_prefetch = 0 : i64, scratch_operands = 1 : i64, tpu.core_type = #tpu.core_type<tc>, window_params = [{transform_indices = @transform_0, window_bounds = array<i64: 1, 16, 128>}, {transform_indices = @transform_1, window_bounds = array<i64: 1, 16, 128>}, {transform_indices = @transform_2, window_bounds = array<i64: 1, 1, 16>}, {pipeline_mode = #tpu.pipeline_mode<synchronous>, transform_indices = @transform_3, window_bounds = array<i64: 1, 128>}, {pipeline_mode = #tpu.pipeline_mode<synchronous>, transform_indices = @transform_4, window_bounds = array<i64: 1, 128>}, {pipeline_mode = #tpu.pipeline_mode<synchronous>, transform_indices = @transform_5, window_bounds = array<i64: 128, 384>}, {pipeline_mode = #tpu.pipeline_mode<synchronous>, transform_indices = @transform_6, window_bounds = array<i64: 1, 384>}, {pipeline_mode = #tpu.pipeline_mode<synchronous>, transform_indices = @transform_7, window_bounds = array<i64: 128, 128>}, {pipeline_mode = #tpu.pipeline_mode<synchronous>, transform_indices = @transform_8, window_bounds = array<i64: 1, 128>}, {pipeline_mode = #tpu.pipeline_mode<synchronous>, transform_indices = @transform_9, window_bounds = array<i64: 1, 128>}, {pipeline_mode = #tpu.pipeline_mode<synchronous>, transform_indices = @transform_10, window_bounds = array<i64: 1, 128>}, {pipeline_mode = #tpu.pipeline_mode<synchronous>, transform_indices = @transform_11, window_bounds = array<i64: 128, 512>}, {pipeline_mode = #tpu.pipeline_mode<synchronous>, transform_indices = @transform_12, window_bounds = array<i64: 1, 512>}, {pipeline_mode = #tpu.pipeline_mode<synchronous>, transform_indices = @transform_13, window_bounds = array<i64: 512, 128>}, {pipeline_mode = #tpu.pipeline_mode<synchronous>, transform_indices = @transform_14, window_bounds = array<i64: 1, 128>}, {transform_indices = @transform_15, window_bounds = array<i64: 1, 16, 128>}]} {
    %c0 = arith.constant 0 : index
    %c0_0 = arith.constant 0 : index
    %c0_1 = arith.constant 0 : index
    %0 = vector.load %arg2[%c0, %c0_0, %c0_1] : memref<1x16x128xf32, #tpu.memory_space<vmem>>, vector<1x16x128xf32>
    %1 = vector.shape_cast %0 : vector<1x16x128xf32> to vector<16x128xf32>
    %c0_2 = arith.constant 0 : index
    %c0_3 = arith.constant 0 : index
    %c0_4 = arith.constant 0 : index
    %2 = vector.load %arg3[%c0_2, %c0_3, %c0_4] : memref<1x16x128xf32, #tpu.memory_space<vmem>>, vector<1x16x128xf32>
    %3 = vector.shape_cast %2 : vector<1x16x128xf32> to vector<16x128xf32>
    %c16_i32 = arith.constant 16 : i32
    %4 = arith.muli %arg1, %c16_i32 : i32
    %cst = arith.constant dense<0.000000e+00> : vector<16xf32>
    %5 = vector.multi_reduction <add>, %1, %cst [1] : vector<16x128xf32> to vector<16xf32>
    %6 = vector.shape_cast %5 : vector<16xf32> to vector<16x1xf32>
    %cst_5 = arith.constant 1.280000e+02 : f32
    %7 = vector.broadcast %cst_5 : f32 to vector<16x1xf32>
    %8 = arith.divf %6, %7 : vector<16x1xf32>
    %9 = vector.broadcast %8 : vector<16x1xf32> to vector<16x128xf32>
    %10 = arith.subf %1, %9 : vector<16x128xf32>
    %11 = arith.mulf %10, %10 : vector<16x128xf32>
    %cst_6 = arith.constant dense<0.000000e+00> : vector<16xf32>
    %12 = vector.multi_reduction <add>, %11, %cst_6 [1] : vector<16x128xf32> to vector<16xf32>
    %13 = vector.shape_cast %12 : vector<16xf32> to vector<16x1xf32>
    %cst_7 = arith.constant 1.280000e+02 : f32
    %14 = vector.broadcast %cst_7 : f32 to vector<16x1xf32>
    %15 = arith.divf %13, %14 : vector<16x1xf32>
    %cst_8 = arith.constant 9.99999974E-6 : f32
    %16 = vector.broadcast %cst_8 : f32 to vector<16x1xf32>
    %17 = arith.addf %15, %16 : vector<16x1xf32>
    %18 = math.rsqrt %17 : vector<16x1xf32>
    %19 = vector.broadcast %18 : vector<16x1xf32> to vector<16x128xf32>
    %20 = arith.mulf %10, %19 : vector<16x128xf32>
    %c0_9 = arith.constant 0 : index
    %c0_10 = arith.constant 0 : index
    %21 = vector.load %arg5[%c0_9, %c0_10] : memref<1x128xf32, #tpu.memory_space<vmem>>, vector<1x128xf32>
    %22 = vector.broadcast %21 : vector<1x128xf32> to vector<16x128xf32>
    %23 = arith.mulf %20, %22 : vector<16x128xf32>
    %c0_11 = arith.constant 0 : index
    %c0_12 = arith.constant 0 : index
    %24 = vector.load %arg6[%c0_11, %c0_12] : memref<1x128xf32, #tpu.memory_space<vmem>>, vector<1x128xf32>
    %25 = vector.broadcast %24 : vector<1x128xf32> to vector<16x128xf32>
    %26 = arith.addf %23, %25 : vector<16x128xf32>
    %27 = arith.truncf %26 : vector<16x128xf32> to vector<16x128xbf16>
    %cst_13 = arith.constant dense<0.000000e+00> : vector<16xf32>
    %28 = vector.multi_reduction <add>, %3, %cst_13 [1] : vector<16x128xf32> to vector<16xf32>
    %29 = vector.shape_cast %28 : vector<16xf32> to vector<16x1xf32>
    %cst_14 = arith.constant 1.280000e+02 : f32
    %30 = vector.broadcast %cst_14 : f32 to vector<16x1xf32>
    %31 = arith.divf %29, %30 : vector<16x1xf32>
    %32 = vector.broadcast %31 : vector<16x1xf32> to vector<16x128xf32>
    %33 = arith.subf %3, %32 : vector<16x128xf32>
    %34 = arith.mulf %33, %33 : vector<16x128xf32>
    %cst_15 = arith.constant dense<0.000000e+00> : vector<16xf32>
    %35 = vector.multi_reduction <add>, %34, %cst_15 [1] : vector<16x128xf32> to vector<16xf32>
    %36 = vector.shape_cast %35 : vector<16xf32> to vector<16x1xf32>
    %cst_16 = arith.constant 1.280000e+02 : f32
    %37 = vector.broadcast %cst_16 : f32 to vector<16x1xf32>
    %38 = arith.divf %36, %37 : vector<16x1xf32>
    %cst_17 = arith.constant 9.99999974E-6 : f32
    %39 = vector.broadcast %cst_17 : f32 to vector<16x1xf32>
    %40 = arith.addf %38, %39 : vector<16x1xf32>
    %41 = math.rsqrt %40 : vector<16x1xf32>
    %42 = vector.broadcast %41 : vector<16x1xf32> to vector<16x128xf32>
    %43 = arith.mulf %33, %42 : vector<16x128xf32>
    %c0_18 = arith.constant 0 : index
    %c0_19 = arith.constant 0 : index
    %44 = vector.load %arg5[%c0_18, %c0_19] : memref<1x128xf32, #tpu.memory_space<vmem>>, vector<1x128xf32>
    %45 = vector.broadcast %44 : vector<1x128xf32> to vector<16x128xf32>
    %46 = arith.mulf %43, %45 : vector<16x128xf32>
    %c0_20 = arith.constant 0 : index
    %c0_21 = arith.constant 0 : index
    %47 = vector.load %arg6[%c0_20, %c0_21] : memref<1x128xf32, #tpu.memory_space<vmem>>, vector<1x128xf32>
    %48 = vector.broadcast %47 : vector<1x128xf32> to vector<16x128xf32>
    %49 = arith.addf %46, %48 : vector<16x128xf32>
    %50 = arith.truncf %49 : vector<16x128xf32> to vector<16x128xbf16>
    %c0_22 = arith.constant 0 : index
    %c0_23 = arith.constant 0 : index
    %51 = vector.load %arg7[%c0_22, %c0_23] : memref<128x384xbf16, #tpu.memory_space<vmem>>, vector<128x128xbf16>
    %cst_24 = arith.constant dense<0.000000e+00> : vector<16x128xf32>
    %52 = tpu.matmul %50, %51, %cst_24 {dimension_numbers = #tpu.dot_dimension_numbers<[1], [0], [0], [1], [0, 0, 1, 1], [], []>} : vector<16x128xbf16>, vector<128x128xbf16>, vector<16x128xf32> -> vector<16x128xf32>
    %c0_25 = arith.constant 0 : index
    %c0_26 = arith.constant 0 : index
    %53 = vector.load %arg8[%c0_25, %c0_26] : memref<1x384xf32, #tpu.memory_space<vmem>>, vector<1x128xf32>
    %54 = vector.broadcast %53 : vector<1x128xf32> to vector<16x128xf32>
    %55 = arith.addf %52, %54 : vector<16x128xf32>
    %56 = arith.truncf %55 : vector<16x128xf32> to vector<16x128xbf16>
    %c0_27 = arith.constant 0 : index
    %c128 = arith.constant 128 : index
    %57 = vector.load %arg7[%c0_27, %c128] : memref<128x384xbf16, #tpu.memory_space<vmem>>, vector<128x128xbf16>
    %cst_28 = arith.constant dense<0.000000e+00> : vector<16x128xf32>
    %58 = tpu.matmul %27, %57, %cst_28 {dimension_numbers = #tpu.dot_dimension_numbers<[1], [0], [0], [1], [0, 0, 1, 1], [], []>} : vector<16x128xbf16>, vector<128x128xbf16>, vector<16x128xf32> -> vector<16x128xf32>
    %c0_29 = arith.constant 0 : index
    %c128_30 = arith.constant 128 : index
    %59 = vector.load %arg8[%c0_29, %c128_30] : memref<1x384xf32, #tpu.memory_space<vmem>>, vector<1x128xf32>
    %60 = vector.broadcast %59 : vector<1x128xf32> to vector<16x128xf32>
    %61 = arith.addf %58, %60 : vector<16x128xf32>
    %62 = arith.truncf %61 : vector<16x128xf32> to vector<16x128xbf16>
    %c0_31 = arith.constant 0 : index
    %c256 = arith.constant 256 : index
    %63 = vector.load %arg7[%c0_31, %c256] : memref<128x384xbf16, #tpu.memory_space<vmem>>, vector<128x128xbf16>
    %cst_32 = arith.constant dense<0.000000e+00> : vector<16x128xf32>
    %64 = tpu.matmul %27, %63, %cst_32 {dimension_numbers = #tpu.dot_dimension_numbers<[1], [0], [0], [1], [0, 0, 1, 1], [], []>} : vector<16x128xbf16>, vector<128x128xbf16>, vector<16x128xf32> -> vector<16x128xf32>
    %c0_33 = arith.constant 0 : index
    %c256_34 = arith.constant 256 : index
    %65 = vector.load %arg8[%c0_33, %c256_34] : memref<1x384xf32, #tpu.memory_space<vmem>>, vector<1x128xf32>
    %66 = vector.broadcast %65 : vector<1x128xf32> to vector<16x128xf32>
    %67 = arith.addf %64, %66 : vector<16x128xf32>
    %68 = arith.truncf %67 : vector<16x128xf32> to vector<16x128xbf16>
    %69 = tpu.iota {dimensions = array<i32: 0>} : vector<16x16xi32>
    %70 = vector.broadcast %4 : i32 to vector<16x16xi32>
    %71 = arith.addi %70, %69 : vector<16x16xi32>
    %72 = tpu.iota {dimensions = array<i32: 1>} : vector<16x16xi32>
    %73 = arith.cmpi sle, %72, %71 : vector<16x16xi32>
    %cst_35 = arith.constant 0.000000e+00 : f32
    %cst_36 = arith.constant -1.000000e+30 : f32
    %74 = vector.broadcast %cst_35 : f32 to vector<16x16xf32>
    %75 = vector.broadcast %cst_36 : f32 to vector<16x16xf32>
    %76 = arith.select %73, %74, %75 : vector<16x16xi1>, vector<16x16xf32>
    %c0_37 = arith.constant 0 : index
    %c0_38 = arith.constant 0 : index
    %c0_39 = arith.constant 0 : index
    %77 = vector.load %arg4[%c0_37, %c0_38, %c0_39] : memref<1x1x16xf32, #tpu.memory_space<vmem>>, vector<1x1x16xf32>
    %78 = vector.shape_cast %77 : vector<1x1x16xf32> to vector<1x16xf32>
    %79 = vector.broadcast %78 : vector<1x16xf32> to vector<16x16xf32>
    %80 = arith.addf %76, %79 : vector<16x16xf32>
    %81 = vector.extract_strided_slice %56 {offsets = [0, 0], sizes = [16, 32], strides = [1, 1]} : vector<16x128xbf16> to vector<16x32xbf16>
    %82 = vector.extract_strided_slice %62 {offsets = [0, 0], sizes = [16, 32], strides = [1, 1]} : vector<16x128xbf16> to vector<16x32xbf16>
    %cst_40 = arith.constant dense<0.000000e+00> : vector<16x16xf32>
    %83 = tpu.matmul %81, %82, %cst_40 {dimension_numbers = #tpu.dot_dimension_numbers<[1], [1], [0], [0], [0, 0, 1, 0], [], []>} : vector<16x32xbf16>, vector<16x32xbf16>, vector<16x16xf32> -> vector<16x16xf32>
    %cst_41 = arith.constant 0.176776692 : f32
    %84 = vector.broadcast %cst_41 : f32 to vector<16x16xf32>
    %85 = arith.mulf %83, %84 : vector<16x16xf32>
    %86 = arith.addf %85, %80 : vector<16x16xf32>
    %cst_42 = arith.constant dense<0xFF800000> : vector<16xf32>
    %87 = vector.multi_reduction <maximumf>, %86, %cst_42 [1] : vector<16x16xf32> to vector<16xf32>
    %88 = vector.shape_cast %87 : vector<16xf32> to vector<16x1xf32>
    %89 = vector.broadcast %88 : vector<16x1xf32> to vector<16x16xf32>
    %90 = arith.subf %86, %89 : vector<16x16xf32>
    %91 = math.exp %90 : vector<16x16xf32>
    %cst_43 = arith.constant dense<0.000000e+00> : vector<16xf32>
    %92 = vector.multi_reduction <add>, %91, %cst_43 [1] : vector<16x16xf32> to vector<16xf32>
    %93 = vector.shape_cast %92 : vector<16xf32> to vector<16x1xf32>
    %cst_44 = arith.constant 1.000000e-30 : f32
    %94 = vector.broadcast %cst_44 : f32 to vector<16x1xf32>
    %95 = arith.maximumf %93, %94 : vector<16x1xf32>
    %96 = tpu.reciprocal %95 {approx = true} : vector<16x1xf32> -> vector<16x1xf32>
    %97 = vector.broadcast %96 : vector<16x1xf32> to vector<16x16xf32>
    %98 = arith.mulf %91, %97 : vector<16x16xf32>
    %99 = arith.truncf %98 : vector<16x16xf32> to vector<16x16xbf16>
    %100 = vector.extract_strided_slice %68 {offsets = [0, 0], sizes = [16, 32], strides = [1, 1]} : vector<16x128xbf16> to vector<16x32xbf16>
    %cst_45 = arith.constant dense<0.000000e+00> : vector<16x32xf32>
    %101 = tpu.matmul %99, %100, %cst_45 {dimension_numbers = #tpu.dot_dimension_numbers<[1], [0], [0], [1], [0, 0, 1, 1], [], []>} : vector<16x16xbf16>, vector<16x32xbf16>, vector<16x32xf32> -> vector<16x32xf32>
    %102 = arith.truncf %101 : vector<16x32xf32> to vector<16x32xbf16>
    %c0_46 = arith.constant 0 : index
    %c0_47 = arith.constant 0 : index
    %103 = vector.load %arg18[%c0_46, %c0_47] : memref<16x128xbf16, #tpu.memory_space<vmem>>, vector<16x32xbf16>
    tpu.vector_store %arg18[%c0_46, %c0_47], %102 {strides = array<i32>} : memref<16x128xbf16, #tpu.memory_space<vmem>>, vector<16x32xbf16>,
    %104 = vector.extract_strided_slice %56 {offsets = [0, 32], sizes = [16, 32], strides = [1, 1]} : vector<16x128xbf16> to vector<16x32xbf16>
    %105 = vector.extract_strided_slice %62 {offsets = [0, 32], sizes = [16, 32], strides = [1, 1]} : vector<16x128xbf16> to vector<16x32xbf16>
    %cst_48 = arith.constant dense<0.000000e+00> : vector<16x16xf32>
    %106 = tpu.matmul %104, %105, %cst_48 {dimension_numbers = #tpu.dot_dimension_numbers<[1], [1], [0], [0], [0, 0, 1, 0], [], []>} : vector<16x32xbf16>, vector<16x32xbf16>, vector<16x16xf32> -> vector<16x16xf32>
    %cst_49 = arith.constant 0.176776692 : f32
    %107 = vector.broadcast %cst_49 : f32 to vector<16x16xf32>
    %108 = arith.mulf %106, %107 : vector<16x16xf32>
    %109 = arith.addf %108, %80 : vector<16x16xf32>
    %cst_50 = arith.constant dense<0xFF800000> : vector<16xf32>
    %110 = vector.multi_reduction <maximumf>, %109, %cst_50 [1] : vector<16x16xf32> to vector<16xf32>
    %111 = vector.shape_cast %110 : vector<16xf32> to vector<16x1xf32>
    %112 = vector.broadcast %111 : vector<16x1xf32> to vector<16x16xf32>
    %113 = arith.subf %109, %112 : vector<16x16xf32>
    %114 = math.exp %113 : vector<16x16xf32>
    %cst_51 = arith.constant dense<0.000000e+00> : vector<16xf32>
    %115 = vector.multi_reduction <add>, %114, %cst_51 [1] : vector<16x16xf32> to vector<16xf32>
    %116 = vector.shape_cast %115 : vector<16xf32> to vector<16x1xf32>
    %cst_52 = arith.constant 1.000000e-30 : f32
    %117 = vector.broadcast %cst_52 : f32 to vector<16x1xf32>
    %118 = arith.maximumf %116, %117 : vector<16x1xf32>
    %119 = tpu.reciprocal %118 {approx = true} : vector<16x1xf32> -> vector<16x1xf32>
    %120 = vector.broadcast %119 : vector<16x1xf32> to vector<16x16xf32>
    %121 = arith.mulf %114, %120 : vector<16x16xf32>
    %122 = arith.truncf %121 : vector<16x16xf32> to vector<16x16xbf16>
    %123 = vector.extract_strided_slice %68 {offsets = [0, 32], sizes = [16, 32], strides = [1, 1]} : vector<16x128xbf16> to vector<16x32xbf16>
    %cst_53 = arith.constant dense<0.000000e+00> : vector<16x32xf32>
    %124 = tpu.matmul %122, %123, %cst_53 {dimension_numbers = #tpu.dot_dimension_numbers<[1], [0], [0], [1], [0, 0, 1, 1], [], []>} : vector<16x16xbf16>, vector<16x32xbf16>, vector<16x32xf32> -> vector<16x32xf32>
    %125 = arith.truncf %124 : vector<16x32xf32> to vector<16x32xbf16>
    %c0_54 = arith.constant 0 : index
    %c32 = arith.constant 32 : index
    %126 = vector.load %arg18[%c0_54, %c32] : memref<16x128xbf16, #tpu.memory_space<vmem>>, vector<16x32xbf16>
    tpu.vector_store %arg18[%c0_54, %c32], %125 {strides = array<i32>} : memref<16x128xbf16, #tpu.memory_space<vmem>>, vector<16x32xbf16>,
    %127 = vector.extract_strided_slice %56 {offsets = [0, 64], sizes = [16, 32], strides = [1, 1]} : vector<16x128xbf16> to vector<16x32xbf16>
    %128 = vector.extract_strided_slice %62 {offsets = [0, 64], sizes = [16, 32], strides = [1, 1]} : vector<16x128xbf16> to vector<16x32xbf16>
    %cst_55 = arith.constant dense<0.000000e+00> : vector<16x16xf32>
    %129 = tpu.matmul %127, %128, %cst_55 {dimension_numbers = #tpu.dot_dimension_numbers<[1], [1], [0], [0], [0, 0, 1, 0], [], []>} : vector<16x32xbf16>, vector<16x32xbf16>, vector<16x16xf32> -> vector<16x16xf32>
    %cst_56 = arith.constant 0.176776692 : f32
    %130 = vector.broadcast %cst_56 : f32 to vector<16x16xf32>
    %131 = arith.mulf %129, %130 : vector<16x16xf32>
    %132 = arith.addf %131, %80 : vector<16x16xf32>
    %cst_57 = arith.constant dense<0xFF800000> : vector<16xf32>
    %133 = vector.multi_reduction <maximumf>, %132, %cst_57 [1] : vector<16x16xf32> to vector<16xf32>
    %134 = vector.shape_cast %133 : vector<16xf32> to vector<16x1xf32>
    %135 = vector.broadcast %134 : vector<16x1xf32> to vector<16x16xf32>
    %136 = arith.subf %132, %135 : vector<16x16xf32>
    %137 = math.exp %136 : vector<16x16xf32>
    %cst_58 = arith.constant dense<0.000000e+00> : vector<16xf32>
    %138 = vector.multi_reduction <add>, %137, %cst_58 [1] : vector<16x16xf32> to vector<16xf32>
    %139 = vector.shape_cast %138 : vector<16xf32> to vector<16x1xf32>
    %cst_59 = arith.constant 1.000000e-30 : f32
    %140 = vector.broadcast %cst_59 : f32 to vector<16x1xf32>
    %141 = arith.maximumf %139, %140 : vector<16x1xf32>
    %142 = tpu.reciprocal %141 {approx = true} : vector<16x1xf32> -> vector<16x1xf32>
    %143 = vector.broadcast %142 : vector<16x1xf32> to vector<16x16xf32>
    %144 = arith.mulf %137, %143 : vector<16x16xf32>
    %145 = arith.truncf %144 : vector<16x16xf32> to vector<16x16xbf16>
    %146 = vector.extract_strided_slice %68 {offsets = [0, 64], sizes = [16, 32], strides = [1, 1]} : vector<16x128xbf16> to vector<16x32xbf16>
    %cst_60 = arith.constant dense<0.000000e+00> : vector<16x32xf32>
    %147 = tpu.matmul %145, %146, %cst_60 {dimension_numbers = #tpu.dot_dimension_numbers<[1], [0], [0], [1], [0, 0, 1, 1], [], []>} : vector<16x16xbf16>, vector<16x32xbf16>, vector<16x32xf32> -> vector<16x32xf32>
    %148 = arith.truncf %147 : vector<16x32xf32> to vector<16x32xbf16>
    %c0_61 = arith.constant 0 : index
    %c64 = arith.constant 64 : index
    %149 = vector.load %arg18[%c0_61, %c64] : memref<16x128xbf16, #tpu.memory_space<vmem>>, vector<16x32xbf16>
    tpu.vector_store %arg18[%c0_61, %c64], %148 {strides = array<i32>} : memref<16x128xbf16, #tpu.memory_space<vmem>>, vector<16x32xbf16>,
    %150 = vector.extract_strided_slice %56 {offsets = [0, 96], sizes = [16, 32], strides = [1, 1]} : vector<16x128xbf16> to vector<16x32xbf16>
    %151 = vector.extract_strided_slice %62 {offsets = [0, 96], sizes = [16, 32], strides = [1, 1]} : vector<16x128xbf16> to vector<16x32xbf16>
    %cst_62 = arith.constant dense<0.000000e+00> : vector<16x16xf32>
    %152 = tpu.matmul %150, %151, %cst_62 {dimension_numbers = #tpu.dot_dimension_numbers<[1], [1], [0], [0], [0, 0, 1, 0], [], []>} : vector<16x32xbf16>, vector<16x32xbf16>, vector<16x16xf32> -> vector<16x16xf32>
    %cst_63 = arith.constant 0.176776692 : f32
    %153 = vector.broadcast %cst_63 : f32 to vector<16x16xf32>
    %154 = arith.mulf %152, %153 : vector<16x16xf32>
    %155 = arith.addf %154, %80 : vector<16x16xf32>
    %cst_64 = arith.constant dense<0xFF800000> : vector<16xf32>
    %156 = vector.multi_reduction <maximumf>, %155, %cst_64 [1] : vector<16x16xf32> to vector<16xf32>
    %157 = vector.shape_cast %156 : vector<16xf32> to vector<16x1xf32>
    %158 = vector.broadcast %157 : vector<16x1xf32> to vector<16x16xf32>
    %159 = arith.subf %155, %158 : vector<16x16xf32>
    %160 = math.exp %159 : vector<16x16xf32>
    %cst_65 = arith.constant dense<0.000000e+00> : vector<16xf32>
    %161 = vector.multi_reduction <add>, %160, %cst_65 [1] : vector<16x16xf32> to vector<16xf32>
    %162 = vector.shape_cast %161 : vector<16xf32> to vector<16x1xf32>
    %cst_66 = arith.constant 1.000000e-30 : f32
    %163 = vector.broadcast %cst_66 : f32 to vector<16x1xf32>
    %164 = arith.maximumf %162, %163 : vector<16x1xf32>
    %165 = tpu.reciprocal %164 {approx = true} : vector<16x1xf32> -> vector<16x1xf32>
    %166 = vector.broadcast %165 : vector<16x1xf32> to vector<16x16xf32>
    %167 = arith.mulf %160, %166 : vector<16x16xf32>
    %168 = arith.truncf %167 : vector<16x16xf32> to vector<16x16xbf16>
    %169 = vector.extract_strided_slice %68 {offsets = [0, 96], sizes = [16, 32], strides = [1, 1]} : vector<16x128xbf16> to vector<16x32xbf16>
    %cst_67 = arith.constant dense<0.000000e+00> : vector<16x32xf32>
    %170 = tpu.matmul %168, %169, %cst_67 {dimension_numbers = #tpu.dot_dimension_numbers<[1], [0], [0], [1], [0, 0, 1, 1], [], []>} : vector<16x16xbf16>, vector<16x32xbf16>, vector<16x32xf32> -> vector<16x32xf32>
    %171 = arith.truncf %170 : vector<16x32xf32> to vector<16x32xbf16>
    %c0_68 = arith.constant 0 : index
    %c96 = arith.constant 96 : index
    %172 = vector.load %arg18[%c0_68, %c96] : memref<16x128xbf16, #tpu.memory_space<vmem>>, vector<16x32xbf16>
    tpu.vector_store %arg18[%c0_68, %c96], %171 {strides = array<i32>} : memref<16x128xbf16, #tpu.memory_space<vmem>>, vector<16x32xbf16>,
    %c0_69 = arith.constant 0 : index
    %c0_70 = arith.constant 0 : index
    %173 = vector.load %arg18[%c0_69, %c0_70] : memref<16x128xbf16, #tpu.memory_space<vmem>>, vector<16x128xbf16>
    %c0_71 = arith.constant 0 : index
    %c0_72 = arith.constant 0 : index
    %174 = vector.load %arg9[%c0_71, %c0_72] : memref<128x128xbf16, #tpu.memory_space<vmem>>, vector<128x128xbf16>
    %cst_73 = arith.constant dense<0.000000e+00> : vector<16x128xf32>
    %175 = tpu.matmul %173, %174, %cst_73 {dimension_numbers = #tpu.dot_dimension_numbers<[1], [0], [0], [1], [0, 0, 1, 1], [], []>} : vector<16x128xbf16>, vector<128x128xbf16>, vector<16x128xf32> -> vector<16x128xf32>
    %176 = arith.addf %3, %175 : vector<16x128xf32>
    %c0_74 = arith.constant 0 : index
    %c0_75 = arith.constant 0 : index
    %177 = vector.load %arg10[%c0_74, %c0_75] : memref<1x128xf32, #tpu.memory_space<vmem>>, vector<1x128xf32>
    %178 = vector.broadcast %177 : vector<1x128xf32> to vector<16x128xf32>
    %179 = arith.addf %176, %178 : vector<16x128xf32>
    %cst_76 = arith.constant dense<0.000000e+00> : vector<16xf32>
    %180 = vector.multi_reduction <add>, %179, %cst_76 [1] : vector<16x128xf32> to vector<16xf32>
    %181 = vector.shape_cast %180 : vector<16xf32> to vector<16x1xf32>
    %cst_77 = arith.constant 1.280000e+02 : f32
    %182 = vector.broadcast %cst_77 : f32 to vector<16x1xf32>
    %183 = arith.divf %181, %182 : vector<16x1xf32>
    %184 = vector.broadcast %183 : vector<16x1xf32> to vector<16x128xf32>
    %185 = arith.subf %179, %184 : vector<16x128xf32>
    %186 = arith.mulf %185, %185 : vector<16x128xf32>
    %cst_78 = arith.constant dense<0.000000e+00> : vector<16xf32>
    %187 = vector.multi_reduction <add>, %186, %cst_78 [1] : vector<16x128xf32> to vector<16xf32>
    %188 = vector.shape_cast %187 : vector<16xf32> to vector<16x1xf32>
    %cst_79 = arith.constant 1.280000e+02 : f32
    %189 = vector.broadcast %cst_79 : f32 to vector<16x1xf32>
    %190 = arith.divf %188, %189 : vector<16x1xf32>
    %cst_80 = arith.constant 9.99999974E-6 : f32
    %191 = vector.broadcast %cst_80 : f32 to vector<16x1xf32>
    %192 = arith.addf %190, %191 : vector<16x1xf32>
    %193 = math.rsqrt %192 : vector<16x1xf32>
    %194 = vector.broadcast %193 : vector<16x1xf32> to vector<16x128xf32>
    %195 = arith.mulf %185, %194 : vector<16x128xf32>
    %c0_81 = arith.constant 0 : index
    %c0_82 = arith.constant 0 : index
    %196 = vector.load %arg11[%c0_81, %c0_82] : memref<1x128xf32, #tpu.memory_space<vmem>>, vector<1x128xf32>
    %197 = vector.broadcast %196 : vector<1x128xf32> to vector<16x128xf32>
    %198 = arith.mulf %195, %197 : vector<16x128xf32>
    %c0_83 = arith.constant 0 : index
    %c0_84 = arith.constant 0 : index
    %199 = vector.load %arg12[%c0_83, %c0_84] : memref<1x128xf32, #tpu.memory_space<vmem>>, vector<1x128xf32>
    %200 = vector.broadcast %199 : vector<1x128xf32> to vector<16x128xf32>
    %201 = arith.addf %198, %200 : vector<16x128xf32>
    %202 = arith.truncf %201 : vector<16x128xf32> to vector<16x128xbf16>
    %c0_85 = arith.constant 0 : index
    %c0_86 = arith.constant 0 : index
    %203 = vector.load %arg13[%c0_85, %c0_86] : memref<128x512xbf16, #tpu.memory_space<vmem>>, vector<128x512xbf16>
    %cst_87 = arith.constant dense<0.000000e+00> : vector<16x512xf32>
    %204 = tpu.matmul %202, %203, %cst_87 {dimension_numbers = #tpu.dot_dimension_numbers<[1], [0], [0], [1], [0, 0, 1, 1], [], []>} : vector<16x128xbf16>, vector<128x512xbf16>, vector<16x512xf32> -> vector<16x512xf32>
    %c0_88 = arith.constant 0 : index
    %c0_89 = arith.constant 0 : index
    %205 = vector.load %arg14[%c0_88, %c0_89] : memref<1x512xf32, #tpu.memory_space<vmem>>, vector<1x512xf32>
    %206 = vector.broadcast %205 : vector<1x512xf32> to vector<16x512xf32>
    %207 = arith.addf %204, %206 : vector<16x512xf32>
    %cst_90 = arith.constant 5.000000e-01 : f32
    %208 = vector.broadcast %cst_90 : f32 to vector<16x512xf32>
    %209 = arith.mulf %208, %207 : vector<16x512xf32>
    %cst_91 = arith.constant 4.471500e-02 : f32
    %210 = vector.broadcast %cst_91 : f32 to vector<16x512xf32>
    %211 = arith.mulf %210, %207 : vector<16x512xf32>
    %212 = arith.mulf %211, %207 : vector<16x512xf32>
    %213 = arith.mulf %212, %207 : vector<16x512xf32>
    %214 = arith.addf %207, %213 : vector<16x512xf32>
    %cst_92 = arith.constant 0.797884583 : f32
    %215 = vector.broadcast %cst_92 : f32 to vector<16x512xf32>
    %216 = arith.mulf %215, %214 : vector<16x512xf32>
    %217 = math.tanh %216 : vector<16x512xf32>
    %cst_93 = arith.constant 1.000000e+00 : f32
    %218 = vector.broadcast %cst_93 : f32 to vector<16x512xf32>
    %219 = arith.addf %218, %217 : vector<16x512xf32>
    %220 = arith.mulf %209, %219 : vector<16x512xf32>
    %221 = arith.truncf %220 : vector<16x512xf32> to vector<16x512xbf16>
    %c0_94 = arith.constant 0 : index
    %c0_95 = arith.constant 0 : index
    %222 = vector.load %arg15[%c0_94, %c0_95] : memref<512x128xbf16, #tpu.memory_space<vmem>>, vector<512x128xbf16>
    %cst_96 = arith.constant dense<0.000000e+00> : vector<16x128xf32>
    %223 = tpu.matmul %221, %222, %cst_96 {dimension_numbers = #tpu.dot_dimension_numbers<[1], [0], [0], [1], [0, 0, 1, 1], [], []>} : vector<16x512xbf16>, vector<512x128xbf16>, vector<16x128xf32> -> vector<16x128xf32>
    %c0_97 = arith.constant 0 : index
    %c0_98 = arith.constant 0 : index
    %224 = vector.load %arg16[%c0_97, %c0_98] : memref<1x128xf32, #tpu.memory_space<vmem>>, vector<1x128xf32>
    %225 = vector.broadcast %224 : vector<1x128xf32> to vector<16x128xf32>
    %226 = arith.addf %223, %225 : vector<16x128xf32>
    %227 = arith.addf %179, %226 : vector<16x128xf32>
    %c0_99 = arith.constant 0 : index
    %c0_100 = arith.constant 0 : index
    %c0_101 = arith.constant 0 : index
    %228 = vector.load %arg17[%c0_99, %c0_100, %c0_101] : memref<1x16x128xf32, #tpu.memory_space<vmem>>, vector<1x16x128xf32>
    %229 = vector.shape_cast %228 : vector<1x16x128xf32> to vector<16x128xf32>
    %230 = vector.shape_cast %227 : vector<16x128xf32> to vector<1x16x128xf32>
    tpu.vector_store %arg17[%c0_99, %c0_100, %c0_101], %230 {strides = array<i32>} : memref<1x16x128xf32, #tpu.memory_space<vmem>>, vector<1x16x128xf32>,
    return
  }
  func.func @transform_0(%arg0: i32, %arg1: i32) -> (i32, i32, i32) {
    %c0_i32 = arith.constant 0 : i32
    %c0_i32_0 = arith.constant 0 : i32
    %c0_i32_1 = arith.constant 0 : i32
    return %arg0, %c0_i32, %c0_i32_0 : i32, i32, i32
  }
  func.func @transform_1(%arg0: i32, %arg1: i32) -> (i32, i32, i32) {
    %c0_i32 = arith.constant 0 : i32
    %c0_i32_0 = arith.constant 0 : i32
    return %arg0, %arg1, %c0_i32 : i32, i32, i32
  }
  func.func @transform_2(%arg0: i32, %arg1: i32) -> (i32, i32, i32) {
    %c0_i32 = arith.constant 0 : i32
    %c0_i32_0 = arith.constant 0 : i32
    %c0_i32_1 = arith.constant 0 : i32
    return %arg0, %c0_i32, %c0_i32_0 : i32, i32, i32
  }
  func.func @transform_3(%arg0: i32, %arg1: i32) -> (i32, i32) {
    %c0_i32 = arith.constant 0 : i32
    %c0_i32_0 = arith.constant 0 : i32
    %c0_i32_1 = arith.constant 0 : i32
    return %c0_i32, %c0_i32_0 : i32, i32
  }
  func.func @transform_4(%arg0: i32, %arg1: i32) -> (i32, i32) {
    %c0_i32 = arith.constant 0 : i32
    %c0_i32_0 = arith.constant 0 : i32
    %c0_i32_1 = arith.constant 0 : i32
    return %c0_i32, %c0_i32_0 : i32, i32
  }
  func.func @transform_5(%arg0: i32, %arg1: i32) -> (i32, i32) {
    %c0_i32 = arith.constant 0 : i32
    %c0_i32_0 = arith.constant 0 : i32
    %c0_i32_1 = arith.constant 0 : i32
    return %c0_i32, %c0_i32_0 : i32, i32
  }
  func.func @transform_6(%arg0: i32, %arg1: i32) -> (i32, i32) {
    %c0_i32 = arith.constant 0 : i32
    %c0_i32_0 = arith.constant 0 : i32
    %c0_i32_1 = arith.constant 0 : i32
    return %c0_i32, %c0_i32_0 : i32, i32
  }
  func.func @transform_7(%arg0: i32, %arg1: i32) -> (i32, i32) {
    %c0_i32 = arith.constant 0 : i32
    %c0_i32_0 = arith.constant 0 : i32
    %c0_i32_1 = arith.constant 0 : i32
    return %c0_i32, %c0_i32_0 : i32, i32
  }
  func.func @transform_8(%arg0: i32, %arg1: i32) -> (i32, i32) {
    %c0_i32 = arith.constant 0 : i32
    %c0_i32_0 = arith.constant 0 : i32
    %c0_i32_1 = arith.constant 0 : i32
    return %c0_i32, %c0_i32_0 : i32, i32
  }
  func.func @transform_9(%arg0: i32, %arg1: i32) -> (i32, i32) {
    %c0_i32 = arith.constant 0 : i32
    %c0_i32_0 = arith.constant 0 : i32
    %c0_i32_1 = arith.constant 0 : i32
    return %c0_i32, %c0_i32_0 : i32, i32
  }
  func.func @transform_10(%arg0: i32, %arg1: i32) -> (i32, i32) {
    %c0_i32 = arith.constant 0 : i32
    %c0_i32_0 = arith.constant 0 : i32
    %c0_i32_1 = arith.constant 0 : i32
    return %c0_i32, %c0_i32_0 : i32, i32
  }
  func.func @transform_11(%arg0: i32, %arg1: i32) -> (i32, i32) {
    %c0_i32 = arith.constant 0 : i32
    %c0_i32_0 = arith.constant 0 : i32
    %c0_i32_1 = arith.constant 0 : i32
    return %c0_i32, %c0_i32_0 : i32, i32
  }
  func.func @transform_12(%arg0: i32, %arg1: i32) -> (i32, i32) {
    %c0_i32 = arith.constant 0 : i32
    %c0_i32_0 = arith.constant 0 : i32
    %c0_i32_1 = arith.constant 0 : i32
    return %c0_i32, %c0_i32_0 : i32, i32
  }
  func.func @transform_13(%arg0: i32, %arg1: i32) -> (i32, i32) {
    %c0_i32 = arith.constant 0 : i32
    %c0_i32_0 = arith.constant 0 : i32
    %c0_i32_1 = arith.constant 0 : i32
    return %c0_i32, %c0_i32_0 : i32, i32
  }
  func.func @transform_14(%arg0: i32, %arg1: i32) -> (i32, i32) {
    %c0_i32 = arith.constant 0 : i32
    %c0_i32_0 = arith.constant 0 : i32
    %c0_i32_1 = arith.constant 0 : i32
    return %c0_i32, %c0_i32_0 : i32, i32
  }
  func.func @transform_15(%arg0: i32, %arg1: i32) -> (i32, i32, i32) {
    %c0_i32 = arith.constant 0 : i32
    %c0_i32_0 = arith.constant 0 : i32
    return %arg0, %arg1, %c0_i32 : i32, i32, i32
  }
}

module attributes {stable_mosaic.version = 11 : i64} {
  func.func @_lmhead_kernel(%arg0: i32, %arg1: memref<32x128xbf16, #tpu.memory_space<vmem>>, %arg2: memref<128x256xbf16, #tpu.memory_space<vmem>>, %arg3: memref<32x256xf32, #tpu.memory_space<vmem>>) attributes {dimension_semantics = [#tpu.dimension_semantics<parallel>], iteration_bounds = array<i64: 1>, scalar_prefetch = 0 : i64, scratch_operands = 0 : i64, tpu.core_type = #tpu.core_type<tc>, window_params = [{pipeline_mode = #tpu.pipeline_mode<synchronous>, transform_indices = @transform_0, window_bounds = array<i64: 32, 128>}, {transform_indices = @transform_1, window_bounds = array<i64: 128, 256>}, {transform_indices = @transform_2, window_bounds = array<i64: 32, 256>}]} {
    %c0 = arith.constant 0 : index
    %c0_0 = arith.constant 0 : index
    %0 = vector.load %arg1[%c0, %c0_0] : memref<32x128xbf16, #tpu.memory_space<vmem>>, vector<32x128xbf16>
    %c0_1 = arith.constant 0 : index
    %c0_2 = arith.constant 0 : index
    %1 = vector.load %arg2[%c0_1, %c0_2] : memref<128x256xbf16, #tpu.memory_space<vmem>>, vector<128x256xbf16>
    %cst = arith.constant dense<0.000000e+00> : vector<32x256xf32>
    %2 = tpu.matmul %0, %1, %cst {dimension_numbers = #tpu.dot_dimension_numbers<[1], [0], [0], [1], [0, 0, 1, 1], [], []>} : vector<32x128xbf16>, vector<128x256xbf16>, vector<32x256xf32> -> vector<32x256xf32>
    %c0_3 = arith.constant 0 : index
    %c0_4 = arith.constant 0 : index
    %3 = vector.load %arg3[%c0_3, %c0_4] : memref<32x256xf32, #tpu.memory_space<vmem>>, vector<32x256xf32>
    tpu.vector_store %arg3[%c0_3, %c0_4], %2 {strides = array<i32>} : memref<32x256xf32, #tpu.memory_space<vmem>>, vector<32x256xf32>,
    return
  }
  func.func @transform_0(%arg0: i32) -> (i32, i32) {
    %c0_i32 = arith.constant 0 : i32
    %c0_i32_0 = arith.constant 0 : i32
    %c0_i32_1 = arith.constant 0 : i32
    return %c0_i32, %c0_i32_0 : i32, i32
  }
  func.func @transform_1(%arg0: i32) -> (i32, i32) {
    %c0_i32 = arith.constant 0 : i32
    %c0_i32_0 = arith.constant 0 : i32
    return %c0_i32, %arg0 : i32, i32
  }
  func.func @transform_2(%arg0: i32) -> (i32, i32) {
    %c0_i32 = arith.constant 0 : i32
    %c0_i32_0 = arith.constant 0 : i32
    return %c0_i32, %arg0 : i32, i32
  }
}

</mosaic_0001>

<bundles_post_ra>
// kernel: _lambda_.8
= control target key start
LH: loop header
LB: loop body
LE: loop exit
PB: predicated region body
PF: predicated region fallthrough
CT: control target
= control target key end

     0   :  { %v157_v4 = vmov 128.0   ;;  %s222_s0 = inlined_call_operand.vmem [shape: f32[32,128], index: 0, kind: input, shape index: {}]   ;;  %s223_s1 = inlined_call_operand.vmem [shape: f32[1,128], index: 1, kind: input, shape index: {}]   ;;  %s224_s2 = inlined_call_operand.vmem [shape: f32[1,128], index: 2, kind: input, shape index: {}]   ;;  %s225_s3 = inlined_call_operand.vmem [shape: bf16[32,128], index: 3, kind: output, shape index: {}]  }
   0x1   :  { %v16_v0 = vld [vmem:[%s222_s0 + $0x10] sm:$0xff]  ;;  %v14_v1 = vld [vmem:[%s222_s0] sm:$0xff]  ;;  %v17_v2 = vld [vmem:[%s222_s0 + $0x18] sm:$0xff]  ;;  %147 = vrcp.f32 %v157_v4 }
   0x2   :  { %22 = vadd.xlane.f32.xlu1 %v16_v0  ;;  %18 = vadd.xlane.f32.xlu0 %v14_v1  ;;  %v15_v3 = vld [vmem:[%s222_s0 + $0x8] sm:$0xff]  ;;  %v145_v62 = vld [vmem:[%s223_s1] ss:$0 sm:$0xff] }
   0x7   :  { %v148_v5 = vpop.eup %147 }
   0x8   :  { %v27_v6 = vmul.f32 128.0, %v148_v5  ;;  %vm31_vm0 = vweird.f32 %v148_v5 }
   0xa   :  { %24 = vadd.xlane.f32.xlu1 %v17_v2  ;;  %20 = vadd.xlane.f32.xlu0 %v15_v3  ;;  %v28_v7 = vsub.f32 1.0, %v27_v6 }
   0xc   :  { %v29_v8 = vmul.f32 %v148_v5, %v28_v7 }
   0xe   :  { %v30_v9 = vadd.f32 %v148_v5, %v29_v8 }
  0x10   :  { %v32_v10 = vsel %vm31_vm0, %v148_v5, %v30_v9  ;;  %v146_v5 = vld [vmem:[%s224_s2] ss:$0 sm:$0xff] }
  0x75   :  { %v23_v11 = vpop.xlane.xlu1 %22  ;;  %v19_v12 = vpop.xlane.xlu0 %18 }
  0x76   :  { %v35_v13 = vmul.f32 %v32_v10, %v23_v11  ;;  %v33_v14 = vmul.f32 %v32_v10, %v19_v12 }
  0x78   :  { %v190_v15 = vsub.f32 %v16_v0, %v35_v13  ;;  %v192_v16 = vsub.f32 %v14_v1, %v33_v14 }
  0x7a   :  { %v43_v17 = vmul.f32 %v190_v15, %v190_v15  ;;  %v41_v18 = vmul.f32 %v192_v16, %v192_v16 }
  0x7c   :  { %49 = vadd.xlane.f32.xlu0 %v43_v17  ;;  %45 = vadd.xlane.f32.xlu2 %v41_v18 }
  0x7d   :  { %v25_v19 = vpop.xlane.xlu1 %24  ;;  %v21_v20 = vpop.xlane.xlu0 %20 }
  0x7e   :  { %v36_v21 = vmul.f32 %v32_v10, %v25_v19  ;;  %v34_v22 = vmul.f32 %v32_v10, %v21_v20 }
  0x80   :  { %v198_v23 = vsub.f32 %v17_v2, %v36_v21  ;;  %v200_v24 = vsub.f32 %v15_v3, %v34_v22 }
  0x82   :  { %v44_v25 = vmul.f32 %v198_v23, %v198_v23  ;;  %v42_v26 = vmul.f32 %v200_v24, %v200_v24 }
  0x84   :  { %51 = vadd.xlane.f32.xlu1 %v44_v25  ;;  %47 = vadd.xlane.f32.xlu2 %v42_v26 }
  0xef   :  { %v46_v27 = vpop.xlane.xlu2 %45  ;;  %v50_v28 = vpop.xlane.xlu0 %49 }
  0xf0   :  { %v53_v29 = vmul.f32 %v46_v27, %v32_v10  ;;  %v55_v30 = vmul.f32 %v50_v28, %v32_v10 }
  0xf2   :  { %v57_v31 = vadd.f32 1e-05, %v53_v29  ;;  %v59_v32 = vadd.f32 1e-05, %v55_v30 }
  0xf4   :  { %149 = vrsqrt.f32 %v57_v31  ;;  %vm87_vm3 = vweird.f32 %v59_v32  ;;  %vm67_vm4 = vweird.f32 %v57_v31 }
  0xf5   :  { %151 = vrsqrt.f32 %v59_v32 }
  0xf7   :  { %v52_v33 = vpop.xlane.xlu1 %51  ;;  %v48_v34 = vpop.xlane.xlu2 %47 }
  0xf8   :  { %v56_v35 = vmul.f32 %v52_v33, %v32_v10  ;;  %v54_v36 = vmul.f32 %v48_v34, %v32_v10 }
  0xfa   :  { %v150_v37 = vpop.eup %149  ;;  %v60_v38 = vadd.f32 1e-05, %v56_v35  ;;  %v58_v39 = vadd.f32 1e-05, %v54_v36 }
  0xfb   :  { %v152_v40 = vpop.eup %151  ;;  %v62_v41 = vmul.f32 %v150_v37, %v57_v31  ;;  %vm68_vm2 = vweird.f32 %v150_v37 }
  0xfc   :  { %v82_v42 = vmul.f32 %v152_v40, %v59_v32  ;;  %153 = vrsqrt.f32 %v60_v38  ;;  %vm88_vm1 = vweird.f32 %v152_v40  ;;  %vm69_vm6 = vmor %vm67_vm4, %vm68_vm2  ;;  %vm97_vm9 = vweird.f32 %v60_v38 }
  0xfd   :  { %v63_v43 = vmul.f32 %v150_v37, %v62_v41  ;;  %155 = vrsqrt.f32 %v58_v39  ;;  %vm89_vm5 = vmor %vm87_vm3, %vm88_vm1  ;;  %vm77_vm11 = vweird.f32 %v58_v39 }
  0xfe   :  { %v83_v44 = vmul.f32 %v152_v40, %v82_v42 }
  0xff   :  { %v64_v45 = vmul.f32 0.5, %v63_v43 }
 0x100   :  { %v84_v46 = vmul.f32 0.5, %v83_v44 }
 0x101   :  { %v65_v47 = vsub.f32 1.5, %v64_v45 }
 0x102   :  { %v154_v48 = vpop.eup %153  ;;  %v85_v49 = vsub.f32 1.5, %v84_v46 }
 0x103   :  { %v156_v50 = vpop.eup %155  ;;  %v92_v51 = vmul.f32 %v154_v48, %v60_v38  ;;  %v66_v52 = vmul.f32 %v150_v37, %v65_v47  ;;  %vm98_vm7 = vweird.f32 %v154_v48 }
 0x104   :  { %v86_v53 = vmul.f32 %v152_v40, %v85_v49  ;;  %v72_v54 = vmul.f32 %v156_v50, %v58_v39  ;;  %vm78_vm8 = vweird.f32 %v156_v50  ;;  %vm99_vm10 = vmor %vm97_vm9, %vm98_vm7 }
 0x105   :  { %v93_v55 = vmul.f32 %v154_v48, %v92_v51  ;;  %v70_v59 = vsel %vm69_vm6, %v150_v37, %v66_v52  ;;  %vm79_vm12 = vmor %vm77_vm11, %vm78_vm8 }
 0x106   :  { %v73_v56 = vmul.f32 %v156_v50, %v72_v54  ;;  %v90_v57 = vsel %vm89_vm5, %v152_v40, %v86_v53  ;;  %v101_v1 = vmul.f32 %v70_v59, %v192_v16 }
 0x107   :  { %v94_v58 = vmul.f32 0.5, %v93_v55  ;;  %v103_v63 = vmul.f32 %v90_v57, %v190_v15 }
 0x108   :  { %v74_v60 = vmul.f32 0.5, %v73_v56  ;;  %v109_v9 = vmul.f32 %v145_v62, %v101_v1 }
 0x109   :  { %v95_v61 = vsub.f32 1.5, %v94_v58  ;;  %v111_v6 = vmul.f32 %v145_v62, %v103_v63 }
 0x10a   :  { %v75_v0 = vsub.f32 1.5, %v74_v60  ;;  %v117_v15 = vadd.f32 %v146_v5, %v109_v9 }
 0x10b   :  { %v96_v2 = vmul.f32 %v154_v48, %v95_v61  ;;  %v119_v13 = vadd.f32 %v146_v5, %v111_v6 }
 0x10c   :  { %v76_v3 = vmul.f32 %v156_v50, %v75_v0 }
 0x10d   :  { %v100_v4 = vsel %vm99_vm10, %v154_v48, %v96_v2 }
 0x10e   :  { %v104_v7 = vmul.f32 %v100_v4, %v198_v23  ;;  %v80_v8 = vsel %vm79_vm12, %v156_v50, %v76_v3 }
 0x10f   :  { %v102_v10 = vmul.f32 %v80_v8, %v200_v24 }
 0x110   :  { %v112_v11 = vmul.f32 %v145_v62, %v104_v7 }
 0x111   :  { %v110_v12 = vmul.f32 %v145_v62, %v102_v10 }
 0x112   :  { %v120_v14 = vadd.f32 %v146_v5, %v112_v11 }
 0x113   :  { %v118_v16 = vadd.f32 %v146_v5, %v110_v12 }
 0x114   :  { %v141_v17 = vpack.c.bf16 %v120_v14, %v119_v13 }
 0x115   :  { %v136_v18 = vpack.c.bf16 %v118_v16, %v117_v15 }
 0x116   :  { %143 = vst [vmem:[%s225_s3 + $0x8] sm:$0xff] %v141_v17  }
 0x117   :  { %137 = vst [vmem:[%s225_s3] sm:$0xff] %v136_v18  }

// kernel: _lambda_.5
= control target key start
LH: loop header
LB: loop body
LE: loop exit
PB: predicated region body
PF: predicated region fallthrough
CT: control target
= control target key end

     0   :  { %10 = vsyncpa [#allocation3], 0  ;;  %s1142_s0 = inlined_call_operand.vmem [shape: f32[2,64], index: 0, kind: input, shape index: {}]   ;;  %s1143_s1 = inlined_call_operand.hbm [shape: bf16[64,256], index: 1, kind: input, shape index: {}]   ;;  %s1144_s2 = inlined_call_operand.vmem [shape: f32[1,256], index: 2, kind: input, shape index: {}]   ;;  %s1145_s3 = inlined_call_operand.hbm [shape: bf16[256,512], index: 3, kind: input, shape index: {}]   ;;  %s1146_s4 = inlined_call_operand.vmem [shape: f32[1,512], index: 4, kind: input, shape index: {}]   ;;  %s1147_s5 = inlined_call_operand.vmem [shape: f32[2,512], index: 5, kind: output, shape index: {}]  }
   0x1   :  { %s18_s20 = sshll.u32 %s1143_s1, 4  ;;  %s19_s20 = int_to_ptr.hbm [resolvable:$true] %s18_s20 }
   0x2   :  { %11 = vsyncpa [#allocation5], 0  ;;  %s1086_s21 = smov [#allocation2]   ;;  %s33_s25 = sshll.u32 %s1145_s3, 4  ;;  %s34_s25 = int_to_ptr.hbm [resolvable:$true] %s33_s25 }
   0x3   :  { %s20_s22 = sshll.u32 %s1086_s21, 4  ;;  %s1087_s26 = smov 128   ;;  %s21_s22 = int_to_ptr.vmem [resolvable:$true] %s20_s22 }
   0x4   :  { %s1088_s27 = smov 8   ;;  %s1089_s28 = smov [#allocation4]  }
   0x5   :  { %26 = dma.hbm_to_vmem [thread:$0]  %s19_s20, 1024, %s21_s22, [#allocation3], %s1087_s26, %s1087_s26, %s1088_s27  }
   0x6   :  { %s35_s29 = sshll.u32 %s1089_s28, 4  ;;  %s1090_s30 = smov 256   ;;  %s36_s29 = int_to_ptr.vmem [resolvable:$true] %s35_s29 }
   0x7   :  { %s1091_s6 = smov 16  }
   0x8   :  { %41 = dma.hbm_to_vmem [thread:$0]  %s34_s25, 8192, %s36_s29, [#allocation5], %s1090_s30, %s1090_s30, %s1091_s6  }
   0x9   :  { %1082 = dma.done.wait [#allocation3], 1024  }
   0xa   :  { %1083 = vsyncadd [#allocation3], 4294966272 }
   0xb   :  { %1084 = dma.done.wait [#allocation5], 8192  }
   0xc   :  { %1085 = vsyncadd [#allocation5], 4294959104  ;;  %v688_v0 = vld [vmem:[#allocation2 + $0x30] sm:$0xf]  ;;  %v959_v1 = vld [vmem:[#allocation2 + $0x34] sm:$0xf0] }
   0xd   :  { %v958_v2 = vld [vmem:[#allocation2 + $0x34] sm:$0xf]  ;;  %v689_v3 = vor.u32 %v959_v1, %v688_v0  ;;  %v690_v4 = vld [vmem:[#allocation2 + $0x38] sm:$0xf0]  ;;  %v680_v5 = vld [vmem:[#allocation2 + $0x20] sm:$0xf] }
   0xe   :  { %v957_v6 = vld [vmem:[#allocation2 + $0x24] sm:$0xf0]  ;;  %v693_v7 = vor.u32 %v958_v2, %v690_v4  ;;  %v956_v8 = vld [vmem:[#allocation2 + $0x24] sm:$0xf]  ;;  %v682_v9 = vld [vmem:[#allocation2 + $0x28] sm:$0xf0] }
   0xf   :  { %117 = vmatpush.bf16.msra.mxu0 %v689_v3  ;;  %v681_v10 = vor.u32 %v957_v6, %v680_v5  ;;  %v685_v11 = vor.u32 %v956_v8, %v682_v9  ;;  %v672_v12 = vld [vmem:[#allocation2 + $0x10] sm:$0xf]  ;;  %v955_v13 = vld [vmem:[#allocation2 + $0x14] sm:$0xf0]  ;;  %v954_v14 = vld [vmem:[#allocation2 + $0x14] sm:$0xf] }
  0x10   :  { %130 = vmatpush.bf16.msra.mxu1 %v693_v7  ;;  %v674_v15 = vld [vmem:[#allocation2 + $0x18] sm:$0xf0]  ;;  %v810_v16 = vld [vmem:[#allocation4 + $0xe0] sm:$0xf]  ;;  %v990_v18 = vld [vmem:[#allocation4 + $0xec] sm:$0xf0]  ;;  %v673_v21 = vor.u32 %v955_v13, %v672_v12 }
  0x11   :  { %v664_v17 = vld [vmem:[#allocation2] sm:$0xf]  ;;  %v1022_v20 = vld [vmem:[#allocation4 + $0x1ec] sm:$0xf0]  ;;  %v953_v22 = vld [vmem:[#allocation2 + $0x4] sm:$0xf0]  ;;  %v811_v25 = vor.u32 %v990_v18, %v810_v16  ;;  %v677_v27 = vor.u32 %v954_v14, %v674_v15 }
  0x12   :  { %v938_v19 = vld [vmem:[#allocation4 + $0x1e0] sm:$0xf]  ;;  %v952_v23 = vld [vmem:[#allocation2 + $0x4] sm:$0xf]  ;;  %v666_v24 = vld [vmem:[#allocation2 + $0x8] sm:$0xf0]  ;;  %v665_v39 = vor.u32 %v953_v22, %v664_v17 }
  0x13   :  { %118 = vmatpush.bf16.msra.mxu0 %v681_v10  ;;  %v939_v26 = vor.u32 %v1022_v20, %v938_v19  ;;  %v988_v28 = vld [vmem:[#allocation4 + $0xe4] sm:$0xf]  ;;  %v794_v29 = vld [vmem:[#allocation4 + $0xc0] sm:$0xf]  ;;  %v986_v30 = vld [vmem:[#allocation4 + $0xcc] sm:$0xf0]  ;;  %537 = vmatpush.bf16.msra.mxu2 %v811_v25  ;;  %v669_v43 = vor.u32 %v952_v23, %v666_v24 }
  0x14   :  { %131 = vmatpush.bf16.msra.mxu1 %v685_v11  ;;  %v812_v31 = vld [vmem:[#allocation4 + $0xf0] sm:$0xf0]  ;;  %v795_v32 = vor.u32 %v986_v30, %v794_v29  ;;  %v922_v33 = vld [vmem:[#allocation4 + $0x1c0] sm:$0xf]  ;;  %v1018_v34 = vld [vmem:[#allocation4 + $0x1cc] sm:$0xf0] }
  0x15   :  { %550 = vmatpush.bf16.msra.mxu3 %v939_v26  ;;  %v53_v35 = vld [vmem:[%s1142_s0] sm:$0x3]  ;;  %v1020_v36 = vld [vmem:[#allocation4 + $0x1e4] sm:$0xf]  ;;  %v940_v37 = vld [vmem:[#allocation4 + $0x1f0] sm:$0xf0]  ;;  %v923_v38 = vor.u32 %v1018_v34, %v922_v33  ;;  %v815_v44 = vor.u32 %v988_v28, %v812_v31 }
  0x16   :  { %v778_v40 = vld [vmem:[#allocation4 + $0xa0] sm:$0xf]  ;;  %v982_v41 = vld [vmem:[#allocation4 + $0xac] sm:$0xf0]  ;;  %v943_v46 = vor.u32 %v1020_v36, %v940_v37  ;;  %v984_v47 = vld [vmem:[#allocation4 + $0xc4] sm:$0xf]  ;;  %v54_v51 = vpack.c.bf16 %v53_v35, %v53_v35 }
  0x17   :  { %119 = vmatpush.bf16.msra.mxu0 %v673_v21  ;;  %v906_v42 = vld [vmem:[#allocation4 + $0x1a0] sm:$0xf]  ;;  %v1014_v45 = vld [vmem:[#allocation4 + $0x1ac] sm:$0xf0]  ;;  %538 = vmatpush.bf16.msra.mxu2 %v795_v32  ;;  %v796_v48 = vld [vmem:[#allocation4 + $0xd0] sm:$0xf0]  ;;  %v779_v50 = vor.u32 %v982_v41, %v778_v40 }
  0x18   :  { %132 = vmatpush.bf16.msra.mxu1 %v677_v27  ;;  %v1016_v49 = vld [vmem:[#allocation4 + $0x1c4] sm:$0xf]  ;;  %v924_v52 = vld [vmem:[#allocation4 + $0x1d0] sm:$0xf0]  ;;  %v907_v53 = vor.u32 %v1014_v45, %v906_v42  ;;  %v762_v54 = vld [vmem:[#allocation4 + $0x80] sm:$0xf]  ;;  %v799_v58 = vor.u32 %v984_v47, %v796_v48 }
  0x19   :  { %551 = vmatpush.bf16.msra.mxu3 %v923_v38  ;;  %v978_v55 = vld [vmem:[#allocation4 + $0x8c] sm:$0xf0]  ;;  %vm109_vm0 = vcmask 523264   ;;  %v890_v56 = vld [vmem:[#allocation4 + $0x180] sm:$0xf]  ;;  %v927_v59 = vor.u32 %v1016_v49, %v924_v52  ;;  %vm648_vm1 = vcmask 1041408  }
  0x1a   :  { %v1010_v57 = vld [vmem:[#allocation4 + $0x18c] sm:$0xf0]  ;;  %v980_v60 = vld [vmem:[#allocation4 + $0xa4] sm:$0xf]  ;;  %v780_v61 = vld [vmem:[#allocation4 + $0xb0] sm:$0xf0]  ;;  %v763_v63 = vor.u32 %v978_v55, %v762_v54 }
  0x1b   :  { %120 = vmatpush.bf16.msra.mxu0 %v665_v39  ;;  %539 = vmatpush.bf16.msra.mxu2 %v779_v50  ;;  %v1012_v62 = vld [vmem:[#allocation4 + $0x1a4] sm:$0xf]  ;;  %v908_v0 = vld [vmem:[#allocation4 + $0x1b0] sm:$0xf0]  ;;  %v891_v1 = vor.u32 %v1010_v57, %v890_v56  ;;  %v746_v2 = vld [vmem:[#allocation4 + $0x60] sm:$0xf]  ;;  %v783_v6 = vor.u32 %v980_v60, %v780_v61 }
  0x1c   :  { %133 = vmatpush.bf16.msra.mxu1 %v669_v43  ;;  %v974_v3 = vld [vmem:[#allocation4 + $0x6c] sm:$0xf0]  ;;  %v874_v4 = vld [vmem:[#allocation4 + $0x160] sm:$0xf]  ;;  %v911_v7 = vor.u32 %v1012_v62, %v908_v0  ;;  %v976_v8 = vld [vmem:[#allocation4 + $0x84] sm:$0xf] }
  0x1d   :  { %552 = vmatpush.bf16.msra.mxu3 %v907_v53  ;;  %v1006_v5 = vld [vmem:[#allocation4 + $0x16c] sm:$0xf0]  ;;  %v764_v9 = vld [vmem:[#allocation4 + $0x90] sm:$0xf0]  ;;  %v1008_v10 = vld [vmem:[#allocation4 + $0x184] sm:$0xf]  ;;  %v747_v11 = vor.u32 %v974_v3, %v746_v2 }
  0x1e   :  { %694 = vmatmul.msk.bf16.vlgmr.msra.gmra.mxu0 %vm109_vm0, %v54_v51  ;;  %v892_v12 = vld [vmem:[#allocation4 + $0x190] sm:$0xf0]  ;;  %v875_v13 = vor.u32 %v1006_v5, %v874_v4  ;;  %v730_v14 = vld [vmem:[#allocation4 + $0x40] sm:$0xf]  ;;  %v970_v15 = vld [vmem:[#allocation4 + $0x4c] sm:$0xf0]  ;;  %v767_v18 = vor.u32 %v976_v8, %v764_v9 }
  0x1f   :  { %563 = vmatpush.bf16.msrb.mxu0 %v815_v44  ;;  %695 = vmatmul.msk.bf16.vlgmr.msra.gmra.mxu1 %vm109_vm0, %v54_v51  ;;  %v858_v16 = vld [vmem:[#allocation4 + $0x140] sm:$0xf]  ;;  %v1002_v17 = vld [vmem:[#allocation4 + $0x14c] sm:$0xf0]  ;;  %v895_v19 = vor.u32 %v1008_v10, %v892_v12  ;;  %v972_v20 = vld [vmem:[#allocation4 + $0x64] sm:$0xf]  ;;  %v731_v23 = vor.u32 %v970_v15, %v730_v14 }
  0x20   :  { %576 = vmatpush.bf16.msrb.mxu1 %v943_v46  ;;  %540 = vmatpush.bf16.msra.mxu2 %v763_v63  ;;  %v748_v21 = vld [vmem:[#allocation4 + $0x70] sm:$0xf0]  ;;  %v1004_v22 = vld [vmem:[#allocation4 + $0x164] sm:$0xf]  ;;  %v859_v25 = vor.u32 %v1002_v17, %v858_v16  ;;  %v714_v26 = vld [vmem:[#allocation4 + $0x20] sm:$0xf] }
  0x21   :  { %553 = vmatpush.bf16.msra.mxu3 %v891_v1  ;;  %v876_v24 = vld [vmem:[#allocation4 + $0x170] sm:$0xf0]  ;;  %v966_v27 = vld [vmem:[#allocation4 + $0x2c] sm:$0xf0]  ;;  %v842_v28 = vld [vmem:[#allocation4 + $0x120] sm:$0xf]  ;;  %v751_v30 = vor.u32 %v972_v20, %v748_v21 }
  0x22   :  { %v998_v29 = vld [vmem:[#allocation4 + $0x12c] sm:$0xf0]  ;;  %v968_v31 = vld [vmem:[#allocation4 + $0x44] sm:$0xf]  ;;  %v879_v32 = vor.u32 %v1004_v22, %v876_v24  ;;  %v732_v33 = vld [vmem:[#allocation4 + $0x50] sm:$0xf0]  ;;  %v715_v36 = vor.u32 %v966_v27, %v714_v26 }
  0x23   :  { %564 = vmatpush.bf16.msrb.mxu0 %v799_v58  ;;  %v1000_v34 = vld [vmem:[#allocation4 + $0x144] sm:$0xf]  ;;  %v860_v35 = vld [vmem:[#allocation4 + $0x150] sm:$0xf0]  ;;  %v843_v37 = vor.u32 %v998_v29, %v842_v28  ;;  %v698_v38 = vld [vmem:[#allocation4] sm:$0xf]  ;;  %v735_v44 = vor.u32 %v968_v31, %v732_v33 }
  0x24   :  { %577 = vmatpush.bf16.msrb.mxu1 %v927_v59  ;;  %541 = vmatpush.bf16.msra.mxu2 %v747_v11  ;;  %v962_v39 = vld [vmem:[#allocation4 + $0xc] sm:$0xf0]  ;;  %v826_v40 = vld [vmem:[#allocation4 + $0x100] sm:$0xf]  ;;  %v818_v42 = vld [vmem:[#allocation4 + $0xe8] sm:$0xf]  ;;  %v863_v47 = vor.u32 %v1000_v34, %v860_v35 }
  0x25   :  { %554 = vmatpush.bf16.msra.mxu3 %v875_v13  ;;  %v994_v41 = vld [vmem:[#allocation4 + $0x10c] sm:$0xf0]  ;;  %v991_v43 = vld [vmem:[#allocation4 + $0xf4] sm:$0xf0]  ;;  %v946_v45 = vld [vmem:[#allocation4 + $0x1e8] sm:$0xf]  ;;  %v699_v50 = vor.u32 %v962_v39, %v698_v38 }
  0x26   :  { %v1023_v46 = vld [vmem:[#allocation4 + $0x1f4] sm:$0xf0]  ;;  %v964_v48 = vld [vmem:[#allocation4 + $0x24] sm:$0xf]  ;;  %v716_v49 = vld [vmem:[#allocation4 + $0x30] sm:$0xf0]  ;;  %v827_v53 = vor.u32 %v994_v41, %v826_v40  ;;  %v819_v54 = vor.u32 %v991_v43, %v818_v42 }
  0x27   :  { %565 = vmatpush.bf16.msrb.mxu0 %v783_v6  ;;  %v996_v51 = vld [vmem:[#allocation4 + $0x124] sm:$0xf]  ;;  %v844_v52 = vld [vmem:[#allocation4 + $0x130] sm:$0xf0]  ;;  %v947_v55 = vor.u32 %v1023_v46, %v946_v45  ;;  %v719_v56 = vor.u32 %v964_v48, %v716_v49  ;;  %v989_v62 = vld [vmem:[#allocation4 + $0xec] sm:$0xf] }
  0x28   :  { %578 = vmatpush.bf16.msrb.mxu1 %v911_v7  ;;  %542 = vmatpush.bf16.msra.mxu2 %v731_v23  ;;  %v847_v57 = vor.u32 %v996_v51, %v844_v52  ;;  %v960_v58 = vld [vmem:[#allocation4 + $0x4] sm:$0xf]  ;;  %v700_v59 = vld [vmem:[#allocation4 + $0x10] sm:$0xf0]  ;;  %v820_v63 = vld [vmem:[#allocation4 + $0xf8] sm:$0xf0] }
  0x29   :  { %555 = vmatpush.bf16.msra.mxu3 %v859_v25  ;;  %v992_v60 = vld [vmem:[#allocation4 + $0x104] sm:$0xf]  ;;  %v828_v61 = vld [vmem:[#allocation4 + $0x110] sm:$0xf0]  ;;  %v1021_v0 = vld [vmem:[#allocation4 + $0x1ec] sm:$0xf]  ;;  %v703_v2 = vor.u32 %v960_v58, %v700_v59  ;;  %v823_v4 = vor.u32 %v989_v62, %v820_v63 }
  0x2a   :  { %v948_v1 = vld [vmem:[#allocation4 + $0x1f8] sm:$0xf0]  ;;  %v831_v3 = vor.u32 %v992_v60, %v828_v61  ;;  %v802_v6 = vld [vmem:[#allocation4 + $0xc8] sm:$0xf]  ;;  %v987_v7 = vld [vmem:[#allocation4 + $0xd4] sm:$0xf0] }
  0x2b   :  { %566 = vmatpush.bf16.msrb.mxu0 %v767_v18  ;;  %v951_v5 = vor.u32 %v1021_v0, %v948_v1  ;;  %v930_v8 = vld [vmem:[#allocation4 + $0x1c8] sm:$0xf]  ;;  %v803_v9 = vor.u32 %v987_v7, %v802_v6  ;;  %v1019_v10 = vld [vmem:[#allocation4 + $0x1d4] sm:$0xf0]  ;;  %v985_v11 = vld [vmem:[#allocation4 + $0xcc] sm:$0xf] }
  0x2c   :  { %579 = vmatpush.bf16.msrb.mxu1 %v895_v19  ;;  %543 = vmatpush.bf16.msra.mxu2 %v715_v36  ;;  %v931_v12 = vor.u32 %v1019_v10, %v930_v8  ;;  %v804_v13 = vld [vmem:[#allocation4 + $0xd8] sm:$0xf0]  ;;  %v1017_v14 = vld [vmem:[#allocation4 + $0x1cc] sm:$0xf]  ;;  %v786_v18 = vld [vmem:[#allocation4 + $0xa8] sm:$0xf] }
  0x2d   :  { %556 = vmatpush.bf16.msra.mxu3 %v843_v37  ;;  %v932_v15 = vld [vmem:[#allocation4 + $0x1d8] sm:$0xf0]  ;;  %v807_v16 = vor.u32 %v985_v11, %v804_v13  ;;  %v983_v19 = vld [vmem:[#allocation4 + $0xb4] sm:$0xf0]  ;;  %v914_v20 = vld [vmem:[#allocation4 + $0x1a8] sm:$0xf] }
  0x2e   :  { %v935_v17 = vor.u32 %v1017_v14, %v932_v15  ;;  %v787_v21 = vor.u32 %v983_v19, %v786_v18  ;;  %v1015_v22 = vld [vmem:[#allocation4 + $0x1b4] sm:$0xf0]  ;;  %v981_v23 = vld [vmem:[#allocation4 + $0xac] sm:$0xf]  ;;  %v788_v24 = vld [vmem:[#allocation4 + $0xb8] sm:$0xf0] }
  0x2f   :  { %567 = vmatpush.bf16.msrb.mxu0 %v751_v30  ;;  %v915_v25 = vor.u32 %v1015_v22, %v914_v20  ;;  %v791_v26 = vor.u32 %v981_v23, %v788_v24  ;;  %v1013_v27 = vld [vmem:[#allocation4 + $0x1ac] sm:$0xf]  ;;  %v916_v28 = vld [vmem:[#allocation4 + $0x1b8] sm:$0xf0]  ;;  %v770_v30 = vld [vmem:[#allocation4 + $0x88] sm:$0xf] }
  0x30   :  { %580 = vmatpush.bf16.msrb.mxu1 %v879_v32  ;;  %544 = vmatpush.bf16.msra.mxu2 %v699_v50  ;;  %v919_v29 = vor.u32 %v1013_v27, %v916_v28  ;;  %v979_v31 = vld [vmem:[#allocation4 + $0x94] sm:$0xf0]  ;;  %v898_v32 = vld [vmem:[#allocation4 + $0x188] sm:$0xf]  ;;  %v977_v35 = vld [vmem:[#allocation4 + $0x8c] sm:$0xf] }
  0x31   :  { %557 = vmatpush.bf16.msra.mxu3 %v827_v53  ;;  %v771_v33 = vor.u32 %v979_v31, %v770_v30  ;;  %v1011_v34 = vld [vmem:[#allocation4 + $0x194] sm:$0xf0]  ;;  %v772_v36 = vld [vmem:[#allocation4 + $0x98] sm:$0xf0]  ;;  %v1009_v39 = vld [vmem:[#allocation4 + $0x18c] sm:$0xf] }
  0x32   :  { %v899_v37 = vor.u32 %v1011_v34, %v898_v32  ;;  %v775_v38 = vor.u32 %v977_v35, %v772_v36  ;;  %v900_v40 = vld [vmem:[#allocation4 + $0x198] sm:$0xf0]  ;;  %v754_v42 = vld [vmem:[#allocation4 + $0x68] sm:$0xf]  ;;  %v975_v43 = vld [vmem:[#allocation4 + $0x74] sm:$0xf0] }
  0x33   :  { %568 = vmatpush.bf16.msrb.mxu0 %v735_v44  ;;  %v903_v41 = vor.u32 %v1009_v39, %v900_v40  ;;  %v882_v44 = vld [vmem:[#allocation4 + $0x168] sm:$0xf]  ;;  %v755_v45 = vor.u32 %v975_v43, %v754_v42  ;;  %v1007_v46 = vld [vmem:[#allocation4 + $0x174] sm:$0xf0]  ;;  %v756_v48 = vld [vmem:[#allocation4 + $0x78] sm:$0xf0] }
  0x34   :  { %581 = vmatpush.bf16.msrb.mxu1 %v863_v47  ;;  %589 = vmatpush.bf16.msrb.mxu2 %v819_v54  ;;  %v973_v47 = vld [vmem:[#allocation4 + $0x6c] sm:$0xf]  ;;  %v883_v49 = vor.u32 %v1007_v46, %v882_v44  ;;  %v884_v52 = vld [vmem:[#allocation4 + $0x178] sm:$0xf0]  ;;  %v738_v53 = vld [vmem:[#allocation4 + $0x48] sm:$0xf] }
  0x35   :  { %602 = vmatpush.bf16.msrb.mxu3 %v947_v55  ;;  %v759_v50 = vor.u32 %v973_v47, %v756_v48  ;;  %v1005_v51 = vld [vmem:[#allocation4 + $0x16c] sm:$0xf]  ;;  %v971_v55 = vld [vmem:[#allocation4 + $0x54] sm:$0xf0]  ;;  %v740_v61 = vld [vmem:[#allocation4 + $0x58] sm:$0xf0] }
  0x36   :  { %v887_v54 = vor.u32 %v1005_v51, %v884_v52  ;;  %v739_v58 = vor.u32 %v971_v55, %v738_v53  ;;  %v969_v60 = vld [vmem:[#allocation4 + $0x4c] sm:$0xf]  ;;  %v868_v0 = vld [vmem:[#allocation4 + $0x158] sm:$0xf0]  ;;  %v722_v1 = vld [vmem:[#allocation4 + $0x28] sm:$0xf] }
  0x37   :  { %569 = vmatpush.bf16.msrb.mxu0 %v719_v56  ;;  %v866_v56 = vld [vmem:[#allocation4 + $0x148] sm:$0xf]  ;;  %v1001_v62 = vld [vmem:[#allocation4 + $0x14c] sm:$0xf]  ;;  %v743_v63 = vor.u32 %v969_v60, %v740_v61  ;;  %v724_v8 = vld [vmem:[#allocation4 + $0x38] sm:$0xf0] }
  0x38   :  { %582 = vmatpush.bf16.msrb.mxu1 %v847_v57  ;;  %590 = vmatpush.bf16.msrb.mxu2 %v803_v9  ;;  %v1003_v57 = vld [vmem:[#allocation4 + $0x154] sm:$0xf0]  ;;  %v965_v6 = vld [vmem:[#allocation4 + $0x2c] sm:$0xf]  ;;  %v852_v10 = vld [vmem:[#allocation4 + $0x138] sm:$0xf0] }
  0x39   :  { %603 = vmatpush.bf16.msrb.mxu3 %v931_v12  ;;  %v867_v59 = vor.u32 %v1003_v57, %v866_v56  ;;  %v997_v9 = vld [vmem:[#allocation4 + $0x12c] sm:$0xf]  ;;  %v706_v12 = vld [vmem:[#allocation4 + $0x8] sm:$0xf]  ;;  %v963_v13 = vld [vmem:[#allocation4 + $0x14] sm:$0xf0]  ;;  %v727_v14 = vor.u32 %v965_v6, %v724_v8 }
  0x3a   :  { %v855_v15 = vor.u32 %v997_v9, %v852_v10  ;;  %v961_v18 = vld [vmem:[#allocation4 + $0xc] sm:$0xf]  ;;  %v708_v19 = vld [vmem:[#allocation4 + $0x18] sm:$0xf0]  ;;  %v707_v22 = vor.u32 %v963_v13, %v706_v12  ;;  %vm650_vm2 = vcmask 1045508   ;;  %vm652_vm3 = vcmask 1043456  }
  0x3b   :  { %570 = vmatpush.bf16.msrb.mxu0 %v703_v2  ;;  %v967_v2 = vld [vmem:[#allocation4 + $0x34] sm:$0xf0]  ;;  %v993_v20 = vld [vmem:[#allocation4 + $0x10c] sm:$0xf]  ;;  %v711_v24 = vor.u32 %v961_v18, %v708_v19 }
  0x3c   :  { %583 = vmatpush.bf16.msrb.mxu1 %v831_v3  ;;  %591 = vmatpush.bf16.msrb.mxu2 %v787_v21  ;;  %v871_v3 = vor.u32 %v1001_v62, %v868_v0  ;;  %v723_v7 = vor.u32 %v967_v2, %v722_v1  ;;  %v836_v21 = vld [vmem:[#allocation4 + $0x118] sm:$0xf0] }
  0x3d   :  { %604 = vmatpush.bf16.msrb.mxu3 %v915_v25  ;;  %v839_v25 = vor.u32 %v993_v20, %v836_v21 }
  0x3f   :  { %615 = vmatpush.bf16.msra.mxu0 %v823_v4  ;;  %v850_v4 = vld [vmem:[#allocation4 + $0x128] sm:$0xf] }
  0x40   :  { %628 = vmatpush.bf16.msra.mxu1 %v951_v5  ;;  %592 = vmatpush.bf16.msrb.mxu2 %v771_v33  ;;  %v999_v5 = vld [vmem:[#allocation4 + $0x134] sm:$0xf0] }
  0x41   :  { %605 = vmatpush.bf16.msrb.mxu3 %v899_v37  ;;  %v851_v11 = vor.u32 %v999_v5, %v850_v4 }
  0x43   :  { %616 = vmatpush.bf16.msra.mxu0 %v807_v16  ;;  %v834_v16 = vld [vmem:[#allocation4 + $0x108] sm:$0xf] }
  0x44   :  { %629 = vmatpush.bf16.msra.mxu1 %v935_v17  ;;  %593 = vmatpush.bf16.msrb.mxu2 %v755_v45  ;;  %v995_v17 = vld [vmem:[#allocation4 + $0x114] sm:$0xf0]  ;;  %v207_v45 = vld [vmem:[%s1146_s4] sm:$0xf] }
  0x45   :  { %606 = vmatpush.bf16.msrb.mxu3 %v883_v49  ;;  %v835_v23 = vor.u32 %v995_v17, %v834_v16  ;;  %v210_v47 = vperm.slane %v207_v45, 1  ;;  %v212_v49 = vperm.slane %v207_v45, 3  ;;  %v209_v51 = vperm.slane %v207_v45, 0 }
  0x46   :  { %v211_v55 = vperm.slane %v207_v45, 2 }
  0x47   :  { %617 = vmatpush.bf16.msra.mxu0 %v791_v26  ;;  %v63_v26 = vld [vmem:[%s1144_s2] sm:$0x3] }
  0x48   :  { %630 = vmatpush.bf16.msra.mxu1 %v919_v29  ;;  %594 = vmatpush.bf16.msrb.mxu2 %v739_v58  ;;  %v65_v27 = vperm.slane %v63_v26, 0  ;;  %v66_v28 = vperm.slane %v63_v26, 1 }
  0x49   :  { %607 = vmatpush.bf16.msrb.mxu3 %v867_v59 }
  0x4b   :  { %618 = vmatpush.bf16.msra.mxu0 %v775_v38 }
  0x4c   :  { %631 = vmatpush.bf16.msra.mxu1 %v903_v41  ;;  %595 = vmatpush.bf16.msrb.mxu2 %v723_v7 }
  0x4d   :  { %608 = vmatpush.bf16.msrb.mxu3 %v851_v11 }
  0x4f   :  { %619 = vmatpush.bf16.msra.mxu0 %v759_v50 }
  0x50   :  { %632 = vmatpush.bf16.msra.mxu1 %v887_v54  ;;  %596 = vmatpush.bf16.msrb.mxu2 %v707_v22 }
  0x51   :  { %609 = vmatpush.bf16.msrb.mxu3 %v835_v23 }
  0x53   :  { %620 = vmatpush.bf16.msra.mxu0 %v743_v63 }
  0x54   :  { %633 = vmatpush.bf16.msra.mxu1 %v871_v3 }
  0x57   :  { %621 = vmatpush.bf16.msra.mxu0 %v727_v14 }
  0x58   :  { %634 = vmatpush.bf16.msra.mxu1 %v855_v15 }
  0x5b   :  { %622 = vmatpush.bf16.msra.mxu0 %v711_v24 }
  0x5c   :  { %635 = vmatpush.bf16.msra.mxu1 %v839_v25 }
  0x9b   :  { %v122_v29 = vpop.f32.mrf.mxu0 }
  0x9c   :  { %v123_v30 = vadd.f32 %v122_v29, %v65_v27  ;;  %v135_v31 = vpop.f32.mrf.mxu1 }
  0x9d   :  { %v136_v32 = vadd.f32 %v135_v31, %v66_v28 }
  0x9e   :  { %1030 = vtanh.f32 %v123_v30 }
  0x9f   :  { %1032 = vtanh.f32 %v136_v32 }
  0xa3   :  { %v124_v33 = vpop.f32.mrf.mxu0 }
  0xa4   :  { %v1031_v34 = vpop.eup %1030  ;;  %v137_v35 = vpop.f32.mrf.mxu1 }
  0xa5   :  { %v1033_v36 = vpop.eup %1032  ;;  %v141_v37 = vpack.c.bf16 %v1031_v34, %v1031_v34 }
  0xa6   :  { %v142_v38 = vpack.c.bf16 %v1033_v36, %v1033_v36 }
  0xa7   :  { %545 = vmatmul.bf16.vlgmr.msra.gmra.mxu2 %v141_v37  ;;  %571 = vmatmul.bf16.vlgmr.msrb.gmra.mxu0 %v141_v37 }
  0xa8   :  { %558 = vmatmul.bf16.vlgmr.msra.gmra.mxu3 %v142_v38  ;;  %584 = vmatmul.bf16.vlgmr.msrb.gmra.mxu1 %v142_v38 }
  0xb7   :  { %597 = vmatmul.bf16.vlgmr.msrb.gmra.mxu2 %v141_v37  ;;  %623 = vmatmul.bf16.vlgmr.msra.gmra.mxu0 %v141_v37 }
  0xb8   :  { %610 = vmatmul.bf16.vlgmr.msrb.gmra.mxu3 %v142_v38  ;;  %636 = vmatmul.bf16.vlgmr.msra.gmra.mxu1 %v142_v38 }
 0x124   :  { %v572_v39 = vpop.f32.mrf.mxu0 }
 0x125   :  { %v585_v40 = vpop.f32.mrf.mxu1  ;;  %v573_v53 = vadd.f32 %v572_v39, %v210_v47 }
 0x127   :  { %v586_v58 = vadd.f32 %v585_v40, %v573_v53 }
 0x129   :  { %v645_v2 = vrot.slane %v586_v58, 6 }
 0x12a   :  { %v546_v41 = vpop.f32.mrf.mxu2 }
 0x12b   :  { %v559_v42 = vpop.f32.mrf.mxu3  ;;  %v547_v56 = vadd.f32 %v546_v41, %v209_v51 }
 0x12c   :  { %v574_v43 = vpop.f32.mrf.mxu0 }
 0x12d   :  { %v587_v44 = vpop.f32.mrf.mxu1  ;;  %v560_v63 = vadd.f32 %v559_v42, %v547_v56 }
 0x12f   :  { %v649_v5 = vsel %vm648_vm1, %v560_v63, %v645_v2 }
 0x132   :  { %v548_v46 = vpop.f32.mrf.mxu2 }
 0x133   :  { %v561_v48 = vpop.f32.mrf.mxu3 }
 0x134   :  { %v624_v50 = vpop.f32.mrf.mxu0 }
 0x135   :  { %v637_v52 = vpop.f32.mrf.mxu1  ;;  %v625_v54 = vadd.f32 %v624_v50, %v212_v49 }
 0x137   :  { %v638_v59 = vadd.f32 %v637_v52, %v625_v54 }
 0x139   :  { %v647_v3 = vrot.slane %v638_v59, 2 }
 0x13a   :  { %v598_v57 = vpop.f32.mrf.mxu2 }
 0x13b   :  { %v599_v60 = vadd.f32 %v598_v57, %v211_v55  ;;  %v611_v61 = vpop.f32.mrf.mxu3 }
 0x13c   :  { %v626_v62 = vpop.f32.mrf.mxu0 }
 0x13d   :  { %v612_v0 = vadd.f32 %v611_v61, %v599_v60  ;;  %v639_v1 = vpop.f32.mrf.mxu1 }
 0x13f   :  { %v646_v4 = vrot.slane %v612_v0, 4 }
 0x141   :  { %v651_v6 = vsel %vm650_vm2, %v646_v4, %v647_v3 }
 0x142   :  { %v653_v7 = vsel %vm652_vm3, %v649_v5, %v651_v6  ;;  %v600_v8 = vpop.f32.mrf.mxu2 }
 0x143   :  { %655 = vst [vmem:[%s1147_s5] sm:$0xff] %v653_v7  ;;  %v613_v9 = vpop.f32.mrf.mxu3 }
 0x144   :  { %660 = vsyncpa [#allocation3], 1 }
 0x145   :  { %661 = vsyncpa [#allocation5], 1 }

// kernel: _lambda_.7
= control target key start
LH: loop header
LB: loop body
LE: loop exit
PB: predicated region body
PF: predicated region fallthrough
CT: control target
= control target key end

     0   :  { %s3587_s0 = inlined_call_operand.vmem [shape: f32[2,16,128], index: 0, kind: input, shape index: {}, may-alias: {0,1}]   ;;  %s3588_s1 = inlined_call_operand.vmem [shape: f32[2,16,128], index: 1, kind: input, shape index: {}, may-alias: {0,1}]   ;;  %s3589_s2 = inlined_call_operand.vmem [shape: f32[2,1,16], index: 2, kind: input, shape index: {}]   ;;  %s3590_s3 = inlined_call_operand.vmem [shape: f32[1,128], index: 3, kind: input, shape index: {}, may-alias: {3,9}]   ;;  %s3591_s4 = inlined_call_operand.vmem [shape: f32[1,128], index: 4, kind: input, shape index: {}, may-alias: {4,8,10,14}]   ;;  %s3592_s5 = inlined_call_operand.vmem [shape: bf16[128,384], index: 5, kind: input, shape index: {}]   ;;  %s3593_s6 = inlined_call_operand.vmem [shape: f32[1,384], index: 6, kind: input, shape index: {}]   ;;  %s3594_s7 = inlined_call_operand.hbm [shape: bf16[128,128], index: 7, kind: input, shape index: {}]   ;;  %s3595_s8 = inlined_call_operand.vmem [shape: f32[1,128], index: 8, kind: input, shape index: {}, may-alias: {4,8,10,14}]   ;;  %s3596_s9 = inlined_call_operand.vmem [shape: f32[1,128], index: 9, kind: input, shape index: {}, may-alias: {3,9}]   ;;  %s3597_s10 = inlined_call_operand.vmem [shape: f32[1,128], index: 10, kind: input, shape index: {}, may-alias: {4,8,10,14}]   ;;  %s3598_s11 = inlined_call_operand.hbm [shape: bf16[128,512], index: 11, kind: input, shape index: {}]   ;;  %s3599_s12 = inlined_call_operand.vmem [shape: f32[1,512], index: 12, kind: input, shape index: {}]   ;;  %s3600_s13 = inlined_call_operand.hbm [shape: bf16[512,128], index: 13, kind: input, shape index: {}]   ;;  %s3601_s14 = inlined_call_operand.vmem [shape: f32[1,128], index: 14, kind: input, shape index: {}, may-alias: {4,8,10,14}]   ;;  %s3602_s15 = inlined_call_operand.vmem [shape: f32[2,16,128], index: 15, kind: output, shape index: {}]  }
   0x1   :  { %3605 = sst [smem:[#allocation12_spill]] %s3598_s11 }
   0x2   :  { %3606 = sst [smem:[#allocation13_spill]] %s3599_s12 }
   0x3   :  { %3607 = sst [smem:[#allocation14_spill]] %s3601_s14 }
   0x4   :  { %3608 = sst [smem:[#allocation15_spill]] %s3602_s15 }
   0x5   :  { %20 = vsyncpa [#allocation4], 0 }
   0x6   :  { %21 = vsyncpa [#allocation6], 0  ;;  %s3151_s18 = smov 0   ;;  %s3153_s19 = smov 0  }
   0x7   :  { %s3155_s20 = smov 0  }
   0x8 LB: > { %3609 = sst [smem:[#allocation10_spill]] %s3053_s19  ;;  %s2286_s24 = sadd.s32 4294967295, %s3057_s20   ;;  %s3057_s20 = sphi %s3155_s20, %s27_s20   ;;  %s3053_s19 = sphi %s3153_s19, %s3620_s19   ;;  %s3049_s18 = sphi %s3151_s18, %s3619_s18  }
   0x9   : > { %3610 = sst [smem:[#allocation11_spill]] %s3057_s20  ;;  %p2288_p0 = scmp.ge.s32.totalorder %s3057_s20, 1 }
   0xa   : > { %s3611_s11 = sld [smem:[#allocation12_spill]]  ;;  %p404_p1 = scmp.lt.s32.totalorder %s3057_s20, 3 }
   0xb   : > { %p3172_p2 = scmp.eq.s32.totalorder %s2286_s24, 0  ;;  %s3059_s27 = smov [#allocation5]  }
   0xc   : > { %p3176_p3 = pnand %p2288_p0, %p404_p1  ;;  %s452_s28 = sshll.u32 %s3059_s27, 4  ;;  %s453_s28 = int_to_ptr.vmem [resolvable:$true] %s452_s28 }
   0xd   : > { %s39_s30 = sadd.s32 1, %s3053_s19  ;;  %s3060_s16 = smov 256  }
   0xe   : > { %p2813_p4 = pneg %p3176_p3  ;;  %p41_p6 = scmp.ge.s32.totalorder %s39_s30, 2 }
   0xf   : > { %s3061_s17 = smov 16   ;;  %s427_s24 = sshll.u32 %s3594_s7, 4  ;;  %s428_s24 = int_to_ptr.hbm [resolvable:$true] %s427_s24 }
  0x10   : > { %s450_s23 = sshll.u32 %s3611_s11, 4  ;;  %p3184_p5 = pnand %p3172_p2, %p2813_p4  ;;  %s451_s23 = int_to_ptr.hbm [resolvable:$true] %s450_s23 }
  0x11   : > { %s3622_s30 = smov (%p41_p6, %s39_s30), 0  ;;  %s3062_s27 = smov [#allocation3]  }
  0x12   : > { %2819 = dma.hbm_to_vmem [thread:$0]  (!%p3184_p5), %s451_s23, 4096, %s453_s28, [#allocation6], %s3060_s16, %s3060_s16, %s3061_s17  }
  0x13   : > { %s429_s11 = sshll.u32 %s3062_s27, 4  ;;  %s467_s19 = sshll.u32 %s3600_s13, 4  ;;  %s430_s11 = int_to_ptr.vmem [resolvable:$true] %s429_s11  ;;  %s468_s19 = int_to_ptr.hbm [resolvable:$true] %s467_s19 }
  0x14   : > { %s3063_s14 = smov 64   ;;  %s3064_s12 = smov 4  }
  0x15   : > { %2816 = dma.hbm_to_vmem [thread:$0]  (!%p3184_p5), %s428_s24, 1024, %s430_s11, [#allocation4], %s3063_s14, %s3063_s14, %s3064_s12  }
  0x16   : > { %s3065_s23 = smov [#allocation7]   ;;  %515 = sbr.rel (%p3176_p3) target bundleno = 2293 (0x8f5), region = 80 }
  0x17   : > { %s469_s28 = sshll.u32 %s3065_s23, 4  ;;  %s470_s28 = int_to_ptr.vmem [resolvable:$true] %s469_s28 }
  0x18   : > { %2822 = dma.hbm_to_vmem [thread:$0]  (!%p3184_p5), %s468_s19, 4096, %s470_s28, [#allocation6], %s3063_s14, %s3063_s14, %s3064_s12  }
  0x1b   : > { %3040 = dma.done.wait (%p3172_p2), [#allocation4], 1024  }
  0x1c   : > { %3042 = vsyncadd (%p3172_p2), [#allocation4], 4294966272 }
  0x1d   : > { %3044 = dma.done.wait (%p3172_p2), [#allocation6], 8192  }
  0x1e   : > { %3046 = vsyncadd (%p3172_p2), [#allocation6], 4294959104  ;;  %p590_p7 = scmp.lt.s32.totalorder %s3049_s18, 1  ;;  %v3066_v4 = vmov 128.0   ;;  %v2333_v27 = vld [vmem:[%s3592_s5 + $0xa8] sm:$0xf] }
  0x1f   : > { %2875 = vrcp.f32 %v3066_v4  ;;  %v2711_v28 = vld [vmem:[%s3592_s5 + $0xb0] sm:$0xf0]  ;;  %v2365_v29 = vld [vmem:[%s3592_s5 + $0xac] sm:$0xf]  ;;  %v2719_v31 = vld [vmem:[%s3592_s5 + $0xb4] sm:$0xf0] }
  0x20   : > { %s3624_s18 = smov (!%p590_p7, %s3049_s18), 1  ;;  %v2334_v30 = vor.u32 %v2711_v28, %v2333_v27  ;;  %v2397_v32 = vld [vmem:[%s3592_s5 + $0xb0] sm:$0xf]  ;;  %v2727_v33 = vld [vmem:[%s3592_s5 + $0xb8] sm:$0xf0]  ;;  %v2366_v34 = vor.u32 %v2719_v31, %v2365_v29  ;;  %vm1009_vm13 = vcmask 261120  }
  0x21   : > { %s3218_s11 = sshll.u32 %s3624_s18, 4  ;;  %s607_s25 = scalar_lea.vmem %s3589_s2, %s3624_s18  ;;  %v2398_v35 = vor.u32 %v2727_v33, %v2397_v32  ;;  %v2329_v36 = vld [vmem:[%s3592_s5 + $0x90] sm:$0xf]  ;;  %v2710_v37 = vld [vmem:[%s3592_s5 + $0x98] sm:$0xf0] }
  0x22   : > { %s603_s15 = scalar_lea.vmem %s3588_s1, %s3218_s11  ;;  %s594_s16 = scalar_lea.vmem %s3587_s0, %s3218_s11  ;;  %797 = vmatpush.bf16.msra.mxu0 %v2334_v30  ;;  %881 = vmatpush.bf16.msra.mxu1 %v2366_v34  ;;  %v2361_v38 = vld [vmem:[%s3592_s5 + $0x94] sm:$0xf]  ;;  %v2330_v39 = vor.u32 %v2710_v37, %v2329_v36  ;;  %v2718_v40 = vld [vmem:[%s3592_s5 + $0x9c] sm:$0xf0]  ;;  %v2393_v41 = vld [vmem:[%s3592_s5 + $0x98] sm:$0xf] }
  0x23   : > { %v3232_v0 = vld [vmem:[%s603_s15] sm:$0xff]  ;;  %v3235_v2 = vld [vmem:[%s603_s15 + $0x8] sm:$0xff]  ;;  %965 = vmatpush.bf16.msra.mxu2 %v2398_v35  ;;  %v2362_v43 = vor.u32 %v2718_v40, %v2361_v38  ;;  %v2325_v45 = vld [vmem:[%s3592_s5 + $0x78] sm:$0xf]  ;;  %s3068_s18 = smov 64   ;;  %s3070_s24 = smov 32  }
  0x24   : > { %684 = vadd.xlane.f32.xlu1 %v3232_v0  ;;  %v619_v1 = vld [vmem:[%s594_s16] sm:$0xff]  ;;  %v620_v3 = vld [vmem:[%s594_s16 + $0x8] sm:$0xff]  ;;  %v2357_v47 = vld [vmem:[%s3592_s5 + $0x7c] sm:$0xf]  ;;  %s3615_s26 = sld [smem:[#allocation13_spill]] }
  0x25   : > { %624 = vadd.xlane.f32.xlu0 %v619_v1  ;;  %v2876_v5 = vpop.eup %2875  ;;  %v2726_v42 = vld [vmem:[%s3592_s5 + $0xa0] sm:$0xf0]  ;;  %v2717_v49 = vld [vmem:[%s3592_s5 + $0x84] sm:$0xf0]  ;;  %v2389_v50 = vld [vmem:[%s3592_s5 + $0x80] sm:$0xf] }
  0x26   : > { %v629_v6 = vmul.f32 128.0, %v2876_v5  ;;  %vm633_vm0 = vweird.f32 %v2876_v5  ;;  %v2394_v44 = vor.u32 %v2726_v42, %v2393_v41  ;;  %798 = vmatpush.bf16.msra.mxu0 %v2330_v39  ;;  %882 = vmatpush.bf16.msra.mxu1 %v2362_v43  ;;  %v2709_v46 = vld [vmem:[%s3592_s5 + $0x80] sm:$0xf0]  ;;  %v2725_v51 = vld [vmem:[%s3592_s5 + $0x88] sm:$0xf0]  ;;  %v2358_v52 = vor.u32 %v2717_v49, %v2357_v47  ;;  %s3616_s17 = sld [smem:[#allocation14_spill]] }
  0x27   : > { %v2326_v48 = vor.u32 %v2709_v46, %v2325_v45  ;;  %v2390_v53 = vor.u32 %v2725_v51, %v2389_v50  ;;  %v2321_v54 = vld [vmem:[%s3592_s5 + $0x60] sm:$0xf]  ;;  %v2708_v55 = vld [vmem:[%s3592_s5 + $0x68] sm:$0xf0]  ;;  %v2353_v56 = vld [vmem:[%s3592_s5 + $0x64] sm:$0xf] }
  0x28   : > { %v630_v7 = vsub.f32 1.0, %v629_v6  ;;  %966 = vmatpush.bf16.msra.mxu2 %v2394_v44  ;;  %v2322_v57 = vor.u32 %v2708_v55, %v2321_v54  ;;  %v2716_v58 = vld [vmem:[%s3592_s5 + $0x6c] sm:$0xf0]  ;;  %v2385_v59 = vld [vmem:[%s3592_s5 + $0x68] sm:$0xf] }
  0x29   : > { %v2724_v60 = vld [vmem:[%s3592_s5 + $0x70] sm:$0xf0]  ;;  %v2354_v61 = vor.u32 %v2716_v58, %v2353_v56  ;;  %v2317_v63 = vld [vmem:[%s3592_s5 + $0x48] sm:$0xf]  ;;  %v2381_v6 = vld [vmem:[%s3592_s5 + $0x50] sm:$0xf] }
  0x2a   : > { %v631_v8 = vmul.f32 %v2876_v5, %v630_v7  ;;  %799 = vmatpush.bf16.msra.mxu0 %v2326_v48  ;;  %883 = vmatpush.bf16.msra.mxu1 %v2358_v52  ;;  %v2386_v62 = vor.u32 %v2724_v60, %v2385_v59  ;;  %v2723_v7 = vld [vmem:[%s3592_s5 + $0x58] sm:$0xf0]  ;;  %v2713_v28 = vld [vmem:[%s3592_s5 + $0x24] sm:$0xf0]  ;;  %v2373_v29 = vld [vmem:[%s3592_s5 + $0x20] sm:$0xf] }
  0x2b   : > { %v2721_v30 = vld [vmem:[%s3592_s5 + $0x28] sm:$0xf0]  ;;  %v2305_v33 = vld [vmem:[%s3592_s5] sm:$0xf]  ;;  %v2337_v35 = vld [vmem:[%s3592_s5 + $0x4] sm:$0xf] }
  0x2c   : > { %686 = vadd.xlane.f32.xlu1 %v3235_v2  ;;  %v632_v9 = vadd.f32 %v2876_v5, %v631_v8  ;;  %967 = vmatpush.bf16.msra.mxu2 %v2390_v53  ;;  %v2374_v32 = vor.u32 %v2721_v30, %v2373_v29  ;;  %v2704_v34 = vld [vmem:[%s3592_s5 + $0x8] sm:$0xf0]  ;;  %v2712_v37 = vld [vmem:[%s3592_s5 + $0xc] sm:$0xf0]  ;;  %v2369_v38 = vld [vmem:[%s3592_s5 + $0x8] sm:$0xf] }
  0x2d   : > { %626 = vadd.xlane.f32.xlu0 %v620_v3  ;;  %v2720_v39 = vld [vmem:[%s3592_s5 + $0x10] sm:$0xf0]  ;;  %v2306_v42 = vor.u32 %v2704_v34, %v2305_v33  ;;  %v2338_v44 = vor.u32 %v2712_v37, %v2337_v35 }
  0x2e   : > { %v3238_v10 = vsel %vm633_vm0, %v2876_v5, %v632_v9  ;;  %800 = vmatpush.bf16.msra.mxu0 %v2322_v57  ;;  %884 = vmatpush.bf16.msra.mxu1 %v2354_v61  ;;  %v2715_v5 = vld [vmem:[%s3592_s5 + $0x54] sm:$0xf0]  ;;  %v2382_v9 = vor.u32 %v2723_v7, %v2381_v6  ;;  %v2370_v45 = vor.u32 %v2720_v39, %v2369_v38  ;;  %vm1034_vm0 = vcmask 130048  }
  0x30   : > { %968 = vmatpush.bf16.msra.mxu2 %v2386_v62 }
  0x34   : > { %969 = vmatpush.bf16.msra.mxu2 %v2382_v9 }
  0x97   : > { %v685_v11 = vpop.xlane.xlu1 %684 }
  0x98   : > { %v688_v12 = vmul.f32 %v685_v11, %v3238_v10  ;;  %v625_v13 = vpop.xlane.xlu0 %624  ;;  %v2313_v11 = vld [vmem:[%s3592_s5 + $0x30] sm:$0xf] }
  0x99   : > { %v635_v14 = vmul.f32 %v3238_v10, %v625_v13  ;;  %v2345_v13 = vld [vmem:[%s3592_s5 + $0x34] sm:$0xf] }
  0x9a   : > { %v3243_v15 = vsub.f32 %v3232_v0, %v688_v12  ;;  %v2706_v12 = vld [vmem:[%s3592_s5 + $0x38] sm:$0xf0] }
  0x9b   : > { %v3245_v16 = vsub.f32 %v619_v1, %v635_v14  ;;  %v2707_v1 = vld [vmem:[%s3592_s5 + $0x50] sm:$0xf0]  ;;  %v2314_v14 = vor.u32 %v2706_v12, %v2313_v11 }
  0x9c   : > { %v692_v17 = vmul.f32 %v3243_v15, %v3243_v15  ;;  %v2318_v4 = vor.u32 %v2707_v1, %v2317_v63 }
  0x9d   : > { %v639_v18 = vmul.f32 %v3245_v16, %v3245_v16 }
  0x9e   : > { %694 = vadd.xlane.f32.xlu0 %v692_v17  ;;  %801 = vmatpush.bf16.msra.mxu0 %v2318_v4  ;;  %v2714_v17 = vld [vmem:[%s3592_s5 + $0x3c] sm:$0xf0] }
  0x9f   : > { %641 = vadd.xlane.f32.xlu2 %v639_v18  ;;  %v687_v19 = vpop.xlane.xlu1 %686  ;;  %v2377_v18 = vld [vmem:[%s3592_s5 + $0x38] sm:$0xf] }
  0xa0   : > { %v689_v20 = vmul.f32 %v687_v19, %v3238_v10  ;;  %v627_v21 = vpop.xlane.xlu0 %626  ;;  %v2722_v19 = vld [vmem:[%s3592_s5 + $0x40] sm:$0xf0] }
  0xa1   : > { %v636_v22 = vmul.f32 %v3238_v10, %v627_v21  ;;  %v2378_v21 = vor.u32 %v2722_v19, %v2377_v18  ;;  %v2866_v19 = vld [vmem:[%s3590_s3] ss:$0 sm:$0xff] }
  0xa2   : > { %v3254_v23 = vsub.f32 %v3235_v2, %v689_v20  ;;  %v2346_v20 = vor.u32 %v2714_v17, %v2345_v13  ;;  %802 = vmatpush.bf16.msra.mxu0 %v2314_v14 }
  0xa3   : > { %v3256_v24 = vsub.f32 %v620_v3, %v636_v22  ;;  %v2349_v3 = vld [vmem:[%s3592_s5 + $0x4c] sm:$0xf]  ;;  %v2309_v22 = vld [vmem:[%s3592_s5 + $0x18] sm:$0xf]  ;;  %970 = vmatpush.bf16.msra.mxu2 %v2378_v21 }
  0xa4   : > { %v693_v25 = vmul.f32 %v3254_v23, %v3254_v23  ;;  %v2350_v8 = vor.u32 %v2715_v5, %v2349_v3 }
  0xa5   : > { %v640_v26 = vmul.f32 %v3256_v24, %v3256_v24 }
  0xa6   : > { %696 = vadd.xlane.f32.xlu1 %v693_v25  ;;  %885 = vmatpush.bf16.msra.mxu1 %v2350_v8  ;;  %v2705_v25 = vld [vmem:[%s3592_s5 + $0x20] sm:$0xf0] }
  0xa7   : > { %643 = vadd.xlane.f32.xlu2 %v640_v26  ;;  %v2341_v26 = vld [vmem:[%s3592_s5 + $0x1c] sm:$0xf]  ;;  %v2310_v27 = vor.u32 %v2705_v25, %v2309_v22  ;;  %971 = vmatpush.bf16.msra.mxu2 %v2374_v32 }
  0xa8   : > { %v2342_v31 = vor.u32 %v2713_v28, %v2341_v26 }
  0xa9   : > { %803 = vmatpush.bf16.msra.mxu0 %v2310_v27  ;;  %v2867_v27 = vld [vmem:[%s3591_s4] ss:$0 sm:$0xff] }
  0xaa   : > { %886 = vmatpush.bf16.msra.mxu1 %v2346_v20 }
  0xab   : > { %972 = vmatpush.bf16.msra.mxu2 %v2370_v45  ;;  %v2868_v45 = vld [vmem:[%s3593_s6] ss:$0 sm:$0xff] }
  0xad   : > { %804 = vmatpush.bf16.msra.mxu0 %v2306_v42  ;;  %v2870_v42 = vld [vmem:[%s3593_s6 + $0x2] ss:$0 sm:$0xff] }
  0xae   : > { %887 = vmatpush.bf16.msra.mxu1 %v2342_v31 }
  0xb2   : > { %888 = vmatpush.bf16.msra.mxu1 %v2338_v44 }
 0x111   : > { %v695_v36 = vpop.xlane.xlu0 %694 }
 0x112   : > { %v642_v40 = vpop.xlane.xlu2 %641  ;;  %v698_v41 = vmul.f32 %v695_v36, %v3238_v10 }
 0x113   : > { %v645_v43 = vmul.f32 %v642_v40, %v3238_v10 }
 0x114   : > { %v700_v46 = vadd.f32 1e-05, %v698_v41 }
 0x115   : > { %v647_v47 = vadd.f32 1e-05, %v645_v43 }
 0x116   : > { %2877 = vrsqrt.f32 %v700_v46  ;;  %vm708_vm1 = vweird.f32 %v700_v46 }
 0x117   : > { %2879 = vrsqrt.f32 %v647_v47  ;;  %vm655_vm4 = vweird.f32 %v647_v47 }
 0x119   : > { %v697_v48 = vpop.xlane.xlu1 %696 }
 0x11a   : > { %v699_v49 = vmul.f32 %v697_v48, %v3238_v10  ;;  %v644_v50 = vpop.xlane.xlu2 %643 }
 0x11b   : > { %v646_v51 = vmul.f32 %v644_v50, %v3238_v10 }
 0x11c   : > { %v2878_v52 = vpop.eup %2877  ;;  %v701_v53 = vadd.f32 1e-05, %v699_v49 }
 0x11d   : > { %v2880_v54 = vpop.eup %2879  ;;  %v703_v55 = vmul.f32 %v2878_v52, %v700_v46  ;;  %v648_v56 = vadd.f32 1e-05, %v646_v51  ;;  %vm709_vm2 = vweird.f32 %v2878_v52 }
 0x11e   : > { %v650_v57 = vmul.f32 %v2880_v54, %v647_v47  ;;  %2881 = vrsqrt.f32 %v701_v53  ;;  %vm656_vm3 = vweird.f32 %v2880_v54  ;;  %vm710_vm5 = vmor %vm708_vm1, %vm709_vm2  ;;  %vm718_vm7 = vweird.f32 %v701_v53 }
 0x11f   : > { %v704_v58 = vmul.f32 %v2878_v52, %v703_v55  ;;  %2883 = vrsqrt.f32 %v648_v56  ;;  %vm657_vm6 = vmor %vm655_vm4, %vm656_vm3  ;;  %vm665_vm11 = vweird.f32 %v648_v56  ;;  %vm1085_vm1 = vcmask 257024  }
 0x120   : > { %v651_v59 = vmul.f32 %v2880_v54, %v650_v57  ;;  %vm1171_vm2 = vcmask 519424   ;;  %vm1257_vm3 = vcmask 781824   ;;  %vm1343_vm4 = vcmask 1044224  }
 0x121   : > { %v705_v60 = vmul.f32 0.5, %v704_v58 }
 0x122   : > { %v652_v61 = vmul.f32 0.5, %v651_v59 }
 0x123   : > { %v706_v62 = vsub.f32 1.5, %v705_v60 }
 0x124   : > { %v2882_v63 = vpop.eup %2881  ;;  %v653_v1 = vsub.f32 1.5, %v652_v61 }
 0x125   : > { %v2884_v3 = vpop.eup %2883  ;;  %v707_v4 = vmul.f32 %v2878_v52, %v706_v62  ;;  %v713_v5 = vmul.f32 %v2882_v63, %v701_v53  ;;  %vm719_vm8 = vweird.f32 %v2882_v63 }
 0x126   : > { %v654_v6 = vmul.f32 %v2880_v54, %v653_v1  ;;  %v660_v7 = vmul.f32 %v2884_v3, %v648_v56  ;;  %vm666_vm9 = vweird.f32 %v2884_v3  ;;  %vm720_vm10 = vmor %vm718_vm7, %vm719_vm8 }
 0x127   : > { %v714_v8 = vmul.f32 %v2882_v63, %v713_v5  ;;  %v711_v12 = vsel %vm710_vm5, %v2878_v52, %v707_v4  ;;  %vm667_vm12 = vmor %vm665_vm11, %vm666_vm9 }
 0x128   : > { %v661_v9 = vmul.f32 %v2884_v3, %v660_v7  ;;  %v658_v14 = vsel %vm657_vm6, %v2880_v54, %v654_v6  ;;  %v722_v20 = vmul.f32 %v711_v12, %v3243_v15  ;;  %v981_v6 = vlaneseq }
 0x129   : > { %v715_v11 = vmul.f32 0.5, %v714_v8  ;;  %v669_v22 = vmul.f32 %v658_v14, %v3245_v16 }
 0x12a   : > { %v662_v13 = vmul.f32 0.5, %v661_v9  ;;  %v724_v29 = vmul.f32 %v2866_v19, %v722_v20  ;;  %v982_v7 = vshrl.u32 %v981_v6, 7  ;;  %v988_v8 = vand.u32 127, %v981_v6  ;;  %v2865_v9 = vld [vmem:[%s607_s25] ss:$0 sm:$0xff]  ;;  %s3069_s25 = smov 96  }
 0x12b   : > { %v716_v17 = vsub.f32 1.5, %v715_v11  ;;  %v675_v32 = vmul.f32 %v2866_v19, %v669_v22  ;;  %v3067_v11 = vmov -1e+30  }
 0x12c   : > { %v663_v18 = vsub.f32 1.5, %v662_v13  ;;  %v726_v34 = vadd.f32 %v2867_v27, %v724_v29  ;;  %vm989_vm14 = vcmp.le.s32.totalorder %v988_v8, %v982_v7  ;;  %v983_v13 = vadd.s32 8, %v982_v7 }
 0x12d   : > { %v717_v21 = vmul.f32 %v2882_v63, %v716_v17  ;;  %v681_v35 = vadd.f32 %v2867_v27, %v675_v32  ;;  %v991_v12 = vsel %vm989_vm14, 0.0, %v3067_v11 }
 0x12e   : > { %v664_v25 = vmul.f32 %v2884_v3, %v663_v18  ;;  %v3439_v14 = vadd.f32 %v2865_v9, %v991_v12  ;;  %vm990_vm15 = vcmp.le.s32.totalorder %v988_v8, %v983_v13 }
 0x12f   : > { %v721_v26 = vsel %vm720_vm10, %v2882_v63, %v717_v21  ;;  %v992_v20 = vsel %vm990_vm15, 0.0, %v3067_v11 }
 0x130   : > { %v723_v28 = vmul.f32 %v721_v26, %v3254_v23  ;;  %v668_v30 = vsel %vm667_vm12, %v2884_v3, %v664_v25  ;;  %v2869_v23 = vld [vmem:[%s3593_s6 + $0x1] ss:$0 sm:$0xff]  ;;  %v3443_v22 = vadd.f32 %v2865_v9, %v992_v20 }
 0x131   : > { %v670_v31 = vmul.f32 %v668_v30, %v3256_v24 }
 0x132   : > { %v725_v15 = vmul.f32 %v2866_v19, %v723_v28 }
 0x133   : > { %v676_v33 = vmul.f32 %v2866_v19, %v670_v31 }
 0x134   : > { %v727_v16 = vadd.f32 %v2867_v27, %v725_v15 }
 0x135   : > { %v682_v36 = vadd.f32 %v2867_v27, %v676_v33 }
 0x136   : > { %v728_v37 = vpack.c.bf16 %v727_v16, %v726_v34 }
 0x137   : > { %v683_v38 = vpack.c.bf16 %v682_v36, %v681_v35 }
 0x138   : > { %805 = vmatmul.bf16.vlgmr.msra.gmra.mxu0 %v728_v37 }
 0x139   : > { %889 = vmatmul.bf16.vlgmr.msra.gmra.mxu1 %v683_v38  ;;  %973 = vmatmul.bf16.vlgmr.msra.gmra.mxu2 %v683_v38 }
 0x1b5   : > { %v806_v39 = vpop.f32.mrf.mxu0 }
 0x1b6   : > { %v890_v40 = vpop.f32.mrf.mxu1  ;;  %v807_v51 = vadd.f32 %v2868_v45, %v806_v39 }
 0x1b7   : > { %v891_v41 = vadd.f32 %v2869_v23, %v890_v40 }
 0x1b8   : > { %v811_v59 = vpack.c.bf16 %v807_v51, %v807_v51 }
 0x1b9   : > { %v895_v46 = vpack.c.bf16 %v891_v41, %v891_v41 }
 0x1ba   : > { %v1001_v3 = vunpack.c.l.b16 %v811_v59 }
 0x1bb   : > { %v1006_v52 = vunpack.c.l.b16 %v895_v46 }
 0x1bc   : > { %v974_v24 = vpop.f32.mrf.mxu2 }
 0x1bd   : > { %v808_v43 = vpop.f32.mrf.mxu0  ;;  %v975_v48 = vadd.f32 %v2870_v42, %v974_v24 }
 0x1be   : > { %v892_v44 = vpop.f32.mrf.mxu1  ;;  %v809_v49 = vadd.f32 %v2868_v45, %v808_v43 }
 0x1bf   : > { %v893_v47 = vadd.f32 %v2869_v23, %v892_v44  ;;  %v979_v55 = vpack.c.bf16 %v975_v48, %v975_v48 }
 0x1c0   : > { %v812_v56 = vpack.c.bf16 %v809_v49, %v809_v49 }
 0x1c1   : > { %v896_v50 = vpack.c.bf16 %v893_v47, %v893_v47  ;;  %v1062_v62 = vunpack.c.l.b16 %v979_v55 }
 0x1c2   : > { %v1002_v63 = vunpack.c.l.b16 %v812_v56 }
 0x1c3   : > { %v1007_v53 = vunpack.c.l.b16 %v896_v50 }
 0x1c4   : > { %v976_v54 = vpop.f32.mrf.mxu2  ;;  %v1003_v5 = vpack.c.b16 %v1002_v63, %v1001_v3 }
 0x1c5   : > { %v1008_v57 = vpack.c.b16 %v1007_v53, %v1006_v52  ;;  %v977_v58 = vadd.f32 %v2870_v42, %v976_v54 }
 0x1c7   : > { %v980_v60 = vpack.c.bf16 %v977_v58, %v977_v58  ;;  %v1014_v61 = vsel %vm1009_vm13, %v1008_v57, 0 }
 0x1c8   : > { %1023 = vmatpush.bf16.xpose.msra.mxu3 %v1014_v61 }
 0x1c9   : > { %v1063_v1 = vunpack.c.l.b16 %v980_v60 }
 0x1cb   : > { %v3430_v4 = vpack.c.b16 %v1063_v1, %v1062_v62 }
 0x1cf   : > { %2399 = vmatmul.msk.bf16.vlgmr.msra.gmra.mxu3 %vm1009_vm13, %v1003_v5 }
 0x1d0   : > { %1076 = vmatpush.bf16.msrb.mxu3 %v3430_v4 }
 0x252   : > { %v1025_v17 = vpop.f32.mrf.mxu3 }
 0x253   : > { %v1030_v18 = vmul.f32 0.17677669, %v1025_v17 }
 0x255   : > { %v1032_v19 = vadd.f32 %v1030_v18, %v3439_v14 }
 0x257   : > { %v1035_v21 = vsel %vm1034_vm0, %v1032_v19, -inf }
 0x258   : > { %1036 = vmax.xlane.f32.xlu2 %v1035_v21 }
 0x25a   : > { %v1027_v25 = vpop.f32.mrf.mxu3 }
 0x25b   : > { %v1031_v26 = vmul.f32 0.17677669, %v1027_v25 }
 0x25d   : > { %v1033_v27 = vadd.f32 %v1031_v26, %v3443_v22 }
 0x25f   : > { %v1038_v28 = vsel %vm1034_vm0, %v1033_v27, -inf }
 0x260   : > { %1039 = vmax.xlane.f32.xlu0 %v1038_v28 }
 0x270   : > { %1176 = vrot.lane.b32.xlu2 %v1008_v57, %s3068_s18 }
 0x274   : > { %1090 = vrot.lane.b32.xlu0 %v1008_v57, %s3069_s25 }
 0x27c   : > { %1262 = vrot.lane.b32.xlu0 %v1008_v57, %s3070_s24 }
 0x2cb   : > { %v1037_v29 = vpop.xlane.xlu2 %1036 }
 0x2cc   : > { %v1041_v30 = vsub.f32 %v1032_v19, %v1037_v29 }
 0x2ce   : > { %v1043_v31 = vmul.f32 1.442695, %v1041_v30 }
 0x2d0   : > { %2885 = vpow2.f32 %v1043_v31 }
 0x2d3   : > { %v1177_v32 = vpop.permute.xlu2 %1176  ;;  %v1040_v15 = vpop.xlane.xlu0 %1039 }
 0x2d4   : > { %v1042_v33 = vsub.f32 %v1033_v27, %v1040_v15  ;;  %v1182_v34 = vsel %vm1009_vm13, %v1177_v32, 0 }
 0x2d5   : > { %1191 = vmatpush.bf16.xpose.msrb.mxu2 %v1182_v34 }
 0x2d6   : > { %v2886_v16 = vpop.eup %2885  ;;  %v1045_v35 = vmul.f32 1.442695, %v1042_v33 }
 0x2d7   : > { %v1047_v36 = vsel %vm1034_vm0, %v2886_v16, 0.0 }
 0x2d8   : > { %2887 = vpow2.f32 %v1045_v35  ;;  %1048 = vadd.xlane.f32.xlu1 %v1047_v36 }
 0x2de   : > { %v2888_v37 = vpop.eup %2887 }
 0x2df   : > { %v1050_v38 = vsel %vm1034_vm0, %v2888_v37, 0.0 }
 0x2e0   : > { %1051 = vadd.xlane.f32.xlu2 %v1050_v38 }
 0x2e6   : > { %v1091_v39 = vpop.permute.xlu0 %1090 }
 0x2e7   : > { %v1096_v40 = vsel %vm1009_vm13, %v1091_v39, 0 }
 0x2e8   : > { %1105 = vmatpush.bf16.xpose.msra.mxu3 %v1096_v40 }
 0x2ee   : > { %v1263_v48 = vpop.permute.xlu0 %1262 }
 0x2ef   : > { %v1268_v50 = vsel %vm1009_vm13, %v1263_v48, 0 }
 0x2f1   : > { %1088 = vrot.lane.b32.xlu1 %v1003_v5, %s3069_s25 }
 0x2f8   : > { %1174 = vrot.lane.b32.xlu2 %v1003_v5, %s3068_s18 }
 0x2f9   : > { %1260 = vrot.lane.b32.xlu1 %v1003_v5, %s3070_s24 }
 0x34b   : > { %v1049_v23 = vpop.xlane.xlu1 %1048 }
 0x34c   : > { %v1053_v41 = vmax.f32 %v1049_v23, 1e-30 }
 0x34e   : > { %2889 = vrcp.f32 %v1053_v41 }
 0x353   : > { %v1052_v24 = vpop.xlane.xlu2 %1051 }
 0x354   : > { %v1054_v42 = vmax.f32 %v1052_v24, 1e-30  ;;  %v2890_v43 = vpop.eup %2889 }
 0x355   : > { %v1057_v46 = vmul.f32 %v2890_v43, %v2886_v16 }
 0x356   : > { %2891 = vrcp.f32 %v1054_v42 }
 0x35b   : > { %v1175_v44 = vpop.permute.xlu2 %1174 }
 0x35c   : > { %v2892_v45 = vpop.eup %2891  ;;  %2403 = vmatmul.msk.bf16.vlgmr.msrb.gmra.mxu2 %vm1009_vm13, %v1175_v44 }
 0x35d   : > { %v1058_v47 = vmul.f32 %v2892_v45, %v2888_v37 }
 0x35f   : > { %v1059_v49 = vpack.c.bf16 %v1058_v47, %v1057_v46 }
 0x361   : > { %2400 = vmatmul.msk.bf16.vlgmr.msrb.gmra.mxu3 %vm1034_vm0, %v1059_v49 }
 0x362   : > { %1277 = vmatpush.bf16.xpose.msrb.mxu3 %v1268_v50 }
 0x363   : > { %v1089_v51 = vpop.permute.xlu1 %1088 }
 0x36b   : > { %v1261_v52 = vpop.permute.xlu1 %1260 }
 0x371   : > { %2401 = vmatmul.msk.bf16.vlgmr.msra.gmra.mxu3 %vm1009_vm13, %v1089_v51 }
 0x381   : > { %2405 = vmatmul.msk.bf16.vlgmr.msrb.gmra.mxu3 %vm1009_vm13, %v1261_v52 }
 0x3df   : > { %v1193_v53 = vpop.f32.mrf.mxu2 }
 0x3e0   : > { %v1198_v54 = vmul.f32 0.17677669, %v1193_v53 }
 0x3e2   : > { %v1200_v55 = vadd.f32 %v1198_v54, %v3439_v14 }
 0x3e4   : > { %v1078_v56 = vpop.f32.mrf.mxu3  ;;  %v1202_v57 = vsel %vm1034_vm0, %v1200_v55, -inf }
 0x3e5   : > { %v1083_v58 = vpack.c.bf16 %v1078_v56, %v1078_v56  ;;  %1203 = vmax.xlane.f32.xlu1 %v1202_v57 }
 0x3e7   : > { %1086 = vst.msk [vmem:[#allocation2] sm:$0xf] %vm1085_vm1, %v1083_v58  ;;  %v1195_v63 = vpop.f32.mrf.mxu2 }
 0x3e8   : > { %v1199_v3 = vmul.f32 0.17677669, %v1195_v63 }
 0x3ea   : > { %v1201_v8 = vadd.f32 %v1199_v3, %v3443_v22 }
 0x3ec   : > { %v1080_v59 = vpop.f32.mrf.mxu3  ;;  %v1205_v11 = vsel %vm1034_vm0, %v1201_v8, -inf }
 0x3ed   : > { %v1084_v60 = vpack.c.bf16 %v1080_v59, %v1080_v59 }
 0x3ef   : > { %1087 = vst.msk [vmem:[#allocation2 + $0x4] sm:$0xf] %vm1085_vm1, %v1084_v60 }
 0x3f4   : > { %v1107_v61 = vpop.f32.mrf.mxu3 }
 0x3f5   : > { %v1112_v62 = vmul.f32 0.17677669, %v1107_v61 }
 0x3f7   : > { %v1114_v1 = vadd.f32 %v1112_v62, %v3439_v14 }
 0x3f9   : > { %v1116_v5 = vsel %vm1034_vm0, %v1114_v1, -inf }
 0x3fa   : > { %1117 = vmax.xlane.f32.xlu0 %v1116_v5 }
 0x3fc   : > { %v1109_v6 = vpop.f32.mrf.mxu3 }
 0x3fd   : > { %v1113_v7 = vmul.f32 0.17677669, %v1109_v6 }
 0x3ff   : > { %v1115_v9 = vadd.f32 %v1113_v7, %v3443_v22 }
 0x401   : > { %v1119_v12 = vsel %vm1034_vm0, %v1115_v9, -inf }
 0x402   : > { %1206 = vmax.xlane.f32.xlu0 %v1205_v11  ;;  %1120 = vmax.xlane.f32.xlu2 %v1119_v12 }
 0x404   : > { %v1279_v13 = vpop.f32.mrf.mxu3 }
 0x405   : > { %v1284_v17 = vmul.f32 0.17677669, %v1279_v13 }
 0x407   : > { %v1286_v18 = vadd.f32 %v1284_v17, %v3439_v14 }
 0x409   : > { %v1288_v19 = vsel %vm1034_vm0, %v1286_v18, -inf }
 0x40a   : > { %1289 = vmax.xlane.f32.xlu2 %v1288_v19 }
 0x40c   : > { %v1281_v20 = vpop.f32.mrf.mxu3 }
 0x40d   : > { %v1285_v21 = vmul.f32 0.17677669, %v1281_v20 }
 0x40f   : > { %v1287_v25 = vadd.f32 %v1285_v21, %v3443_v22 }
 0x411   : > { %v1291_v26 = vsel %vm1034_vm0, %v1287_v25, -inf }
 0x412   : > { %1292 = vmax.xlane.f32.xlu1 %v1291_v26 }
 0x458   : > { %v1204_v27 = vpop.xlane.xlu1 %1203 }
 0x459   : > { %v1208_v28 = vsub.f32 %v1200_v55, %v1204_v27 }
 0x45b   : > { %v1210_v29 = vmul.f32 1.442695, %v1208_v28 }
 0x45d   : > { %2893 = vpow2.f32 %v1210_v29 }
 0x463   : > { %v3474_v30 = vpop.eup %2893 }
 0x464   : > { %v1214_v31 = vsel %vm1034_vm0, %v3474_v30, 0.0 }
 0x465   : > { %1215 = vadd.xlane.f32.xlu1 %v1214_v31 }
 0x46d   : > { %v1118_v14 = vpop.xlane.xlu0 %1117 }
 0x46e   : > { %v1122_v35 = vsub.f32 %v1114_v1, %v1118_v14 }
 0x470   : > { %v1124_v36 = vmul.f32 1.442695, %v1122_v35  ;;  %v2735_v35 = vld [vmem:[#allocation3 + $0x30] sm:$0xff] }
 0x475   : > { %v1121_v32 = vpop.xlane.xlu2 %1120  ;;  %v1207_v15 = vpop.xlane.xlu0 %1206 }
 0x476   : > { %v1123_v33 = vsub.f32 %v1115_v9, %v1121_v32  ;;  %v1209_v34 = vsub.f32 %v1201_v8, %v1207_v15 }
 0x478   : > { %v1126_v16 = vmul.f32 1.442695, %v1123_v33  ;;  %v1212_v22 = vmul.f32 1.442695, %v1209_v34 }
 0x47a   : > { %2895 = vpow2.f32 %v1126_v16 }
 0x47b   : > { %2897 = vpow2.f32 %v1212_v22  ;;  %v2736_v22 = vld [vmem:[#allocation3 + $0x38] sm:$0xff] }
 0x47c   : > { %2899 = vpow2.f32 %v1124_v36  ;;  %1418 = vmatpush.bf16.msrb.mxu1 %v2736_v22  ;;  %v2734_v36 = vld [vmem:[#allocation3 + $0x28] sm:$0xff] }
 0x47d   : > { %v1290_v37 = vpop.xlane.xlu2 %1289  ;;  %v2758_v22 = vld [vmem:[#allocation5 + $0xac] sm:$0xf] }
 0x47e   : > { %v1294_v38 = vsub.f32 %v1286_v18, %v1290_v37 }
 0x480   : > { %v2896_v39 = vpop.eup %2895  ;;  %v1296_v40 = vmul.f32 1.442695, %v1294_v38  ;;  %1419 = vmatpush.bf16.msrb.mxu1 %v2735_v35  ;;  %v2535_v35 = vld [vmem:[#allocation5 + $0xb8] sm:$0xf0] }
 0x481   : > { %v2898_v23 = vpop.eup %2897  ;;  %v1131_v41 = vsel %vm1034_vm0, %v2896_v39, 0.0 }
 0x482   : > { %2901 = vpow2.f32 %v1296_v40  ;;  %1132 = vadd.xlane.f32.xlu2 %v1131_v41  ;;  %v1217_v24 = vsel %vm1034_vm0, %v2898_v23, 0.0  ;;  %v2900_v44 = vpop.eup %2899  ;;  %v2732_v40 = vld [vmem:[#allocation3 + $0x18] sm:$0xff]  ;;  %v2730_v41 = vld [vmem:[#allocation3 + $0x8] sm:$0xff] }
 0x483   : > { %1218 = vadd.xlane.f32.xlu0 %v1217_v24  ;;  %v1128_v48 = vsel %vm1034_vm0, %v2900_v44, 0.0  ;;  %v2729_v24 = vld [vmem:[#allocation3] sm:$0xff] }
 0x484   : > { %1420 = vmatpush.bf16.msrb.mxu1 %v2734_v36  ;;  %v2538_v36 = vor.u32 %v2758_v22, %v2535_v35  ;;  %v2453_v22 = vld [vmem:[#allocation5 + $0x8] sm:$0xf]  ;;  %v2740_v35 = vld [vmem:[#allocation5 + $0x14] sm:$0xf0] }
 0x485   : > { %v1293_v42 = vpop.xlane.xlu1 %1292 }
 0x486   : > { %v1295_v43 = vsub.f32 %v1287_v25, %v1293_v42 }
 0x488   : > { %v2902_v45 = vpop.eup %2901  ;;  %v1298_v46 = vmul.f32 1.442695, %v1295_v43 }
 0x489   : > { %v1300_v47 = vsel %vm1034_vm0, %v2902_v45, 0.0 }
 0x48a   : > { %2903 = vpow2.f32 %v1298_v46  ;;  %1301 = vadd.xlane.f32.xlu1 %v1300_v47  ;;  %v2871_v47 = vld [vmem:[%s3595_s8] ss:$0 sm:$0xff] }
 0x48b   : > { %1129 = vadd.xlane.f32.xlu0 %v1128_v48 }
 0x490   : > { %v2904_v49 = vpop.eup %2903 }
 0x491   : > { %v1303_v50 = vsel %vm1034_vm0, %v2904_v49, 0.0 }
 0x493   : > { %1304 = vadd.xlane.f32.xlu0 %v1303_v50 }
 0x49a   : > { %1141 = vrot.lane.b32.xlu2 %v3430_v4, %s3069_s25 }
 0x4a3   : > { %1227 = vrot.lane.b32.xlu1 %v3430_v4, %s3068_s18 }
 0x4a7   : > { %1313 = vrot.lane.b32.xlu0 %v3430_v4, %s3070_s24 }
 0x4d8   : > { %v1216_v57 = vpop.xlane.xlu1 %1215 }
 0x4d9   : > { %v1220_v62 = vmax.f32 %v1216_v57, 1e-30 }
 0x4f5   : > { %v1133_v51 = vpop.xlane.xlu2 %1132 }
 0x4f6   : > { %v1219_v52 = vpop.xlane.xlu0 %1218  ;;  %v1135_v53 = vmax.f32 %v1133_v51, 1e-30 }
 0x4f7   : > { %v1221_v59 = vmax.f32 %v1219_v52, 1e-30 }
 0x4f8   : > { %2905 = vrcp.f32 %v1135_v53 }
 0x4fd   : > { %v1142_v54 = vpop.permute.xlu2 %1141  ;;  %v1302_v3 = vpop.xlane.xlu1 %1301 }
 0x4fe   : > { %v1130_v55 = vpop.xlane.xlu0 %1129  ;;  %1154 = vmatpush.bf16.msrb.mxu0 %v1142_v54  ;;  %v2906_v58 = vpop.eup %2905  ;;  %v1306_v6 = vmax.f32 %v1302_v3, 1e-30  ;;  %v2565_v3 = vld [vmem:[#allocation5 + $0xe8] sm:$0xf] }
 0x4ff   : > { %v1134_v56 = vmax.f32 %v1130_v55, 1e-30  ;;  %v1139_v63 = vmul.f32 %v2906_v58, %v2896_v39  ;;  %v2733_v39 = vld [vmem:[#allocation3 + $0x20] sm:$0xff] }
 0x500   : > { %1421 = vmatpush.bf16.msrb.mxu1 %v2733_v39  ;;  %v2753_v39 = vld [vmem:[#allocation5 + $0x84] sm:$0xf] }
 0x501   : > { %2907 = vrcp.f32 %v1134_v56 }
 0x502   : > { %2909 = vrcp.f32 %v1221_v59 }
 0x503   : > { %2911 = vrcp.f32 %v1220_v62  ;;  %v2765_v62 = vld [vmem:[#allocation5 + $0xe4] sm:$0xf] }
 0x504   : > { %1422 = vmatpush.bf16.msrb.mxu1 %v2732_v40 }
 0x506   : > { %v1305_v61 = vpop.xlane.xlu0 %1304 }
 0x507   : > { %v2908_v60 = vpop.eup %2907  ;;  %v1307_v4 = vmax.f32 %v1305_v61, 1e-30  ;;  %v2767_v61 = vld [vmem:[#allocation5 + $0xec] sm:$0xf0] }
 0x508   : > { %v1138_v1 = vmul.f32 %v2908_v60, %v2900_v44  ;;  %v2910_v7 = vpop.eup %2909  ;;  %v2557_v60 = vld [vmem:[#allocation5 + $0xe0] sm:$0xf] }
 0x509   : > { %2913 = vrcp.f32 %v1307_v4  ;;  %v2912_v8 = vpop.eup %2911  ;;  %v1225_v9 = vmul.f32 %v2910_v7, %v2898_v23  ;;  %v2731_v23 = vld [vmem:[#allocation3 + $0x10] sm:$0xff]  ;;  %v2768_v4 = vld [vmem:[#allocation5 + $0xf4] sm:$0xf0]  ;;  %v2766_v7 = vld [vmem:[#allocation5 + $0xec] sm:$0xf] }
 0x50a   : > { %v1140_v5 = vpack.c.bf16 %v1139_v63, %v1138_v1  ;;  %2915 = vrcp.f32 %v1306_v6  ;;  %v1224_v12 = vmul.f32 %v2912_v8, %v3474_v30  ;;  %1423 = vmatpush.bf16.msrb.mxu1 %v2731_v23  ;;  %v2558_v63 = vor.u32 %v2767_v61, %v2557_v60  ;;  %v2559_v1 = vld [vmem:[#allocation5 + $0xf0] sm:$0xf0]  ;;  %v2567_v8 = vld [vmem:[#allocation5 + $0xf8] sm:$0xf0]  ;;  %v2477_v61 = vld [vmem:[#allocation5 + $0x40] sm:$0xf] }
 0x50b   : > { %v2566_v6 = vor.u32 %v2768_v4, %v2565_v3  ;;  %v2511_v23 = vld [vmem:[#allocation5 + $0x90] sm:$0xf0]  ;;  %v2485_v4 = vld [vmem:[#allocation5 + $0x48] sm:$0xf] }
 0x50c   : > { %2402 = vmatmul.msk.bf16.vlgmr.msrb.gmra.mxu0 %vm1034_vm0, %v1140_v5  ;;  %v1226_v18 = vpack.c.bf16 %v1225_v9, %v1224_v12  ;;  %v2562_v5 = vor.u32 %v2765_v62, %v2559_v1  ;;  %v2570_v9 = vor.u32 %v2766_v7, %v2567_v8  ;;  %v2763_v12 = vld [vmem:[#allocation5 + $0xcc] sm:$0xf0]  ;;  %v2479_v3 = vld [vmem:[#allocation5 + $0x50] sm:$0xf0]  ;;  %v2746_v8 = vld [vmem:[#allocation5 + $0x4c] sm:$0xf] }
 0x50d   : > { %v2747_v62 = vld [vmem:[#allocation5 + $0x4c] sm:$0xf0] }
 0x50e   : > { %1424 = vmatpush.bf16.msrb.mxu1 %v2730_v41  ;;  %1709 = vmatpush.bf16.msra.mxu3 %v2562_v5  ;;  %v2517_v41 = vld [vmem:[#allocation5 + $0x88] sm:$0xf]  ;;  %v2478_v1 = vor.u32 %v2747_v62, %v2477_v61  ;;  %v2748_v5 = vld [vmem:[#allocation5 + $0x54] sm:$0xf0] }
 0x50f   : > { %v2914_v11 = vpop.eup %2913  ;;  %v2486_v7 = vor.u32 %v2748_v5, %v2485_v4  ;;  %v2873_v61 = vld [vmem:[%s3597_s10] ss:$0 sm:$0xff]  ;;  %v2791_v5 = vld [vmem:[#allocation7 + $0xb0] sm:$0xff] }
 0x510   : > { %v2916_v17 = vpop.eup %2915  ;;  %v1311_v19 = vmul.f32 %v2914_v11, %v2904_v49  ;;  %v2541_v11 = vld [vmem:[#allocation5 + $0xc0] sm:$0xf]  ;;  %v2800_v4 = vld [vmem:[#allocation7 + $0xf8] sm:$0xff] }
 0x511   : > { %v1310_v20 = vmul.f32 %v2916_v17, %v2902_v45  ;;  %v2542_v17 = vor.u32 %v2763_v12, %v2541_v11  ;;  %v2461_v12 = vld [vmem:[#allocation5 + $0x20] sm:$0xf] }
 0x512   : > { %1425 = vmatpush.bf16.msrb.mxu1 %v2729_v24  ;;  %v2756_v24 = vld [vmem:[#allocation5 + $0x94] sm:$0xf0] }
 0x513   : > { %v1312_v25 = vpack.c.bf16 %v1311_v19, %v1310_v20  ;;  %v2549_v19 = vld [vmem:[#allocation5 + $0xc8] sm:$0xf]  ;;  %v2764_v20 = vld [vmem:[#allocation5 + $0xd4] sm:$0xf0] }
 0x515   : > { %v1228_v13 = vpop.permute.xlu1 %1227 }
 0x516   : > { %1240 = vmatpush.bf16.msra.mxu2 %v1228_v13  ;;  %v2761_v13 = vld [vmem:[#allocation5 + $0xc4] sm:$0xf]  ;;  %1737 = vmatpush.bf16.msra.mxu1 %v2570_v9  ;;  %v2487_v9 = vld [vmem:[#allocation5 + $0x58] sm:$0xf0] }
 0x517   : > { %v2490_v11 = vor.u32 %v2746_v8, %v2487_v9  ;;  %v2790_v8 = vld [vmem:[#allocation7 + $0xa8] sm:$0xff] }
 0x518   : > { %v2798_v9 = vld [vmem:[#allocation7 + $0xe8] sm:$0xff] }
 0x519   : > { %v1314_v21 = vpop.permute.xlu0 %1313  ;;  %2404 = vmatmul.msk.bf16.vlgmr.msra.gmra.mxu2 %vm1034_vm0, %v1226_v18  ;;  %v2543_v18 = vld [vmem:[#allocation5 + $0xd0] sm:$0xf0] }
 0x51a   : > { %1326 = vmatpush.bf16.msra.mxu0 %v1314_v21  ;;  %1695 = vmatpush.bf16.msrb.mxu2 %v2558_v63  ;;  %v2546_v21 = vor.u32 %v2761_v13, %v2543_v18  ;;  %v2745_v63 = vld [vmem:[#allocation5 + $0x44] sm:$0xf]  ;;  %v2743_v13 = vld [vmem:[#allocation5 + $0x2c] sm:$0xf0] }
 0x51b   : > { %v2462_v18 = vor.u32 %v2743_v13, %v2461_v12  ;;  %v2783_v12 = vld [vmem:[#allocation7 + $0x70] sm:$0xff]  ;;  %v2789_v13 = vld [vmem:[#allocation7 + $0xa0] sm:$0xff] }
 0x51c   : > { %1710 = vmatpush.bf16.msra.mxu3 %v2546_v21  ;;  %v2744_v21 = vld [vmem:[#allocation5 + $0x34] sm:$0xf0] }
 0x51d   : > { %2406 = vmatmul.msk.bf16.vlgmr.msra.gmra.mxu0 %vm1034_vm0, %v1312_v25  ;;  %v2550_v25 = vor.u32 %v2764_v20, %v2549_v19  ;;  %v2463_v19 = vld [vmem:[#allocation5 + $0x30] sm:$0xf0]  ;;  %v2469_v20 = vld [vmem:[#allocation5 + $0x28] sm:$0xf] }
 0x51e   : > { %1723 = vmatpush.bf16.msrb.mxu0 %v2566_v6  ;;  %1696 = vmatpush.bf16.msrb.mxu2 %v2542_v17  ;;  %v2482_v6 = vor.u32 %v2745_v63, %v2479_v3  ;;  %v2741_v17 = vld [vmem:[#allocation5 + $0x24] sm:$0xf] }
 0x522   : > { %1724 = vmatpush.bf16.msrb.mxu0 %v2550_v25 }
 0x589   : > { %v1156_v26 = vpop.f32.mrf.mxu0 }
 0x58a   : > { %v1161_v27 = vpack.c.bf16 %v1156_v26, %v1156_v26  ;;  %v2762_v26 = vld [vmem:[#allocation5 + $0xcc] sm:$0xf] }
 0x58c   : > { %1165 = vrot.lane.b32.xlu2 %v1161_v27, %s3070_s24  ;;  %v2551_v27 = vld [vmem:[#allocation5 + $0xd8] sm:$0xf0] }
 0x591   : > { %v1158_v28 = vpop.f32.mrf.mxu0 }
 0x592   : > { %v1162_v29 = vpack.c.bf16 %v1158_v28, %v1158_v28  ;;  %v2554_v28 = vor.u32 %v2762_v26, %v2551_v27  ;;  %v2466_v26 = vor.u32 %v2741_v17, %v2463_v19  ;;  %v2470_v27 = vor.u32 %v2744_v21, %v2469_v20  ;;  %v2797_v17 = vld [vmem:[#allocation7 + $0xe0] sm:$0xff]  ;;  %v2782_v19 = vld [vmem:[#allocation7 + $0x68] sm:$0xff]  ;;  %v2788_v20 = vld [vmem:[#allocation7 + $0x98] sm:$0xff] }
 0x593   : > { %v2796_v21 = vld [vmem:[#allocation7 + $0xd8] sm:$0xff] }
 0x594   : > { %1167 = vrot.lane.b32.xlu2 %v1162_v29, %s3070_s24  ;;  %v2525_v29 = vld [vmem:[#allocation5 + $0xa0] sm:$0xf]  ;;  %1738 = vmatpush.bf16.msra.mxu1 %v2554_v28  ;;  %v2742_v28 = vld [vmem:[#allocation5 + $0x2c] sm:$0xf] }
 0x598   : > { %1739 = vmatpush.bf16.msra.mxu1 %v2538_v36  ;;  %v2738_v36 = vld [vmem:[#allocation5 + $0xc] sm:$0xf] }
 0x59a   : > { %v1328_v30 = vpop.f32.mrf.mxu0 }
 0x59b   : > { %v1333_v31 = vpack.c.bf16 %v1328_v30, %v1328_v30  ;;  %v2759_v30 = vld [vmem:[#allocation5 + $0xac] sm:$0xf0] }
 0x59c   : > { %v1242_v14 = vpop.f32.mrf.mxu2 }
 0x59d   : > { %v1247_v32 = vpack.c.bf16 %v1242_v14, %v1242_v14  ;;  %1337 = vrot.lane.b32.xlu2 %v1333_v31, %s3069_s25  ;;  %v2757_v31 = vld [vmem:[#allocation5 + $0xa4] sm:$0xf]  ;;  %v2526_v14 = vor.u32 %v2759_v30, %v2525_v29  ;;  %v2471_v29 = vld [vmem:[#allocation5 + $0x38] sm:$0xf0]  ;;  %v2445_v30 = vld [vmem:[#allocation5] sm:$0xf] }
 0x59f   : > { %1251 = vrot.lane.b32.xlu0 %v1247_v32, %s3068_s18  ;;  %v2527_v32 = vld [vmem:[#allocation5 + $0xb0] sm:$0xf0]  ;;  %1697 = vmatpush.bf16.msrb.mxu2 %v2526_v14  ;;  %v2474_v14 = vor.u32 %v2742_v28, %v2471_v29  ;;  %v2772_v29 = vld [vmem:[#allocation7 + $0x18] sm:$0xff] }
 0x5a0   : > { %v2795_v28 = vld [vmem:[#allocation7 + $0xd0] sm:$0xff] }
 0x5a2   : > { %v1330_v15 = vpop.f32.mrf.mxu0 }
 0x5a3   : > { %v1334_v34 = vpack.c.bf16 %v1330_v15, %v1330_v15  ;;  %v2533_v15 = vld [vmem:[#allocation5 + $0xa8] sm:$0xf] }
 0x5a4   : > { %v1244_v33 = vpop.f32.mrf.mxu2 }
 0x5a5   : > { %v1248_v16 = vpack.c.bf16 %v1244_v33, %v1244_v33  ;;  %v2760_v33 = vld [vmem:[#allocation5 + $0xb4] sm:$0xf0] }
 0x5a7   : > { %1253 = vrot.lane.b32.xlu1 %v1248_v16, %s3068_s18  ;;  %1339 = vrot.lane.b32.xlu0 %v1334_v34, %s3069_s25  ;;  %v2530_v34 = vor.u32 %v2757_v31, %v2527_v32  ;;  %v2534_v16 = vor.u32 %v2760_v33, %v2533_v15  ;;  %v2739_v32 = vld [vmem:[#allocation5 + $0xc] sm:$0xf0]  ;;  %v2737_v15 = vld [vmem:[#allocation5 + $0x4] sm:$0xf]  ;;  %v2447_v33 = vld [vmem:[#allocation5 + $0x10] sm:$0xf0] }
 0x5a8   : > { %s3617_s18 = sld [smem:[#allocation15_spill]] }
 0x5a9   : > { %1711 = vmatpush.bf16.msra.mxu3 %v2530_v34  ;;  %1725 = vmatpush.bf16.msrb.mxu0 %v2534_v16  ;;  %v2446_v34 = vor.u32 %v2739_v32, %v2445_v30  ;;  %v2450_v16 = vor.u32 %v2737_v15, %v2447_v33  ;;  %v2780_v30 = vld [vmem:[#allocation7 + $0x58] sm:$0xff]  ;;  %v2771_v15 = vld [vmem:[#allocation7 + $0x10] sm:$0xff] }
 0x5aa   : > { %v3535_v32 = vld [vmem:[%s3615_s26] sm:$0xf]  ;;  %v2779_v33 = vld [vmem:[#allocation7 + $0x50] sm:$0xff] }
 0x5ae   : > { %s616_s25 = scalar_lea.vmem %s3617_s18, %s3218_s11 }
 0x5e6   : > { %v1166_v37 = vpop.permute.xlu2 %1165 }
 0x5e7   : > { %1172 = vst.msk [vmem:[#allocation2] sm:$0xf] %vm1171_vm2, %v1166_v37  ;;  %v2509_v37 = vld [vmem:[#allocation5 + $0x80] sm:$0xf] }
 0x5ee   : > { %v1168_v38 = vpop.permute.xlu2 %1167 }
 0x5ef   : > { %1173 = vst.msk [vmem:[#allocation2 + $0x4] sm:$0xf] %vm1171_vm2, %v1168_v38  ;;  %v2755_v38 = vld [vmem:[#allocation5 + $0x8c] sm:$0xf0] }
 0x5f0   : > { %v2510_v40 = vor.u32 %v2755_v38, %v2509_v37  ;;  %v2454_v38 = vor.u32 %v2740_v35, %v2453_v22  ;;  %v1529_v22 = vperm.slane %v3535_v32, 2  ;;  %v1530_v35 = vperm.slane %v3535_v32, 3 }
 0x5f2   : > { %1698 = vmatpush.bf16.msrb.mxu2 %v2510_v40 }
 0x5f7   : > { %v1338_v43 = vpop.permute.xlu2 %1337 }
 0x611   : > { %v1252_v42 = vpop.permute.xlu0 %1251 }
 0x612   : > { %1258 = vst.msk [vmem:[#allocation2] sm:$0xf] %vm1257_vm3, %v1252_v42  ;;  %v2514_v42 = vor.u32 %v2753_v39, %v2511_v23  ;;  %v2455_v39 = vld [vmem:[#allocation5 + $0x18] sm:$0xf0] }
 0x613   : > { %1344 = vst.msk [vmem:[#allocation2] sm:$0xf] %vm1343_vm4, %v1338_v43  ;;  %v2518_v43 = vor.u32 %v2756_v24, %v2517_v41  ;;  %v2458_v40 = vor.u32 %v2738_v36, %v2455_v39  ;;  %v2770_v36 = vld [vmem:[#allocation7 + $0x8] sm:$0xff] }
 0x614   : > { %1712 = vmatpush.bf16.msra.mxu3 %v2514_v42 }
 0x615   : > { %1726 = vmatpush.bf16.msrb.mxu0 %v2518_v43 }
 0x619   : > { %v1254_v44 = vpop.permute.xlu1 %1253  ;;  %v1340_v45 = vpop.permute.xlu0 %1339 }
 0x61a   : > { %1259 = vst.msk [vmem:[#allocation2 + $0x4] sm:$0xf] %vm1257_vm3, %v1254_v44  ;;  %v2754_v44 = vld [vmem:[#allocation5 + $0x8c] sm:$0xf] }
 0x61b   : > { %1345 = vst.msk [vmem:[#allocation2 + $0x4] sm:$0xf] %vm1343_vm4, %v1340_v45  ;;  %v2519_v45 = vld [vmem:[#allocation5 + $0x98] sm:$0xf0] }
 0x622   : > { %v2728_v46 = vld [vmem:[#allocation2] sm:$0xff] }
 0x623   : > { %1426 = vmatmul.bf16.vlgmr.msrb.gmra.mxu1 %v2728_v46  ;;  %v2522_v46 = vor.u32 %v2754_v44, %v2519_v45 }
 0x625   : > { %1740 = vmatpush.bf16.msra.mxu1 %v2522_v46 }
 0x6a0   : > { %v1427_v48 = vpop.f32.mrf.mxu1 }
 0x6a1   : > { %v1432_v49 = vadd.f32 %v1427_v48, %v3232_v0  ;;  %v2751_v48 = vld [vmem:[#allocation5 + $0x6c] sm:$0xf0] }
 0x6a3   : > { %v3503_v50 = vadd.f32 %v2871_v47, %v1432_v49  ;;  %v2749_v49 = vld [vmem:[#allocation5 + $0x64] sm:$0xf] }
 0x6a5   : > { %1440 = vadd.xlane.f32.xlu1 %v3503_v50 }
 0x6a8   : > { %v1429_v51 = vpop.f32.mrf.mxu1 }
 0x6a9   : > { %v1433_v52 = vadd.f32 %v1429_v51, %v3235_v2 }
 0x6ab   : > { %v3507_v53 = vadd.f32 %v2871_v47, %v1433_v52  ;;  %v2493_v47 = vld [vmem:[#allocation5 + $0x60] sm:$0xf]  ;;  %v2495_v52 = vld [vmem:[#allocation5 + $0x70] sm:$0xf0] }
 0x6ac   : > { %v2494_v51 = vor.u32 %v2751_v48, %v2493_v47 }
 0x6ad   : > { %1442 = vadd.xlane.f32.xlu2 %v3507_v53 }
 0x6ae   : > { %1699 = vmatpush.bf16.msrb.mxu2 %v2494_v51 }
 0x6b2   : > { %1700 = vmatpush.bf16.msrb.mxu2 %v2478_v1 }
 0x6b6   : > { %1701 = vmatpush.bf16.msrb.mxu2 %v2462_v18  ;;  %v2774_v18 = vld [vmem:[#allocation7 + $0x28] sm:$0xff] }
 0x6ba   : > { %1702 = vmatpush.bf16.msrb.mxu2 %v2446_v34  ;;  %v2785_v34 = vld [vmem:[#allocation7 + $0x80] sm:$0xff] }
 0x718   : > { %v1441_v54 = vpop.xlane.xlu1 %1440 }
 0x719   : > { %v1444_v55 = vmul.f32 %v1441_v54, %v3238_v10  ;;  %v2501_v54 = vld [vmem:[#allocation5 + $0x68] sm:$0xf] }
 0x71b   : > { %v3512_v56 = vsub.f32 %v3503_v50, %v1444_v55  ;;  %v2752_v55 = vld [vmem:[#allocation5 + $0x74] sm:$0xf0] }
 0x71d   : > { %v1448_v0 = vmul.f32 %v3512_v56, %v3512_v56 }
 0x71f   : > { %1450 = vadd.xlane.f32.xlu0 %v1448_v0  ;;  %v2498_v0 = vor.u32 %v2749_v49, %v2495_v52 }
 0x720   : > { %v1443_v57 = vpop.xlane.xlu2 %1442 }
 0x721   : > { %v1445_v58 = vmul.f32 %v1443_v57, %v3238_v10  ;;  %v2502_v57 = vor.u32 %v2752_v55, %v2501_v54  ;;  %1713 = vmatpush.bf16.msra.mxu3 %v2498_v0  ;;  %v2872_v0 = vld [vmem:[%s3596_s9] ss:$0 sm:$0xff] }
 0x723   : > { %v3518_v59 = vsub.f32 %v3507_v53, %v1445_v58  ;;  %v2750_v58 = vld [vmem:[#allocation5 + $0x6c] sm:$0xf]  ;;  %1727 = vmatpush.bf16.msrb.mxu0 %v2502_v57 }
 0x725   : > { %v1449_v2 = vmul.f32 %v3518_v59, %v3518_v59  ;;  %1714 = vmatpush.bf16.msra.mxu3 %v2482_v6  ;;  %v2799_v6 = vld [vmem:[#allocation7 + $0xf0] sm:$0xff] }
 0x727   : > { %1452 = vadd.xlane.f32.xlu1 %v1449_v2  ;;  %v2503_v2 = vld [vmem:[#allocation5 + $0x78] sm:$0xf0]  ;;  %1728 = vmatpush.bf16.msrb.mxu0 %v2486_v7 }
 0x728   : > { %v2506_v60 = vor.u32 %v2750_v58, %v2503_v2  ;;  %v2784_v7 = vld [vmem:[#allocation7 + $0x78] sm:$0xff] }
 0x729   : > { %1715 = vmatpush.bf16.msra.mxu3 %v2466_v26  ;;  %v2781_v26 = vld [vmem:[#allocation7 + $0x60] sm:$0xff] }
 0x72a   : > { %1741 = vmatpush.bf16.msra.mxu1 %v2506_v60 }
 0x72b   : > { %1729 = vmatpush.bf16.msrb.mxu0 %v2470_v27  ;;  %v2787_v27 = vld [vmem:[#allocation7 + $0x90] sm:$0xff] }
 0x72d   : > { %1716 = vmatpush.bf16.msra.mxu3 %v2450_v16  ;;  %v2793_v16 = vld [vmem:[#allocation7 + $0xc0] sm:$0xff] }
 0x72e   : > { %1742 = vmatpush.bf16.msra.mxu1 %v2490_v11  ;;  %v2775_v11 = vld [vmem:[#allocation7 + $0x30] sm:$0xff] }
 0x72f   : > { %1730 = vmatpush.bf16.msrb.mxu0 %v2454_v38 }
 0x731   : > { %2101 = vmatpush.bf16.msrb.mxu3 %v2784_v7 }
 0x732   : > { %1743 = vmatpush.bf16.msra.mxu1 %v2474_v14  ;;  %v2794_v14 = vld [vmem:[#allocation7 + $0xc8] sm:$0xff] }
 0x735   : > { %2102 = vmatpush.bf16.msrb.mxu3 %v2783_v12 }
 0x736   : > { %1744 = vmatpush.bf16.msra.mxu1 %v2458_v40 }
 0x739   : > { %2103 = vmatpush.bf16.msrb.mxu3 %v2782_v19 }
 0x73a   : > { %2129 = vmatpush.bf16.msrb.mxu1 %v2800_v4 }
 0x73d   : > { %2104 = vmatpush.bf16.msrb.mxu3 %v2781_v26 }
 0x73e   : > { %2130 = vmatpush.bf16.msrb.mxu1 %v2799_v6 }
 0x741   : > { %2105 = vmatpush.bf16.msrb.mxu3 %v2780_v30 }
 0x742   : > { %2131 = vmatpush.bf16.msrb.mxu1 %v2798_v9 }
 0x745   : > { %2106 = vmatpush.bf16.msrb.mxu3 %v2779_v33 }
 0x746   : > { %2132 = vmatpush.bf16.msrb.mxu1 %v2797_v17 }
 0x74a   : > { %2133 = vmatpush.bf16.msrb.mxu1 %v2796_v21 }
 0x74e   : > { %2134 = vmatpush.bf16.msrb.mxu1 %v2795_v28 }
 0x752   : > { %2135 = vmatpush.bf16.msrb.mxu1 %v2794_v14 }
 0x756   : > { %2136 = vmatpush.bf16.msrb.mxu1 %v2793_v16 }
 0x792   : > { %v1451_v25 = vpop.xlane.xlu0 %1450 }
 0x793   : > { %v1454_v31 = vmul.f32 %v1451_v25, %v3238_v10  ;;  %v2773_v25 = vld [vmem:[#allocation7 + $0x20] sm:$0xff] }
 0x795   : > { %v1456_v37 = vadd.f32 1e-05, %v1454_v31  ;;  %v2786_v31 = vld [vmem:[#allocation7 + $0x88] sm:$0xff] }
 0x797   : > { %2917 = vrsqrt.f32 %v1456_v37  ;;  %vm1464_vm6 = vweird.f32 %v1456_v37 }
 0x79a   : > { %v1453_v23 = vpop.xlane.xlu1 %1452 }
 0x79b   : > { %v1455_v41 = vmul.f32 %v1453_v23, %v3238_v10 }
 0x79d   : > { %v2918_v24 = vpop.eup %2917  ;;  %v1457_v42 = vadd.f32 1e-05, %v1455_v41  ;;  %v1527_v41 = vperm.slane %v3535_v32, 0 }
 0x79e   : > { %v1459_v43 = vmul.f32 %v2918_v24, %v1456_v37  ;;  %vm1465_vm5 = vweird.f32 %v2918_v24  ;;  %v2778_v37 = vld [vmem:[#allocation7 + $0x48] sm:$0xff] }
 0x79f   : > { %2919 = vrsqrt.f32 %v1457_v42  ;;  %vm1466_vm7 = vmor %vm1464_vm6, %vm1465_vm5  ;;  %vm1474_vm9 = vweird.f32 %v1457_v42  ;;  %2107 = vmatpush.bf16.msrb.mxu3 %v2778_v37 }
 0x7a0   : > { %v1460_v44 = vmul.f32 %v2918_v24, %v1459_v43 }
 0x7a2   : > { %v1461_v45 = vmul.f32 0.5, %v1460_v44  ;;  %v2769_v44 = vld [vmem:[#allocation7] sm:$0xff] }
 0x7a4   : > { %v1462_v46 = vsub.f32 1.5, %v1461_v45  ;;  %v2777_v45 = vld [vmem:[#allocation7 + $0x40] sm:$0xff] }
 0x7a5   : > { %v2920_v47 = vpop.eup %2919  ;;  %2108 = vmatpush.bf16.msrb.mxu3 %v2777_v45 }
 0x7a6   : > { %v1463_v48 = vmul.f32 %v2918_v24, %v1462_v46  ;;  %v1469_v49 = vmul.f32 %v2920_v47, %v1457_v42  ;;  %vm1475_vm8 = vweird.f32 %v2920_v47 }
 0x7a7   : > { %vm1476_vm10 = vmor %vm1474_vm9, %vm1475_vm8 }
 0x7a8   : > { %v1470_v51 = vmul.f32 %v2920_v47, %v1469_v49  ;;  %v1467_v52 = vsel %vm1466_vm7, %v2918_v24, %v1463_v48  ;;  %v1528_v24 = vperm.slane %v3535_v32, 1 }
 0x7a9   : > { %v1478_v10 = vmul.f32 %v1467_v52, %v3512_v56  ;;  %v2792_v56 = vld [vmem:[#allocation7 + $0xb8] sm:$0xff] }
 0x7aa   : > { %v1471_v54 = vmul.f32 0.5, %v1470_v51  ;;  %2115 = vmatpush.bf16.msra.mxu0 %v2792_v56 }
 0x7ab   : > { %v1484_v60 = vmul.f32 %v2872_v0, %v1478_v10 }
 0x7ac   : > { %v1472_v55 = vsub.f32 1.5, %v1471_v54 }
 0x7ad   : > { %v1490_v63 = vadd.f32 %v2873_v61, %v1484_v60 }
 0x7ae   : > { %v1473_v57 = vmul.f32 %v2920_v47, %v1472_v55  ;;  %2116 = vmatpush.bf16.msra.mxu0 %v2791_v5 }
 0x7b0   : > { %v1477_v58 = vsel %vm1476_vm10, %v2920_v47, %v1473_v57 }
 0x7b1   : > { %v1479_v2 = vmul.f32 %v1477_v58, %v3518_v59  ;;  %v2776_v59 = vld [vmem:[#allocation7 + $0x38] sm:$0xff] }
 0x7b2   : > { %2087 = vmatpush.bf16.msra.mxu2 %v2776_v59  ;;  %2117 = vmatpush.bf16.msra.mxu0 %v2790_v8 }
 0x7b3   : > { %v1485_v62 = vmul.f32 %v2872_v0, %v1479_v2 }
 0x7b5   : > { %v1491_v1 = vadd.f32 %v2873_v61, %v1485_v62 }
 0x7b6   : > { %2088 = vmatpush.bf16.msra.mxu2 %v2775_v11  ;;  %2118 = vmatpush.bf16.msra.mxu0 %v2789_v13 }
 0x7b7   : > { %v1492_v3 = vpack.c.bf16 %v1491_v1, %v1490_v63 }
 0x7b9   : > { %1703 = vmatmul.bf16.vlgmr.msrb.gmra.mxu2 %v1492_v3  ;;  %1717 = vmatmul.bf16.vlgmr.msra.gmra.mxu3 %v1492_v3 }
 0x7ba   : > { %1731 = vmatmul.bf16.vlgmr.msrb.gmra.mxu0 %v1492_v3  ;;  %1745 = vmatmul.bf16.vlgmr.msra.gmra.mxu1 %v1492_v3 }
 0x7bb   : > { %2089 = vmatpush.bf16.msra.mxu2 %v2774_v18  ;;  %2119 = vmatpush.bf16.msra.mxu0 %v2788_v20 }
 0x7bf   : > { %2090 = vmatpush.bf16.msra.mxu2 %v2773_v25  ;;  %2120 = vmatpush.bf16.msra.mxu0 %v2787_v27 }
 0x7c3   : > { %2091 = vmatpush.bf16.msra.mxu2 %v2772_v29  ;;  %2121 = vmatpush.bf16.msra.mxu0 %v2786_v31 }
 0x7c7   : > { %2092 = vmatpush.bf16.msra.mxu2 %v2771_v15  ;;  %2122 = vmatpush.bf16.msra.mxu0 %v2785_v34 }
 0x7cb   : > { %2093 = vmatpush.bf16.msra.mxu2 %v2770_v36 }
 0x7cf   : > { %2094 = vmatpush.bf16.msra.mxu2 %v2769_v44 }
 0x837   : > { %v1732_v38 = vpop.f32.mrf.mxu0  ;;  %v1746_v39 = vpop.f32.mrf.mxu1 }
 0x838   : > { %v3539_v40 = vadd.f32 %v1732_v38, %v1529_v22  ;;  %v3541_v23 = vadd.f32 %v1746_v39, %v1530_v35 }
 0x83a   : > { %v1761_v42 = vmul.f32 0.044715, %v3539_v40  ;;  %v1762_v43 = vmul.f32 0.044715, %v3541_v23 }
 0x83c   : > { %v1769_v46 = vmul.f32 %v1761_v42, %v3539_v40  ;;  %v1770_v47 = vmul.f32 %v1762_v43, %v3541_v23  ;;  %v1704_v48 = vpop.f32.mrf.mxu2  ;;  %v1718_v49 = vpop.f32.mrf.mxu3  ;;  %v1753_v43 = vmul.f32 0.5, %v3539_v40 }
 0x83d   : > { %v3549_v51 = vadd.f32 %v1704_v48, %v1527_v41  ;;  %v3551_v52 = vadd.f32 %v1718_v49, %v1528_v24 }
 0x83e   : > { %v1777_v54 = vmul.f32 %v1769_v46, %v3539_v40  ;;  %v1778_v55 = vmul.f32 %v1770_v47, %v3541_v23  ;;  %v1754_v47 = vmul.f32 0.5, %v3541_v23 }
 0x83f   : > { %v1759_v10 = vmul.f32 0.044715, %v3549_v51  ;;  %v1760_v0 = vmul.f32 0.044715, %v3551_v52  ;;  %v1734_v57 = vpop.f32.mrf.mxu0  ;;  %v1748_v58 = vpop.f32.mrf.mxu1 }
 0x840   : > { %v1785_v2 = vadd.f32 %v1777_v54, %v3539_v40  ;;  %v1735_v60 = vadd.f32 %v1734_v57, %v1529_v22  ;;  %v1749_v61 = vadd.f32 %v1748_v58, %v1530_v35  ;;  %v1786_v62 = vadd.f32 %v1778_v55, %v3541_v23 }
 0x841   : > { %v1767_v63 = vmul.f32 %v1759_v10, %v3549_v51  ;;  %v1768_v1 = vmul.f32 %v1760_v0, %v3551_v52 }
 0x842   : > { %v1765_v3 = vmul.f32 0.044715, %v1735_v60  ;;  %v1766_v5 = vmul.f32 0.044715, %v1749_v61  ;;  %v1793_v6 = vmul.f32 0.7978846, %v1785_v2 }
 0x843   : > { %v1775_v56 = vmul.f32 %v1767_v63, %v3549_v51  ;;  %v1776_v4 = vmul.f32 %v1768_v1, %v3551_v52  ;;  %v1794_v9 = vmul.f32 0.7978846, %v1786_v62  ;;  %v1757_v44 = vmul.f32 0.5, %v1735_v60 }
 0x844   : > { %v1773_v59 = vmul.f32 %v1765_v3, %v1735_v60  ;;  %v1706_v7 = vpop.f32.mrf.mxu2  ;;  %v1720_v8 = vpop.f32.mrf.mxu3  ;;  %v1774_v12 = vmul.f32 %v1766_v5, %v1749_v61  ;;  %2921 = vtanh.f32 %v1793_v6  ;;  %v1758_v48 = vmul.f32 0.5, %v1749_v61 }
 0x845   : > { %v1783_v11 = vadd.f32 %v1775_v56, %v3549_v51  ;;  %v1707_v13 = vadd.f32 %v1706_v7, %v1527_v41  ;;  %v1784_v17 = vadd.f32 %v1776_v4, %v3551_v52  ;;  %v1721_v19 = vadd.f32 %v1720_v8, %v1528_v24 }
 0x846   : > { %v1781_v18 = vmul.f32 %v1773_v59, %v1735_v60  ;;  %v1782_v21 = vmul.f32 %v1774_v12, %v1749_v61  ;;  %2923 = vtanh.f32 %v1794_v9  ;;  %v1751_v3 = vmul.f32 0.5, %v3549_v51  ;;  %v2874_v51 = vld [vmem:[%s3616_s17] ss:$0 sm:$0xff] }
 0x847   : > { %v1791_v20 = vmul.f32 0.7978846, %v1783_v11  ;;  %v1763_v25 = vmul.f32 0.044715, %v1707_v13  ;;  %v1764_v27 = vmul.f32 0.044715, %v1721_v19 }
 0x848   : > { %v1789_v26 = vadd.f32 %v1781_v18, %v1735_v60  ;;  %v1790_v28 = vadd.f32 %v1782_v21, %v1749_v61  ;;  %v1792_v30 = vmul.f32 0.7978846, %v1784_v17  ;;  %v1755_v40 = vmul.f32 0.5, %v1707_v13 }
 0x849   : > { %v1771_v29 = vmul.f32 %v1763_v25, %v1707_v13  ;;  %v1772_v14 = vmul.f32 %v1764_v27, %v1721_v19  ;;  %2925 = vtanh.f32 %v1791_v20  ;;  %v1752_v56 = vmul.f32 0.5, %v3551_v52 }
 0x84a   : > { %v1797_v31 = vmul.f32 0.7978846, %v1789_v26  ;;  %v1798_v32 = vmul.f32 0.7978846, %v1790_v28  ;;  %v2922_v16 = vpop.eup %2921  ;;  %v1756_v23 = vmul.f32 0.5, %v1721_v19 }
 0x84b   : > { %v1779_v15 = vmul.f32 %v1771_v29, %v1707_v13  ;;  %v1780_v33 = vmul.f32 %v1772_v14, %v1721_v19  ;;  %v1809_v39 = vadd.f32 1.0, %v2922_v16 }
 0x84c   : > { %2927 = vtanh.f32 %v1797_v31  ;;  %v2924_v35 = vpop.eup %2923 }
 0x84d   : > { %v1787_v34 = vadd.f32 %v1779_v15, %v1707_v13  ;;  %2929 = vtanh.f32 %v1798_v32  ;;  %v1788_v22 = vadd.f32 %v1780_v33, %v1721_v19  ;;  %v1810_v24 = vadd.f32 1.0, %v2924_v35 }
 0x84e   : > { %2931 = vtanh.f32 %v1792_v30  ;;  %v1817_v54 = vmul.f32 %v1809_v39, %v1753_v43 }
 0x84f   : > { %v1795_v36 = vmul.f32 0.7978846, %v1787_v34  ;;  %v1796_v37 = vmul.f32 0.7978846, %v1788_v22  ;;  %v2926_v38 = vpop.eup %2925  ;;  %v1818_v10 = vmul.f32 %v1810_v24, %v1754_v47 }
 0x850   : > { %v1807_v57 = vadd.f32 1.0, %v2926_v38 }
 0x851   : > { %2933 = vtanh.f32 %v1795_v36 }
 0x852   : > { %v2928_v41 = vpop.eup %2927  ;;  %2935 = vtanh.f32 %v1796_v37  ;;  %v1815_v4 = vmul.f32 %v1807_v57, %v1751_v3 }
 0x853   : > { %v2930_v42 = vpop.eup %2929  ;;  %v1813_v45 = vadd.f32 1.0, %v2928_v41 }
 0x854   : > { %v2932_v46 = vpop.eup %2931  ;;  %v1814_v49 = vadd.f32 1.0, %v2930_v42 }
 0x855   : > { %v1821_v55 = vmul.f32 %v1813_v45, %v1757_v44  ;;  %v1808_v62 = vadd.f32 1.0, %v2932_v46 }
 0x856   : > { %v1822_v0 = vmul.f32 %v1814_v49, %v1758_v48 }
 0x857   : > { %v2934_v58 = vpop.eup %2933  ;;  %v1825_v2 = vpack.c.bf16 %v1821_v55, %v1817_v54  ;;  %v1816_v6 = vmul.f32 %v1808_v62, %v1752_v56 }
 0x858   : > { %v2936_v63 = vpop.eup %2935  ;;  %v1826_v1 = vpack.c.bf16 %v1822_v0, %v1818_v10  ;;  %v1811_v60 = vadd.f32 1.0, %v2934_v58 }
 0x859   : > { %2123 = vmatmul.bf16.vlgmr.msra.gmra.mxu0 %v1825_v2  ;;  %v1812_v61 = vadd.f32 1.0, %v2936_v63 }
 0x85a   : > { %2137 = vmatmul.bf16.vlgmr.msrb.gmra.mxu1 %v1826_v1  ;;  %v1819_v5 = vmul.f32 %v1811_v60, %v1755_v40 }
 0x85b   : > { %v1820_v59 = vmul.f32 %v1812_v61, %v1756_v23 }
 0x85c   : > { %v1823_v7 = vpack.c.bf16 %v1819_v5, %v1815_v4 }
 0x85d   : > { %v1824_v8 = vpack.c.bf16 %v1820_v59, %v1816_v6 }
 0x85e   : > { %2095 = vmatmul.bf16.vlgmr.msra.gmra.mxu2 %v1823_v7 }
 0x85f   : > { %2109 = vmatmul.bf16.vlgmr.msrb.gmra.mxu3 %v1824_v8 }
 0x8d6   : > { %v2124_v52 = vpop.f32.mrf.mxu0 }
 0x8d7   : > { %v2138_v17 = vpop.f32.mrf.mxu1 }
 0x8de   : > { %v2126_v28 = vpop.f32.mrf.mxu0 }
 0x8df   : > { %v2140_v30 = vpop.f32.mrf.mxu1 }
 0x8e1   : > { %v2096_v9 = vpop.f32.mrf.mxu2 }
 0x8e2   : > { %v2097_v11 = vadd.f32 %v2874_v51, %v2096_v9  ;;  %v2110_v12 = vpop.f32.mrf.mxu3 }
 0x8e4   : > { %v2111_v13 = vadd.f32 %v2110_v12, %v2097_v11 }
 0x8e6   : > { %v2125_v18 = vadd.f32 %v2124_v52, %v2111_v13 }
 0x8e8   : > { %v2139_v19 = vadd.f32 %v2138_v17, %v2125_v18 }
 0x8e9   : > { %v2098_v20 = vpop.f32.mrf.mxu2 }
 0x8ea   : > { %v2143_v21 = vadd.f32 %v2139_v19, %v3503_v50  ;;  %v2099_v25 = vadd.f32 %v2874_v51, %v2098_v20  ;;  %v2112_v26 = vpop.f32.mrf.mxu3 }
 0x8ec   : > { %2145 = vst [vmem:[%s616_s25] sm:$0xff] %v2143_v21  ;;  %v2113_v27 = vadd.f32 %v2112_v26, %v2099_v25 }
 0x8ee   : > { %v2127_v29 = vadd.f32 %v2126_v28, %v2113_v27 }
 0x8f0   : > { %v2141_v31 = vadd.f32 %v2140_v30, %v2127_v29 }
 0x8f2   : > { %v2144_v14 = vadd.f32 %v2141_v31, %v3507_v53 }
 0x8f4   : > { %2146 = vst [vmem:[%s616_s25 + $0x8] sm:$0xff] %v2144_v14 }
 0x8f5 PF: > { %s3618_s24 = sld [smem:[#allocation11_spill]]  ;;  %s3620_s19 = smov %s3622_s30 }
 0x8f6   : > { %s3619_s18 = sld [smem:[#allocation10_spill]] }
 0x8fb   : > { %s27_s20 = sadd.s32 1, %s3618_s24  }
 0x8fc   : > { %p24_p8 = scmp.ge.s32.totalorder %s27_s20, 4  }
 0x8fe   :  { %26 = sbr.rel (!%p24_p8) target bundleno = 8 (0x8), region = 129 }
 0x903   :  { %2177 = vsyncpa [#allocation4], 1 }
 0x904   :  { %2179 = vsyncpa [#allocation4 + $0x1], 1 }
 0x905   :  { %2180 = vsyncpa [#allocation6], 1 }

// kernel: _lambda_.9
= control target key start
LH: loop header
LB: loop body
LE: loop exit
PB: predicated region body
PF: predicated region fallthrough
CT: control target
= control target key end

     0   :  { %s420_s1 = inlined_call_operand.vmem [shape: bf16[128,256], index: 1, kind: input, shape index: {}]   ;;  %s421_s0 = inlined_call_operand.vmem [shape: bf16[32,128], index: 0, kind: input, shape index: {}]   ;;  %s422_s2 = inlined_call_operand.vmem [shape: f32[32,256], index: 2, kind: output, shape index: {}]  }
   0x1   :  { %v239_v0 = vld [vmem:[%s420_s1 + $0x70] sm:$0xf]  ;;  %v262_v1 = vld [vmem:[%s420_s1 + $0x74] sm:$0xf0]  ;;  %v261_v2 = vld [vmem:[%s420_s1 + $0x74] sm:$0xf] }
   0x2   :  { %v240_v3 = vor.u32 %v262_v1, %v239_v0  ;;  %v241_v4 = vld [vmem:[%s420_s1 + $0x78] sm:$0xf0]  ;;  %v231_v5 = vld [vmem:[%s420_s1 + $0x60] sm:$0xf]  ;;  %v260_v6 = vld [vmem:[%s420_s1 + $0x64] sm:$0xf0] }
   0x3   :  { %v244_v7 = vor.u32 %v261_v2, %v241_v4  ;;  %v259_v8 = vld [vmem:[%s420_s1 + $0x64] sm:$0xf]  ;;  %v233_v9 = vld [vmem:[%s420_s1 + $0x68] sm:$0xf0]  ;;  %v232_v10 = vor.u32 %v260_v6, %v231_v5  ;;  %v223_v12 = vld [vmem:[%s420_s1 + $0x50] sm:$0xf] }
   0x4   :  { %123 = vmatpush.bf16.msra.mxu0 %v240_v3  ;;  %263 = vmatpush.bf16.msra.mxu2 %v240_v3  ;;  %v236_v11 = vor.u32 %v259_v8, %v233_v9  ;;  %v258_v13 = vld [vmem:[%s420_s1 + $0x54] sm:$0xf0]  ;;  %v257_v14 = vld [vmem:[%s420_s1 + $0x54] sm:$0xf]  ;;  %v225_v15 = vld [vmem:[%s420_s1 + $0x58] sm:$0xf0] }
   0x5   :  { %142 = vmatpush.bf16.msra.mxu1 %v244_v7  ;;  %271 = vmatpush.bf16.msra.mxu3 %v244_v7  ;;  %v224_v16 = vor.u32 %v258_v13, %v223_v12  ;;  %v228_v17 = vor.u32 %v257_v14, %v225_v15  ;;  %v215_v18 = vld [vmem:[%s420_s1 + $0x40] sm:$0xf]  ;;  %v256_v19 = vld [vmem:[%s420_s1 + $0x44] sm:$0xf0]  ;;  %v255_v20 = vld [vmem:[%s420_s1 + $0x44] sm:$0xf] }
   0x6   :  { %v217_v21 = vld [vmem:[%s420_s1 + $0x48] sm:$0xf0]  ;;  %v216_v22 = vor.u32 %v256_v19, %v215_v18  ;;  %v207_v24 = vld [vmem:[%s420_s1 + $0x30] sm:$0xf]  ;;  %v254_v25 = vld [vmem:[%s420_s1 + $0x34] sm:$0xf0] }
   0x7   :  { %v220_v23 = vor.u32 %v255_v20, %v217_v21  ;;  %v253_v26 = vld [vmem:[%s420_s1 + $0x34] sm:$0xf]  ;;  %v209_v27 = vld [vmem:[%s420_s1 + $0x38] sm:$0xf0]  ;;  %v208_v28 = vor.u32 %v254_v25, %v207_v24  ;;  %v199_v30 = vld [vmem:[%s420_s1 + $0x20] sm:$0xf] }
   0x8   :  { %124 = vmatpush.bf16.msra.mxu0 %v232_v10  ;;  %264 = vmatpush.bf16.msra.mxu2 %v232_v10  ;;  %v212_v29 = vor.u32 %v253_v26, %v209_v27  ;;  %v252_v31 = vld [vmem:[%s420_s1 + $0x24] sm:$0xf0]  ;;  %v251_v32 = vld [vmem:[%s420_s1 + $0x24] sm:$0xf]  ;;  %v201_v33 = vld [vmem:[%s420_s1 + $0x28] sm:$0xf0] }
   0x9   :  { %143 = vmatpush.bf16.msra.mxu1 %v236_v11  ;;  %272 = vmatpush.bf16.msra.mxu3 %v236_v11  ;;  %v200_v34 = vor.u32 %v252_v31, %v199_v30  ;;  %v204_v35 = vor.u32 %v251_v32, %v201_v33  ;;  %v191_v36 = vld [vmem:[%s420_s1 + $0x10] sm:$0xf]  ;;  %v250_v37 = vld [vmem:[%s420_s1 + $0x14] sm:$0xf0]  ;;  %v249_v38 = vld [vmem:[%s420_s1 + $0x14] sm:$0xf] }
   0xa   :  { %v193_v39 = vld [vmem:[%s420_s1 + $0x18] sm:$0xf0]  ;;  %v192_v40 = vor.u32 %v250_v37, %v191_v36  ;;  %v183_v42 = vld [vmem:[%s420_s1] sm:$0xf]  ;;  %v248_v43 = vld [vmem:[%s420_s1 + $0x4] sm:$0xf0] }
   0xb   :  { %v196_v41 = vor.u32 %v249_v38, %v193_v39  ;;  %v247_v44 = vld [vmem:[%s420_s1 + $0x4] sm:$0xf]  ;;  %v185_v45 = vld [vmem:[%s420_s1 + $0x8] sm:$0xf0]  ;;  %v184_v46 = vor.u32 %v248_v43, %v183_v42 }
   0xc   :  { %125 = vmatpush.bf16.msra.mxu0 %v224_v16  ;;  %265 = vmatpush.bf16.msra.mxu2 %v224_v16  ;;  %v188_v47 = vor.u32 %v247_v44, %v185_v45  ;;  %v245_v48 = vld [vmem:[%s421_s0] sm:$0xff]  ;;  %v246_v49 = vld [vmem:[%s421_s0 + $0x8] sm:$0xff] }
   0xd   :  { %144 = vmatpush.bf16.msra.mxu1 %v228_v17  ;;  %273 = vmatpush.bf16.msra.mxu3 %v228_v17 }
  0x10   :  { %126 = vmatpush.bf16.msra.mxu0 %v216_v22  ;;  %266 = vmatpush.bf16.msra.mxu2 %v216_v22 }
  0x11   :  { %145 = vmatpush.bf16.msra.mxu1 %v220_v23  ;;  %274 = vmatpush.bf16.msra.mxu3 %v220_v23 }
  0x14   :  { %127 = vmatpush.bf16.msra.mxu0 %v208_v28  ;;  %267 = vmatpush.bf16.msra.mxu2 %v208_v28 }
  0x15   :  { %146 = vmatpush.bf16.msra.mxu1 %v212_v29  ;;  %275 = vmatpush.bf16.msra.mxu3 %v212_v29 }
  0x18   :  { %128 = vmatpush.bf16.msra.mxu0 %v200_v34  ;;  %268 = vmatpush.bf16.msra.mxu2 %v200_v34 }
  0x19   :  { %147 = vmatpush.bf16.msra.mxu1 %v204_v35  ;;  %276 = vmatpush.bf16.msra.mxu3 %v204_v35 }
  0x1c   :  { %129 = vmatpush.bf16.msra.mxu0 %v192_v40  ;;  %269 = vmatpush.bf16.msra.mxu2 %v192_v40 }
  0x1d   :  { %148 = vmatpush.bf16.msra.mxu1 %v196_v41  ;;  %277 = vmatpush.bf16.msra.mxu3 %v196_v41 }
  0x20   :  { %130 = vmatpush.bf16.msra.mxu0 %v184_v46  ;;  %270 = vmatpush.bf16.msra.mxu2 %v184_v46 }
  0x21   :  { %149 = vmatpush.bf16.msra.mxu1 %v188_v47  ;;  %278 = vmatpush.bf16.msra.mxu3 %v188_v47 }
  0x23   :  { %131 = vmatmul.bf16.vlgmr.msra.gmra.mxu0 %v245_v48  ;;  %136 = vmatmul.bf16.vlgmr.msra.gmra.mxu2 %v246_v49 }
  0x24   :  { %150 = vmatmul.bf16.vlgmr.msra.gmra.mxu1 %v245_v48  ;;  %155 = vmatmul.bf16.vlgmr.msra.gmra.mxu3 %v246_v49 }
  0xa0   :  { %v132_v50 = vpop.f32.mrf.mxu0 }
  0xa1   :  { %161 = vst [vmem:[%s422_s2] sm:$0xff] %v132_v50  ;;  %v151_v51 = vpop.f32.mrf.mxu1 }
  0xa2   :  { %162 = vst [vmem:[%s422_s2 + $0x8] sm:$0xff] %v151_v51 }
  0xa6   :  { %v137_v52 = vpop.f32.mrf.mxu2 }
  0xa7   :  { %165 = vst [vmem:[%s422_s2 + $0x20] sm:$0xff] %v137_v52  ;;  %v156_v53 = vpop.f32.mrf.mxu3 }
  0xa8   :  { %166 = vst [vmem:[%s422_s2 + $0x28] sm:$0xff] %v156_v53  ;;  %v134_v54 = vpop.f32.mrf.mxu0 }
  0xa9   :  { %163 = vst [vmem:[%s422_s2 + $0x10] sm:$0xff] %v134_v54  ;;  %v153_v55 = vpop.f32.mrf.mxu1 }
  0xaa   :  { %164 = vst [vmem:[%s422_s2 + $0x18] sm:$0xff] %v153_v55 }
  0xae   :  { %v139_v56 = vpop.f32.mrf.mxu2 }
  0xaf   :  { %167 = vst [vmem:[%s422_s2 + $0x30] sm:$0xff] %v139_v56  ;;  %v158_v57 = vpop.f32.mrf.mxu3 }
  0xb0   :  { %168 = vst [vmem:[%s422_s2 + $0x38] sm:$0xff] %v158_v57 }

// kernel: _lambda_.6
= control target key start
LH: loop header
LB: loop body
LE: loop exit
PB: predicated region body
PF: predicated region fallthrough
CT: control target
= control target key end

     0   :  { %s3530_s0 = inlined_call_operand.vmem [shape: f32[2,16,128], index: 0, kind: input, shape index: {}, may-alias: {0,1}]   ;;  %s3531_s1 = inlined_call_operand.vmem [shape: f32[2,16,128], index: 1, kind: input, shape index: {}, may-alias: {0,1}]   ;;  %s3532_s2 = inlined_call_operand.vmem [shape: f32[2,1,16], index: 2, kind: input, shape index: {}]   ;;  %s3533_s3 = inlined_call_operand.vmem [shape: f32[1,128], index: 3, kind: input, shape index: {}, may-alias: {3,9}]   ;;  %s3534_s4 = inlined_call_operand.vmem [shape: f32[1,128], index: 4, kind: input, shape index: {}, may-alias: {4,8,10,14}]   ;;  %s3535_s5 = inlined_call_operand.hbm [shape: bf16[128,384], index: 5, kind: input, shape index: {}]   ;;  %s3536_s6 = inlined_call_operand.vmem [shape: f32[1,384], index: 6, kind: input, shape index: {}]   ;;  %s3537_s7 = inlined_call_operand.hbm [shape: bf16[128,128], index: 7, kind: input, shape index: {}]   ;;  %s3538_s8 = inlined_call_operand.vmem [shape: f32[1,128], index: 8, kind: input, shape index: {}, may-alias: {4,8,10,14}]   ;;  %s3539_s9 = inlined_call_operand.vmem [shape: f32[1,128], index: 9, kind: input, shape index: {}, may-alias: {3,9}]   ;;  %s3540_s10 = inlined_call_operand.vmem [shape: f32[1,128], index: 10, kind: input, shape index: {}, may-alias: {4,8,10,14}]   ;;  %s3541_s11 = inlined_call_operand.hbm [shape: bf16[128,512], index: 11, kind: input, shape index: {}]   ;;  %s3542_s12 = inlined_call_operand.vmem [shape: f32[1,512], index: 12, kind: input, shape index: {}]   ;;  %s3543_s13 = inlined_call_operand.hbm [shape: bf16[512,128], index: 13, kind: input, shape index: {}]   ;;  %s3544_s14 = inlined_call_operand.vmem [shape: f32[1,128], index: 14, kind: input, shape index: {}, may-alias: {4,8,10,14}]   ;;  %s3545_s15 = inlined_call_operand.vmem [shape: f32[2,16,128], index: 15, kind: output, shape index: {}]  }
   0x1   :  { %3548 = sst [smem:[#allocation16_spill]] %s3535_s5 }
   0x2   :  { %3549 = sst [smem:[#allocation17_spill]] %s3537_s7 }
   0x3   :  { %3550 = sst [smem:[#allocation18_spill]] %s3542_s12 }
   0x4   :  { %3551 = sst [smem:[#allocation19_spill]] %s3544_s14 }
   0x5   :  { %3552 = sst [smem:[#allocation20_spill]] %s3545_s15 }
   0x6   :  { %20 = vsyncpa [#allocation4], 0 }
   0x7   :  { %21 = vsyncpa [#allocation6], 0 }
   0x8   :  { %22 = vsyncpa [#allocation9], 0  ;;  %s3229_s18 = smov 0   ;;  %s3231_s19 = smov 0  }
   0x9   :  { %s3233_s20 = smov 0  }
   0xa LB: > { %3553 = sst [smem:[#allocation13_spill]] %s3128_s19  ;;  %s2313_s24 = sadd.s32 4294967295, %s3132_s20   ;;  %s3132_s20 = sphi %s3233_s20, %s28_s20   ;;  %s3128_s19 = sphi %s3231_s19, %s3566_s19   ;;  %s3124_s18 = sphi %s3229_s18, %s3565_s18  }
   0xb   : > { %3554 = sst [smem:[#allocation14_spill]] %s3132_s20  ;;  %p2315_p0 = scmp.ge.s32.totalorder %s3132_s20, 1 }
   0xc   : > { %s3555_s7 = sld [smem:[#allocation17_spill]]  ;;  %p405_p1 = scmp.lt.s32.totalorder %s3132_s20, 3 }
   0xd   : > { %p3250_p2 = scmp.eq.s32.totalorder %s2313_s24, 0  ;;  %s3134_s27 = smov [#allocation5]  }
   0xe   : > { %p3254_p3 = pnand %p2315_p0, %p405_p1  ;;  %s441_s28 = sshll.u32 %s3134_s27, 4  ;;  %s442_s28 = int_to_ptr.vmem [resolvable:$true] %s441_s28 }
   0xf   : > { %s40_s30 = sadd.s32 1, %s3128_s19  ;;  %s3135_s16 = smov 64  }
  0x10   : > { %p2846_p4 = pneg %p3254_p3  ;;  %p42_p6 = scmp.ge.s32.totalorder %s40_s30, 2 }
  0x11   : > { %s3136_s17 = smov 4   ;;  %s3560_s5 = sld [smem:[#allocation16_spill]] }
  0x12   : > { %s439_s23 = sshll.u32 %s3555_s7, 4  ;;  %p3262_p5 = pnand %p3250_p2, %p2846_p4  ;;  %s440_s23 = int_to_ptr.hbm [resolvable:$true] %s439_s23 }
  0x13   : > { %s3568_s30 = smov (%p42_p6, %s40_s30), 0  ;;  %s3137_s27 = smov [#allocation3]  }
  0x14   : > { %2852 = dma.hbm_to_vmem [thread:$0]  (!%p3262_p5), %s440_s23, 1024, %s442_s28, [#allocation6], %s3135_s16, %s3135_s16, %s3136_s17  }
  0x15   : > { %3559 = sst [smem:[#allocation15_spill]] %s3568_s30  ;;  %s424_s7 = sshll.u32 %s3137_s27, 4  ;;  %s425_s7 = int_to_ptr.vmem [resolvable:$true] %s424_s7 }
  0x16   : > { %s462_s19 = sshll.u32 %s3541_s11, 4  ;;  %s3138_s14 = smov 192   ;;  %s463_s19 = int_to_ptr.hbm [resolvable:$true] %s462_s19 }
  0x17   : > { %s422_s24 = sshll.u32 %s3560_s5, 4  ;;  %s3139_s12 = smov 12   ;;  %s423_s24 = int_to_ptr.hbm [resolvable:$true] %s422_s24 }
  0x18   : > { %2849 = dma.hbm_to_vmem [thread:$0]  (!%p3262_p5), %s423_s24, 3072, %s425_s7, [#allocation4], %s3138_s14, %s3138_s14, %s3139_s12  }
  0x19   : > { %s3140_s23 = smov [#allocation7]   ;;  %s3141_s21 = smov 256  }
  0x1a   : > { %s464_s28 = sshll.u32 %s3140_s23, 4  ;;  %s3142_s22 = smov 16   ;;  %s465_s28 = int_to_ptr.vmem [resolvable:$true] %s464_s28 }
  0x1b   : > { %2855 = dma.hbm_to_vmem [thread:$0]  (!%p3262_p5), %s463_s19, 4096, %s465_s28, [#allocation6], %s3141_s21, %s3141_s21, %s3142_s22  }
  0x1c   : > { %s479_s30 = sshll.u32 %s3543_s13, 4  ;;  %s3143_s15 = smov [#allocation8]   ;;  %s480_s30 = int_to_ptr.hbm [resolvable:$true] %s479_s30 }
  0x1d   : > { %s481_s20 = sshll.u32 %s3143_s15, 4  ;;  %527 = sbr.rel (%p3254_p3) target bundleno = 2302 (0x8fe), region = 80  ;;  %s482_s20 = int_to_ptr.vmem [resolvable:$true] %s481_s20 }
  0x1e   : > { %2858 = dma.hbm_to_vmem [thread:$0]  (!%p3262_p5), %s480_s30, 4096, %s482_s20, [#allocation9], %s3135_s16, %s3135_s16, %s3136_s17  }
  0x22   : > { %3111 = dma.done.wait (%p3250_p2), [#allocation4], 3072  }
  0x23   : > { %3113 = vsyncadd (%p3250_p2), [#allocation4], 4294964224 }
  0x24   : > { %3115 = dma.done.wait (%p3250_p2), [#allocation6], 5120  }
  0x25   : > { %3117 = vsyncadd (%p3250_p2), [#allocation6], 4294962176 }
  0x26   : > { %3119 = dma.done.wait (%p3250_p2), [#allocation9], 4096  }
  0x27   : > { %3121 = vsyncadd (%p3250_p2), [#allocation9], 4294963200  ;;  %p607_p7 = scmp.lt.s32.totalorder %s3124_s18, 1  ;;  %v3144_v4 = vmov 128.0   ;;  %v2362_v27 = vld [vmem:[#allocation3 + $0xa8] sm:$0xf] }
  0x28   : > { %2916 = vrcp.f32 %v3144_v4  ;;  %v2740_v28 = vld [vmem:[#allocation3 + $0xb0] sm:$0xf0]  ;;  %v2394_v29 = vld [vmem:[#allocation3 + $0xac] sm:$0xf]  ;;  %v2748_v31 = vld [vmem:[#allocation3 + $0xb4] sm:$0xf0] }
  0x29   : > { %s3570_s18 = smov (!%p607_p7, %s3124_s18), 1  ;;  %v2363_v30 = vor.u32 %v2740_v28, %v2362_v27  ;;  %v2426_v32 = vld [vmem:[#allocation3 + $0xb0] sm:$0xf]  ;;  %v2756_v33 = vld [vmem:[#allocation3 + $0xb8] sm:$0xf0]  ;;  %v2395_v34 = vor.u32 %v2748_v31, %v2394_v29  ;;  %vm1026_vm13 = vcmask 261120  }
  0x2a   : > { %s3305_s5 = sshll.u32 %s3570_s18, 4  ;;  %s624_s25 = scalar_lea.vmem %s3532_s2, %s3570_s18  ;;  %v2427_v35 = vor.u32 %v2756_v33, %v2426_v32  ;;  %v2358_v36 = vld [vmem:[#allocation3 + $0x90] sm:$0xf]  ;;  %v2739_v37 = vld [vmem:[#allocation3 + $0x98] sm:$0xf0] }
  0x2b   : > { %s620_s14 = scalar_lea.vmem %s3531_s1, %s3305_s5  ;;  %s611_s16 = scalar_lea.vmem %s3530_s0, %s3305_s5  ;;  %814 = vmatpush.bf16.msra.mxu0 %v2363_v30  ;;  %898 = vmatpush.bf16.msra.mxu1 %v2395_v34  ;;  %v2390_v38 = vld [vmem:[#allocation3 + $0x94] sm:$0xf]  ;;  %v2359_v39 = vor.u32 %v2739_v37, %v2358_v36  ;;  %v2747_v40 = vld [vmem:[#allocation3 + $0x9c] sm:$0xf0]  ;;  %v2422_v41 = vld [vmem:[#allocation3 + $0x98] sm:$0xf] }
  0x2c   : > { %v3319_v0 = vld [vmem:[%s620_s14] sm:$0xff]  ;;  %v3322_v2 = vld [vmem:[%s620_s14 + $0x8] sm:$0xff]  ;;  %982 = vmatpush.bf16.msra.mxu2 %v2427_v35  ;;  %v2391_v43 = vor.u32 %v2747_v40, %v2390_v38  ;;  %v2746_v49 = vld [vmem:[#allocation3 + $0x84] sm:$0xf0]  ;;  %s3146_s18 = smov 64   ;;  %s3147_s19 = smov 96  }
  0x2d   : > { %701 = vadd.xlane.f32.xlu1 %v3319_v0  ;;  %v636_v1 = vld [vmem:[%s611_s16] sm:$0xff]  ;;  %v637_v3 = vld [vmem:[%s611_s16 + $0x8] sm:$0xff]  ;;  %v2754_v51 = vld [vmem:[#allocation3 + $0x88] sm:$0xf0]  ;;  %s3148_s26 = smov 32   ;;  %s3561_s21 = sld [smem:[#allocation18_spill]] }
  0x2e   : > { %641 = vadd.xlane.f32.xlu0 %v636_v1  ;;  %v2917_v5 = vpop.eup %2916  ;;  %v2755_v42 = vld [vmem:[#allocation3 + $0xa0] sm:$0xf0]  ;;  %v2354_v45 = vld [vmem:[#allocation3 + $0x78] sm:$0xf]  ;;  %v2386_v47 = vld [vmem:[#allocation3 + $0x7c] sm:$0xf] }
  0x2f   : > { %v646_v6 = vmul.f32 128.0, %v2917_v5  ;;  %vm650_vm0 = vweird.f32 %v2917_v5  ;;  %v2423_v44 = vor.u32 %v2755_v42, %v2422_v41  ;;  %815 = vmatpush.bf16.msra.mxu0 %v2359_v39  ;;  %899 = vmatpush.bf16.msra.mxu1 %v2391_v43  ;;  %v2738_v46 = vld [vmem:[#allocation3 + $0x80] sm:$0xf0]  ;;  %v2418_v50 = vld [vmem:[#allocation3 + $0x80] sm:$0xf]  ;;  %v2387_v52 = vor.u32 %v2746_v49, %v2386_v47  ;;  %s3562_s15 = sld [smem:[#allocation19_spill]] }
  0x30   : > { %v2355_v48 = vor.u32 %v2738_v46, %v2354_v45  ;;  %v2419_v53 = vor.u32 %v2754_v51, %v2418_v50  ;;  %v2350_v54 = vld [vmem:[#allocation3 + $0x60] sm:$0xf]  ;;  %v2737_v55 = vld [vmem:[#allocation3 + $0x68] sm:$0xf0]  ;;  %v2382_v56 = vld [vmem:[#allocation3 + $0x64] sm:$0xf] }
  0x31   : > { %v647_v7 = vsub.f32 1.0, %v646_v6  ;;  %983 = vmatpush.bf16.msra.mxu2 %v2423_v44  ;;  %v2351_v57 = vor.u32 %v2737_v55, %v2350_v54  ;;  %v2745_v58 = vld [vmem:[#allocation3 + $0x6c] sm:$0xf0]  ;;  %v2414_v59 = vld [vmem:[#allocation3 + $0x68] sm:$0xf]  ;;  %s3563_s12 = sld [smem:[#allocation20_spill]] }
  0x32   : > { %v2753_v60 = vld [vmem:[#allocation3 + $0x70] sm:$0xf0]  ;;  %v2383_v61 = vor.u32 %v2745_v58, %v2382_v56  ;;  %v2346_v63 = vld [vmem:[#allocation3 + $0x48] sm:$0xf]  ;;  %v2410_v6 = vld [vmem:[#allocation3 + $0x50] sm:$0xf] }
  0x33   : > { %v648_v8 = vmul.f32 %v2917_v5, %v647_v7  ;;  %816 = vmatpush.bf16.msra.mxu0 %v2355_v48  ;;  %900 = vmatpush.bf16.msra.mxu1 %v2387_v52  ;;  %v2415_v62 = vor.u32 %v2753_v60, %v2414_v59  ;;  %v2752_v7 = vld [vmem:[#allocation3 + $0x58] sm:$0xf0]  ;;  %v2742_v28 = vld [vmem:[#allocation3 + $0x24] sm:$0xf0]  ;;  %v2402_v29 = vld [vmem:[#allocation3 + $0x20] sm:$0xf] }
  0x34   : > { %v2750_v30 = vld [vmem:[#allocation3 + $0x28] sm:$0xf0]  ;;  %v2334_v33 = vld [vmem:[#allocation3] sm:$0xf]  ;;  %v2366_v35 = vld [vmem:[#allocation3 + $0x4] sm:$0xf] }
  0x35   : > { %703 = vadd.xlane.f32.xlu1 %v3322_v2  ;;  %v649_v9 = vadd.f32 %v2917_v5, %v648_v8  ;;  %984 = vmatpush.bf16.msra.mxu2 %v2419_v53  ;;  %v2403_v32 = vor.u32 %v2750_v30, %v2402_v29  ;;  %v2733_v34 = vld [vmem:[#allocation3 + $0x8] sm:$0xf0]  ;;  %v2741_v37 = vld [vmem:[#allocation3 + $0xc] sm:$0xf0]  ;;  %v2398_v38 = vld [vmem:[#allocation3 + $0x8] sm:$0xf] }
  0x36   : > { %643 = vadd.xlane.f32.xlu0 %v637_v3  ;;  %v2749_v39 = vld [vmem:[#allocation3 + $0x10] sm:$0xf0]  ;;  %v2335_v42 = vor.u32 %v2733_v34, %v2334_v33  ;;  %v2367_v44 = vor.u32 %v2741_v37, %v2366_v35 }
  0x37   : > { %v3325_v10 = vsel %vm650_vm0, %v2917_v5, %v649_v9  ;;  %817 = vmatpush.bf16.msra.mxu0 %v2351_v57  ;;  %901 = vmatpush.bf16.msra.mxu1 %v2383_v61  ;;  %v2744_v5 = vld [vmem:[#allocation3 + $0x54] sm:$0xf0]  ;;  %v2411_v9 = vor.u32 %v2752_v7, %v2410_v6  ;;  %v2399_v45 = vor.u32 %v2749_v39, %v2398_v38  ;;  %vm1051_vm0 = vcmask 130048   ;;  %s633_s14 = scalar_lea.vmem %s3563_s12, %s3305_s5 }
  0x39   : > { %985 = vmatpush.bf16.msra.mxu2 %v2415_v62 }
  0x3d   : > { %986 = vmatpush.bf16.msra.mxu2 %v2411_v9 }
  0xa0   : > { %v702_v11 = vpop.xlane.xlu1 %701 }
  0xa1   : > { %v705_v12 = vmul.f32 %v702_v11, %v3325_v10  ;;  %v642_v13 = vpop.xlane.xlu0 %641  ;;  %v2342_v11 = vld [vmem:[#allocation3 + $0x30] sm:$0xf] }
  0xa2   : > { %v652_v14 = vmul.f32 %v3325_v10, %v642_v13  ;;  %v2374_v13 = vld [vmem:[#allocation3 + $0x34] sm:$0xf] }
  0xa3   : > { %v3330_v15 = vsub.f32 %v3319_v0, %v705_v12  ;;  %v2735_v12 = vld [vmem:[#allocation3 + $0x38] sm:$0xf0] }
  0xa4   : > { %v3332_v16 = vsub.f32 %v636_v1, %v652_v14  ;;  %v2736_v1 = vld [vmem:[#allocation3 + $0x50] sm:$0xf0]  ;;  %v2343_v14 = vor.u32 %v2735_v12, %v2342_v11 }
  0xa5   : > { %v709_v17 = vmul.f32 %v3330_v15, %v3330_v15  ;;  %v2347_v4 = vor.u32 %v2736_v1, %v2346_v63 }
  0xa6   : > { %v656_v18 = vmul.f32 %v3332_v16, %v3332_v16 }
  0xa7   : > { %711 = vadd.xlane.f32.xlu0 %v709_v17  ;;  %818 = vmatpush.bf16.msra.mxu0 %v2347_v4  ;;  %v2743_v17 = vld [vmem:[#allocation3 + $0x3c] sm:$0xf0] }
  0xa8   : > { %658 = vadd.xlane.f32.xlu2 %v656_v18  ;;  %v704_v19 = vpop.xlane.xlu1 %703  ;;  %v2406_v18 = vld [vmem:[#allocation3 + $0x38] sm:$0xf] }
  0xa9   : > { %v706_v20 = vmul.f32 %v704_v19, %v3325_v10  ;;  %v644_v21 = vpop.xlane.xlu0 %643  ;;  %v2751_v19 = vld [vmem:[#allocation3 + $0x40] sm:$0xf0] }
  0xaa   : > { %v653_v22 = vmul.f32 %v3325_v10, %v644_v21  ;;  %v2407_v21 = vor.u32 %v2751_v19, %v2406_v18  ;;  %v2907_v19 = vld [vmem:[%s3533_s3] ss:$0 sm:$0xff] }
  0xab   : > { %v3341_v23 = vsub.f32 %v3322_v2, %v706_v20  ;;  %v2375_v20 = vor.u32 %v2743_v17, %v2374_v13  ;;  %819 = vmatpush.bf16.msra.mxu0 %v2343_v14 }
  0xac   : > { %v3343_v24 = vsub.f32 %v637_v3, %v653_v22  ;;  %v2378_v3 = vld [vmem:[#allocation3 + $0x4c] sm:$0xf]  ;;  %v2338_v22 = vld [vmem:[#allocation3 + $0x18] sm:$0xf]  ;;  %987 = vmatpush.bf16.msra.mxu2 %v2407_v21 }
  0xad   : > { %v710_v25 = vmul.f32 %v3341_v23, %v3341_v23  ;;  %v2379_v8 = vor.u32 %v2744_v5, %v2378_v3 }
  0xae   : > { %v657_v26 = vmul.f32 %v3343_v24, %v3343_v24 }
  0xaf   : > { %713 = vadd.xlane.f32.xlu1 %v710_v25  ;;  %902 = vmatpush.bf16.msra.mxu1 %v2379_v8  ;;  %v2734_v25 = vld [vmem:[#allocation3 + $0x20] sm:$0xf0] }
  0xb0   : > { %660 = vadd.xlane.f32.xlu2 %v657_v26  ;;  %v2370_v26 = vld [vmem:[#allocation3 + $0x1c] sm:$0xf]  ;;  %v2339_v27 = vor.u32 %v2734_v25, %v2338_v22  ;;  %988 = vmatpush.bf16.msra.mxu2 %v2403_v32 }
  0xb1   : > { %v2371_v31 = vor.u32 %v2742_v28, %v2370_v26 }
  0xb2   : > { %820 = vmatpush.bf16.msra.mxu0 %v2339_v27  ;;  %v2908_v27 = vld [vmem:[%s3534_s4] ss:$0 sm:$0xff] }
  0xb3   : > { %903 = vmatpush.bf16.msra.mxu1 %v2375_v20 }
  0xb4   : > { %989 = vmatpush.bf16.msra.mxu2 %v2399_v45  ;;  %v2909_v45 = vld [vmem:[%s3536_s6] ss:$0 sm:$0xff] }
  0xb6   : > { %821 = vmatpush.bf16.msra.mxu0 %v2335_v42  ;;  %v2911_v42 = vld [vmem:[%s3536_s6 + $0x2] ss:$0 sm:$0xff] }
  0xb7   : > { %904 = vmatpush.bf16.msra.mxu1 %v2371_v31 }
  0xbb   : > { %905 = vmatpush.bf16.msra.mxu1 %v2367_v44 }
 0x11a   : > { %v712_v36 = vpop.xlane.xlu0 %711 }
 0x11b   : > { %v659_v40 = vpop.xlane.xlu2 %658  ;;  %v715_v41 = vmul.f32 %v712_v36, %v3325_v10 }
 0x11c   : > { %v662_v43 = vmul.f32 %v659_v40, %v3325_v10 }
 0x11d   : > { %v717_v46 = vadd.f32 1e-05, %v715_v41 }
 0x11e   : > { %v664_v47 = vadd.f32 1e-05, %v662_v43 }
 0x11f   : > { %2918 = vrsqrt.f32 %v717_v46  ;;  %vm725_vm1 = vweird.f32 %v717_v46 }
 0x120   : > { %2920 = vrsqrt.f32 %v664_v47  ;;  %vm672_vm4 = vweird.f32 %v664_v47 }
 0x122   : > { %v714_v48 = vpop.xlane.xlu1 %713 }
 0x123   : > { %v716_v49 = vmul.f32 %v714_v48, %v3325_v10  ;;  %v661_v50 = vpop.xlane.xlu2 %660 }
 0x124   : > { %v663_v51 = vmul.f32 %v661_v50, %v3325_v10 }
 0x125   : > { %v2919_v52 = vpop.eup %2918  ;;  %v718_v53 = vadd.f32 1e-05, %v716_v49 }
 0x126   : > { %v2921_v54 = vpop.eup %2920  ;;  %v720_v55 = vmul.f32 %v2919_v52, %v717_v46  ;;  %v665_v56 = vadd.f32 1e-05, %v663_v51  ;;  %vm726_vm2 = vweird.f32 %v2919_v52 }
 0x127   : > { %v667_v57 = vmul.f32 %v2921_v54, %v664_v47  ;;  %2922 = vrsqrt.f32 %v718_v53  ;;  %vm673_vm3 = vweird.f32 %v2921_v54  ;;  %vm727_vm5 = vmor %vm725_vm1, %vm726_vm2  ;;  %vm735_vm7 = vweird.f32 %v718_v53 }
 0x128   : > { %v721_v58 = vmul.f32 %v2919_v52, %v720_v55  ;;  %2924 = vrsqrt.f32 %v665_v56  ;;  %vm674_vm6 = vmor %vm672_vm4, %vm673_vm3  ;;  %vm682_vm11 = vweird.f32 %v665_v56  ;;  %vm1102_vm1 = vcmask 257024  }
 0x129   : > { %v668_v59 = vmul.f32 %v2921_v54, %v667_v57  ;;  %vm1188_vm2 = vcmask 519424   ;;  %vm1274_vm3 = vcmask 781824   ;;  %vm1360_vm4 = vcmask 1044224  }
 0x12a   : > { %v722_v60 = vmul.f32 0.5, %v721_v58 }
 0x12b   : > { %v669_v61 = vmul.f32 0.5, %v668_v59 }
 0x12c   : > { %v723_v62 = vsub.f32 1.5, %v722_v60 }
 0x12d   : > { %v2923_v63 = vpop.eup %2922  ;;  %v670_v1 = vsub.f32 1.5, %v669_v61 }
 0x12e   : > { %v2925_v3 = vpop.eup %2924  ;;  %v724_v4 = vmul.f32 %v2919_v52, %v723_v62  ;;  %v730_v5 = vmul.f32 %v2923_v63, %v718_v53  ;;  %vm736_vm8 = vweird.f32 %v2923_v63 }
 0x12f   : > { %v671_v6 = vmul.f32 %v2921_v54, %v670_v1  ;;  %v677_v7 = vmul.f32 %v2925_v3, %v665_v56  ;;  %vm683_vm9 = vweird.f32 %v2925_v3  ;;  %vm737_vm10 = vmor %vm735_vm7, %vm736_vm8 }
 0x130   : > { %v731_v8 = vmul.f32 %v2923_v63, %v730_v5  ;;  %v728_v12 = vsel %vm727_vm5, %v2919_v52, %v724_v4  ;;  %vm684_vm12 = vmor %vm682_vm11, %vm683_vm9 }
 0x131   : > { %v678_v9 = vmul.f32 %v2925_v3, %v677_v7  ;;  %v675_v14 = vsel %vm674_vm6, %v2921_v54, %v671_v6  ;;  %v739_v20 = vmul.f32 %v728_v12, %v3330_v15  ;;  %v998_v6 = vlaneseq }
 0x132   : > { %v732_v11 = vmul.f32 0.5, %v731_v8  ;;  %v686_v22 = vmul.f32 %v675_v14, %v3332_v16 }
 0x133   : > { %v679_v13 = vmul.f32 0.5, %v678_v9  ;;  %v741_v29 = vmul.f32 %v2907_v19, %v739_v20  ;;  %v999_v7 = vshrl.u32 %v998_v6, 7  ;;  %v1005_v8 = vand.u32 127, %v998_v6  ;;  %v2906_v9 = vld [vmem:[%s624_s25] ss:$0 sm:$0xff] }
 0x134   : > { %v733_v17 = vsub.f32 1.5, %v732_v11  ;;  %v692_v32 = vmul.f32 %v2907_v19, %v686_v22  ;;  %v3145_v11 = vmov -1e+30  }
 0x135   : > { %v680_v18 = vsub.f32 1.5, %v679_v13  ;;  %v743_v34 = vadd.f32 %v2908_v27, %v741_v29  ;;  %vm1006_vm14 = vcmp.le.s32.totalorder %v1005_v8, %v999_v7  ;;  %v1000_v13 = vadd.s32 8, %v999_v7 }
 0x136   : > { %v734_v21 = vmul.f32 %v2923_v63, %v733_v17  ;;  %v698_v35 = vadd.f32 %v2908_v27, %v692_v32  ;;  %v1008_v12 = vsel %vm1006_vm14, 0.0, %v3145_v11 }
 0x137   : > { %v681_v25 = vmul.f32 %v2925_v3, %v680_v18  ;;  %v3382_v14 = vadd.f32 %v2906_v9, %v1008_v12  ;;  %vm1007_vm15 = vcmp.le.s32.totalorder %v1005_v8, %v1000_v13 }
 0x138   : > { %v738_v26 = vsel %vm737_vm10, %v2923_v63, %v734_v21  ;;  %v1009_v20 = vsel %vm1007_vm15, 0.0, %v3145_v11 }
 0x139   : > { %v740_v28 = vmul.f32 %v738_v26, %v3341_v23  ;;  %v685_v30 = vsel %vm684_vm12, %v2925_v3, %v681_v25  ;;  %v2910_v23 = vld [vmem:[%s3536_s6 + $0x1] ss:$0 sm:$0xff]  ;;  %v3386_v22 = vadd.f32 %v2906_v9, %v1009_v20 }
 0x13a   : > { %v687_v31 = vmul.f32 %v685_v30, %v3343_v24 }
 0x13b   : > { %v742_v15 = vmul.f32 %v2907_v19, %v740_v28 }
 0x13c   : > { %v693_v33 = vmul.f32 %v2907_v19, %v687_v31 }
 0x13d   : > { %v744_v16 = vadd.f32 %v2908_v27, %v742_v15 }
 0x13e   : > { %v699_v36 = vadd.f32 %v2908_v27, %v693_v33 }
 0x13f   : > { %v745_v37 = vpack.c.bf16 %v744_v16, %v743_v34 }
 0x140   : > { %v700_v38 = vpack.c.bf16 %v699_v36, %v698_v35 }
 0x141   : > { %822 = vmatmul.bf16.vlgmr.msra.gmra.mxu0 %v745_v37 }
 0x142   : > { %906 = vmatmul.bf16.vlgmr.msra.gmra.mxu1 %v700_v38  ;;  %990 = vmatmul.bf16.vlgmr.msra.gmra.mxu2 %v700_v38 }
 0x1be   : > { %v823_v39 = vpop.f32.mrf.mxu0 }
 0x1bf   : > { %v907_v40 = vpop.f32.mrf.mxu1  ;;  %v824_v51 = vadd.f32 %v2909_v45, %v823_v39 }
 0x1c0   : > { %v908_v41 = vadd.f32 %v2910_v23, %v907_v40 }
 0x1c1   : > { %v828_v59 = vpack.c.bf16 %v824_v51, %v824_v51 }
 0x1c2   : > { %v912_v46 = vpack.c.bf16 %v908_v41, %v908_v41 }
 0x1c3   : > { %v1018_v3 = vunpack.c.l.b16 %v828_v59 }
 0x1c4   : > { %v1023_v52 = vunpack.c.l.b16 %v912_v46 }
 0x1c5   : > { %v991_v24 = vpop.f32.mrf.mxu2 }
 0x1c6   : > { %v825_v43 = vpop.f32.mrf.mxu0  ;;  %v992_v48 = vadd.f32 %v2911_v42, %v991_v24 }
 0x1c7   : > { %v909_v44 = vpop.f32.mrf.mxu1  ;;  %v826_v49 = vadd.f32 %v2909_v45, %v825_v43 }
 0x1c8   : > { %v910_v47 = vadd.f32 %v2910_v23, %v909_v44  ;;  %v996_v55 = vpack.c.bf16 %v992_v48, %v992_v48 }
 0x1c9   : > { %v829_v56 = vpack.c.bf16 %v826_v49, %v826_v49 }
 0x1ca   : > { %v913_v50 = vpack.c.bf16 %v910_v47, %v910_v47  ;;  %v1079_v62 = vunpack.c.l.b16 %v996_v55 }
 0x1cb   : > { %v1019_v63 = vunpack.c.l.b16 %v829_v56 }
 0x1cc   : > { %v1024_v53 = vunpack.c.l.b16 %v913_v50 }
 0x1cd   : > { %v993_v54 = vpop.f32.mrf.mxu2  ;;  %v1020_v5 = vpack.c.b16 %v1019_v63, %v1018_v3 }
 0x1ce   : > { %v1025_v57 = vpack.c.b16 %v1024_v53, %v1023_v52  ;;  %v994_v58 = vadd.f32 %v2911_v42, %v993_v54 }
 0x1d0   : > { %v997_v60 = vpack.c.bf16 %v994_v58, %v994_v58  ;;  %v1031_v61 = vsel %vm1026_vm13, %v1025_v57, 0 }
 0x1d1   : > { %1040 = vmatpush.bf16.xpose.msra.mxu3 %v1031_v61 }
 0x1d2   : > { %v1080_v1 = vunpack.c.l.b16 %v997_v60 }
 0x1d4   : > { %v3373_v4 = vpack.c.b16 %v1080_v1, %v1079_v62 }
 0x1d8   : > { %2428 = vmatmul.msk.bf16.vlgmr.msra.gmra.mxu3 %vm1026_vm13, %v1020_v5 }
 0x1d9   : > { %1093 = vmatpush.bf16.msrb.mxu3 %v3373_v4 }
 0x25b   : > { %v1042_v17 = vpop.f32.mrf.mxu3 }
 0x25c   : > { %v1047_v18 = vmul.f32 0.17677669, %v1042_v17 }
 0x25e   : > { %v1049_v19 = vadd.f32 %v1047_v18, %v3382_v14 }
 0x260   : > { %v1052_v21 = vsel %vm1051_vm0, %v1049_v19, -inf }
 0x261   : > { %1053 = vmax.xlane.f32.xlu2 %v1052_v21 }
 0x263   : > { %v1044_v25 = vpop.f32.mrf.mxu3 }
 0x264   : > { %v1048_v26 = vmul.f32 0.17677669, %v1044_v25 }
 0x266   : > { %v1050_v27 = vadd.f32 %v1048_v26, %v3386_v22 }
 0x268   : > { %v1055_v28 = vsel %vm1051_vm0, %v1050_v27, -inf }
 0x269   : > { %1056 = vmax.xlane.f32.xlu0 %v1055_v28 }
 0x279   : > { %1193 = vrot.lane.b32.xlu2 %v1025_v57, %s3146_s18 }
 0x27d   : > { %1107 = vrot.lane.b32.xlu0 %v1025_v57, %s3147_s19 }
 0x285   : > { %1279 = vrot.lane.b32.xlu0 %v1025_v57, %s3148_s26 }
 0x2d4   : > { %v1054_v29 = vpop.xlane.xlu2 %1053 }
 0x2d5   : > { %v1058_v30 = vsub.f32 %v1049_v19, %v1054_v29 }
 0x2d7   : > { %v1060_v31 = vmul.f32 1.442695, %v1058_v30 }
 0x2d9   : > { %2926 = vpow2.f32 %v1060_v31 }
 0x2dc   : > { %v1194_v32 = vpop.permute.xlu2 %1193  ;;  %v1057_v15 = vpop.xlane.xlu0 %1056 }
 0x2dd   : > { %v1059_v33 = vsub.f32 %v1050_v27, %v1057_v15  ;;  %v1199_v34 = vsel %vm1026_vm13, %v1194_v32, 0 }
 0x2de   : > { %1208 = vmatpush.bf16.xpose.msrb.mxu2 %v1199_v34 }
 0x2df   : > { %v2927_v16 = vpop.eup %2926  ;;  %v1062_v35 = vmul.f32 1.442695, %v1059_v33 }
 0x2e0   : > { %v1064_v36 = vsel %vm1051_vm0, %v2927_v16, 0.0 }
 0x2e1   : > { %2928 = vpow2.f32 %v1062_v35  ;;  %1065 = vadd.xlane.f32.xlu1 %v1064_v36 }
 0x2e7   : > { %v2929_v37 = vpop.eup %2928 }
 0x2e8   : > { %v1067_v38 = vsel %vm1051_vm0, %v2929_v37, 0.0 }
 0x2e9   : > { %1068 = vadd.xlane.f32.xlu2 %v1067_v38 }
 0x2ef   : > { %v1108_v39 = vpop.permute.xlu0 %1107 }
 0x2f0   : > { %v1113_v40 = vsel %vm1026_vm13, %v1108_v39, 0 }
 0x2f1   : > { %1122 = vmatpush.bf16.xpose.msra.mxu3 %v1113_v40 }
 0x2f7   : > { %v1280_v48 = vpop.permute.xlu0 %1279 }
 0x2f8   : > { %v1285_v50 = vsel %vm1026_vm13, %v1280_v48, 0 }
 0x2fa   : > { %1105 = vrot.lane.b32.xlu1 %v1020_v5, %s3147_s19 }
 0x301   : > { %1191 = vrot.lane.b32.xlu2 %v1020_v5, %s3146_s18 }
 0x302   : > { %1277 = vrot.lane.b32.xlu1 %v1020_v5, %s3148_s26 }
 0x354   : > { %v1066_v23 = vpop.xlane.xlu1 %1065 }
 0x355   : > { %v1070_v41 = vmax.f32 %v1066_v23, 1e-30 }
 0x357   : > { %2930 = vrcp.f32 %v1070_v41 }
 0x35c   : > { %v1069_v24 = vpop.xlane.xlu2 %1068 }
 0x35d   : > { %v1071_v42 = vmax.f32 %v1069_v24, 1e-30  ;;  %v2931_v43 = vpop.eup %2930 }
 0x35e   : > { %v1074_v46 = vmul.f32 %v2931_v43, %v2927_v16 }
 0x35f   : > { %2932 = vrcp.f32 %v1071_v42 }
 0x364   : > { %v1192_v44 = vpop.permute.xlu2 %1191 }
 0x365   : > { %v2933_v45 = vpop.eup %2932  ;;  %2432 = vmatmul.msk.bf16.vlgmr.msrb.gmra.mxu2 %vm1026_vm13, %v1192_v44 }
 0x366   : > { %v1075_v47 = vmul.f32 %v2933_v45, %v2929_v37 }
 0x368   : > { %v1076_v49 = vpack.c.bf16 %v1075_v47, %v1074_v46 }
 0x36a   : > { %2429 = vmatmul.msk.bf16.vlgmr.msrb.gmra.mxu3 %vm1051_vm0, %v1076_v49 }
 0x36b   : > { %1294 = vmatpush.bf16.xpose.msrb.mxu3 %v1285_v50 }
 0x36c   : > { %v1106_v51 = vpop.permute.xlu1 %1105 }
 0x374   : > { %v1278_v52 = vpop.permute.xlu1 %1277 }
 0x37a   : > { %2430 = vmatmul.msk.bf16.vlgmr.msra.gmra.mxu3 %vm1026_vm13, %v1106_v51 }
 0x38a   : > { %2434 = vmatmul.msk.bf16.vlgmr.msrb.gmra.mxu3 %vm1026_vm13, %v1278_v52 }
 0x3e8   : > { %v1210_v53 = vpop.f32.mrf.mxu2 }
 0x3e9   : > { %v1215_v54 = vmul.f32 0.17677669, %v1210_v53 }
 0x3eb   : > { %v1217_v55 = vadd.f32 %v1215_v54, %v3382_v14 }
 0x3ed   : > { %v1095_v56 = vpop.f32.mrf.mxu3  ;;  %v1219_v57 = vsel %vm1051_vm0, %v1217_v55, -inf }
 0x3ee   : > { %v1100_v58 = vpack.c.bf16 %v1095_v56, %v1095_v56  ;;  %1220 = vmax.xlane.f32.xlu1 %v1219_v57 }
 0x3f0   : > { %1103 = vst.msk [vmem:[#allocation2] sm:$0xf] %vm1102_vm1, %v1100_v58  ;;  %v1212_v63 = vpop.f32.mrf.mxu2 }
 0x3f1   : > { %v1216_v3 = vmul.f32 0.17677669, %v1212_v63 }
 0x3f3   : > { %v1218_v8 = vadd.f32 %v1216_v3, %v3386_v22 }
 0x3f5   : > { %v1097_v59 = vpop.f32.mrf.mxu3  ;;  %v1222_v11 = vsel %vm1051_vm0, %v1218_v8, -inf }
 0x3f6   : > { %v1101_v60 = vpack.c.bf16 %v1097_v59, %v1097_v59 }
 0x3f8   : > { %1104 = vst.msk [vmem:[#allocation2 + $0x4] sm:$0xf] %vm1102_vm1, %v1101_v60 }
 0x3fd   : > { %v1124_v61 = vpop.f32.mrf.mxu3 }
 0x3fe   : > { %v1129_v62 = vmul.f32 0.17677669, %v1124_v61 }
 0x400   : > { %v1131_v1 = vadd.f32 %v1129_v62, %v3382_v14 }
 0x402   : > { %v1133_v5 = vsel %vm1051_vm0, %v1131_v1, -inf }
 0x403   : > { %1134 = vmax.xlane.f32.xlu0 %v1133_v5 }
 0x405   : > { %v1126_v6 = vpop.f32.mrf.mxu3 }
 0x406   : > { %v1130_v7 = vmul.f32 0.17677669, %v1126_v6 }
 0x408   : > { %v1132_v9 = vadd.f32 %v1130_v7, %v3386_v22 }
 0x40a   : > { %v1136_v12 = vsel %vm1051_vm0, %v1132_v9, -inf }
 0x40b   : > { %1223 = vmax.xlane.f32.xlu0 %v1222_v11  ;;  %1137 = vmax.xlane.f32.xlu2 %v1136_v12 }
 0x40d   : > { %v1296_v13 = vpop.f32.mrf.mxu3 }
 0x40e   : > { %v1301_v17 = vmul.f32 0.17677669, %v1296_v13 }
 0x410   : > { %v1303_v18 = vadd.f32 %v1301_v17, %v3382_v14 }
 0x412   : > { %v1305_v19 = vsel %vm1051_vm0, %v1303_v18, -inf }
 0x413   : > { %1306 = vmax.xlane.f32.xlu2 %v1305_v19 }
 0x415   : > { %v1298_v20 = vpop.f32.mrf.mxu3 }
 0x416   : > { %v1302_v21 = vmul.f32 0.17677669, %v1298_v20 }
 0x418   : > { %v1304_v25 = vadd.f32 %v1302_v21, %v3386_v22 }
 0x41a   : > { %v1308_v26 = vsel %vm1051_vm0, %v1304_v25, -inf }
 0x41b   : > { %1309 = vmax.xlane.f32.xlu1 %v1308_v26 }
 0x461   : > { %v1221_v27 = vpop.xlane.xlu1 %1220 }
 0x462   : > { %v1225_v28 = vsub.f32 %v1217_v55, %v1221_v27 }
 0x464   : > { %v1227_v29 = vmul.f32 1.442695, %v1225_v28 }
 0x466   : > { %2934 = vpow2.f32 %v1227_v29 }
 0x46c   : > { %v3417_v30 = vpop.eup %2934 }
 0x46d   : > { %v1231_v31 = vsel %vm1051_vm0, %v3417_v30, 0.0 }
 0x46e   : > { %1232 = vadd.xlane.f32.xlu1 %v1231_v31 }
 0x476   : > { %v1135_v14 = vpop.xlane.xlu0 %1134 }
 0x477   : > { %v1139_v35 = vsub.f32 %v1131_v1, %v1135_v14 }
 0x479   : > { %v1141_v36 = vmul.f32 1.442695, %v1139_v35  ;;  %v2764_v35 = vld [vmem:[#allocation5 + $0x30] sm:$0xff] }
 0x47e   : > { %v1138_v32 = vpop.xlane.xlu2 %1137  ;;  %v1224_v15 = vpop.xlane.xlu0 %1223 }
 0x47f   : > { %v1140_v33 = vsub.f32 %v1132_v9, %v1138_v32  ;;  %v1226_v34 = vsub.f32 %v1218_v8, %v1224_v15 }
 0x481   : > { %v1143_v16 = vmul.f32 1.442695, %v1140_v33  ;;  %v1229_v22 = vmul.f32 1.442695, %v1226_v34 }
 0x483   : > { %2936 = vpow2.f32 %v1143_v16 }
 0x484   : > { %2938 = vpow2.f32 %v1229_v22  ;;  %v2765_v22 = vld [vmem:[#allocation5 + $0x38] sm:$0xff] }
 0x485   : > { %2940 = vpow2.f32 %v1141_v36  ;;  %1435 = vmatpush.bf16.msrb.mxu1 %v2765_v22  ;;  %v2763_v36 = vld [vmem:[#allocation5 + $0x28] sm:$0xff] }
 0x486   : > { %v1307_v37 = vpop.xlane.xlu2 %1306  ;;  %v2787_v22 = vld [vmem:[#allocation7 + $0xac] sm:$0xf] }
 0x487   : > { %v1311_v38 = vsub.f32 %v1303_v18, %v1307_v37 }
 0x489   : > { %v2937_v39 = vpop.eup %2936  ;;  %v1313_v40 = vmul.f32 1.442695, %v1311_v38  ;;  %1436 = vmatpush.bf16.msrb.mxu1 %v2764_v35  ;;  %v2564_v35 = vld [vmem:[#allocation7 + $0xb8] sm:$0xf0] }
 0x48a   : > { %v2939_v23 = vpop.eup %2938  ;;  %v1148_v41 = vsel %vm1051_vm0, %v2937_v39, 0.0 }
 0x48b   : > { %2942 = vpow2.f32 %v1313_v40  ;;  %1149 = vadd.xlane.f32.xlu2 %v1148_v41  ;;  %v1234_v24 = vsel %vm1051_vm0, %v2939_v23, 0.0  ;;  %v2941_v44 = vpop.eup %2940  ;;  %v2761_v40 = vld [vmem:[#allocation5 + $0x18] sm:$0xff]  ;;  %v2759_v41 = vld [vmem:[#allocation5 + $0x8] sm:$0xff] }
 0x48c   : > { %1235 = vadd.xlane.f32.xlu0 %v1234_v24  ;;  %v1145_v48 = vsel %vm1051_vm0, %v2941_v44, 0.0  ;;  %v2758_v24 = vld [vmem:[#allocation5] sm:$0xff] }
 0x48d   : > { %1437 = vmatpush.bf16.msrb.mxu1 %v2763_v36  ;;  %v2567_v36 = vor.u32 %v2787_v22, %v2564_v35  ;;  %v2482_v22 = vld [vmem:[#allocation7 + $0x8] sm:$0xf]  ;;  %v2769_v35 = vld [vmem:[#allocation7 + $0x14] sm:$0xf0] }
 0x48e   : > { %v1310_v42 = vpop.xlane.xlu1 %1309 }
 0x48f   : > { %v1312_v43 = vsub.f32 %v1304_v25, %v1310_v42 }
 0x491   : > { %v2943_v45 = vpop.eup %2942  ;;  %v1315_v46 = vmul.f32 1.442695, %v1312_v43 }
 0x492   : > { %v1317_v47 = vsel %vm1051_vm0, %v2943_v45, 0.0 }
 0x493   : > { %2944 = vpow2.f32 %v1315_v46  ;;  %1318 = vadd.xlane.f32.xlu1 %v1317_v47  ;;  %v2912_v47 = vld [vmem:[%s3538_s8] ss:$0 sm:$0xff] }
 0x494   : > { %1146 = vadd.xlane.f32.xlu0 %v1145_v48 }
 0x499   : > { %v2945_v49 = vpop.eup %2944 }
 0x49a   : > { %v1320_v50 = vsel %vm1051_vm0, %v2945_v49, 0.0 }
 0x49c   : > { %1321 = vadd.xlane.f32.xlu0 %v1320_v50 }
 0x4a3   : > { %1158 = vrot.lane.b32.xlu2 %v3373_v4, %s3147_s19 }
 0x4ac   : > { %1244 = vrot.lane.b32.xlu1 %v3373_v4, %s3146_s18 }
 0x4b0   : > { %1330 = vrot.lane.b32.xlu0 %v3373_v4, %s3148_s26 }
 0x4e1   : > { %v1233_v57 = vpop.xlane.xlu1 %1232 }
 0x4e2   : > { %v1237_v62 = vmax.f32 %v1233_v57, 1e-30 }
 0x4fe   : > { %v1150_v51 = vpop.xlane.xlu2 %1149 }
 0x4ff   : > { %v1236_v52 = vpop.xlane.xlu0 %1235  ;;  %v1152_v53 = vmax.f32 %v1150_v51, 1e-30 }
 0x500   : > { %v1238_v59 = vmax.f32 %v1236_v52, 1e-30 }
 0x501   : > { %2946 = vrcp.f32 %v1152_v53 }
 0x506   : > { %v1159_v54 = vpop.permute.xlu2 %1158  ;;  %v1319_v3 = vpop.xlane.xlu1 %1318 }
 0x507   : > { %v1147_v55 = vpop.xlane.xlu0 %1146  ;;  %1171 = vmatpush.bf16.msrb.mxu0 %v1159_v54  ;;  %v2947_v58 = vpop.eup %2946  ;;  %v1323_v6 = vmax.f32 %v1319_v3, 1e-30  ;;  %v2594_v3 = vld [vmem:[#allocation7 + $0xe8] sm:$0xf] }
 0x508   : > { %v1151_v56 = vmax.f32 %v1147_v55, 1e-30  ;;  %v1156_v63 = vmul.f32 %v2947_v58, %v2937_v39  ;;  %v2762_v39 = vld [vmem:[#allocation5 + $0x20] sm:$0xff] }
 0x509   : > { %1438 = vmatpush.bf16.msrb.mxu1 %v2762_v39  ;;  %v2782_v39 = vld [vmem:[#allocation7 + $0x84] sm:$0xf] }
 0x50a   : > { %2948 = vrcp.f32 %v1151_v56 }
 0x50b   : > { %2950 = vrcp.f32 %v1238_v59 }
 0x50c   : > { %2952 = vrcp.f32 %v1237_v62  ;;  %v2794_v62 = vld [vmem:[#allocation7 + $0xe4] sm:$0xf] }
 0x50d   : > { %1439 = vmatpush.bf16.msrb.mxu1 %v2761_v40 }
 0x50f   : > { %v1322_v61 = vpop.xlane.xlu0 %1321 }
 0x510   : > { %v2949_v60 = vpop.eup %2948  ;;  %v1324_v4 = vmax.f32 %v1322_v61, 1e-30  ;;  %v2796_v61 = vld [vmem:[#allocation7 + $0xec] sm:$0xf0] }
 0x511   : > { %v1155_v1 = vmul.f32 %v2949_v60, %v2941_v44  ;;  %v2951_v7 = vpop.eup %2950  ;;  %v2586_v60 = vld [vmem:[#allocation7 + $0xe0] sm:$0xf] }
 0x512   : > { %2954 = vrcp.f32 %v1324_v4  ;;  %v2953_v8 = vpop.eup %2952  ;;  %v1242_v9 = vmul.f32 %v2951_v7, %v2939_v23  ;;  %v2760_v23 = vld [vmem:[#allocation5 + $0x10] sm:$0xff]  ;;  %v2797_v4 = vld [vmem:[#allocation7 + $0xf4] sm:$0xf0]  ;;  %v2795_v7 = vld [vmem:[#allocation7 + $0xec] sm:$0xf] }
 0x513   : > { %v1157_v5 = vpack.c.bf16 %v1156_v63, %v1155_v1  ;;  %2956 = vrcp.f32 %v1323_v6  ;;  %v1241_v12 = vmul.f32 %v2953_v8, %v3417_v30  ;;  %1440 = vmatpush.bf16.msrb.mxu1 %v2760_v23  ;;  %v2587_v63 = vor.u32 %v2796_v61, %v2586_v60  ;;  %v2588_v1 = vld [vmem:[#allocation7 + $0xf0] sm:$0xf0]  ;;  %v2596_v8 = vld [vmem:[#allocation7 + $0xf8] sm:$0xf0]  ;;  %v2506_v61 = vld [vmem:[#allocation7 + $0x40] sm:$0xf] }
 0x514   : > { %v2595_v6 = vor.u32 %v2797_v4, %v2594_v3  ;;  %v2540_v23 = vld [vmem:[#allocation7 + $0x90] sm:$0xf0]  ;;  %v2514_v4 = vld [vmem:[#allocation7 + $0x48] sm:$0xf] }
 0x515   : > { %2431 = vmatmul.msk.bf16.vlgmr.msrb.gmra.mxu0 %vm1051_vm0, %v1157_v5  ;;  %v1243_v18 = vpack.c.bf16 %v1242_v9, %v1241_v12  ;;  %v2591_v5 = vor.u32 %v2794_v62, %v2588_v1  ;;  %v2599_v9 = vor.u32 %v2795_v7, %v2596_v8  ;;  %v2792_v12 = vld [vmem:[#allocation7 + $0xcc] sm:$0xf0]  ;;  %v2508_v3 = vld [vmem:[#allocation7 + $0x50] sm:$0xf0]  ;;  %v2775_v8 = vld [vmem:[#allocation7 + $0x4c] sm:$0xf] }
 0x516   : > { %v2776_v62 = vld [vmem:[#allocation7 + $0x4c] sm:$0xf0] }
 0x517   : > { %1441 = vmatpush.bf16.msrb.mxu1 %v2759_v41  ;;  %1726 = vmatpush.bf16.msra.mxu3 %v2591_v5  ;;  %v2546_v41 = vld [vmem:[#allocation7 + $0x88] sm:$0xf]  ;;  %v2507_v1 = vor.u32 %v2776_v62, %v2506_v61  ;;  %v2777_v5 = vld [vmem:[#allocation7 + $0x54] sm:$0xf0] }
 0x518   : > { %v2955_v11 = vpop.eup %2954  ;;  %v2515_v7 = vor.u32 %v2777_v5, %v2514_v4  ;;  %v2914_v61 = vld [vmem:[%s3540_s10] ss:$0 sm:$0xff]  ;;  %v2820_v5 = vld [vmem:[#allocation8 + $0xb0] sm:$0xff] }
 0x519   : > { %v2957_v17 = vpop.eup %2956  ;;  %v1328_v19 = vmul.f32 %v2955_v11, %v2945_v49  ;;  %v2570_v11 = vld [vmem:[#allocation7 + $0xc0] sm:$0xf]  ;;  %v2829_v4 = vld [vmem:[#allocation8 + $0xf8] sm:$0xff] }
 0x51a   : > { %v1327_v20 = vmul.f32 %v2957_v17, %v2943_v45  ;;  %v2571_v17 = vor.u32 %v2792_v12, %v2570_v11  ;;  %v2490_v12 = vld [vmem:[#allocation7 + $0x20] sm:$0xf] }
 0x51b   : > { %1442 = vmatpush.bf16.msrb.mxu1 %v2758_v24  ;;  %v2785_v24 = vld [vmem:[#allocation7 + $0x94] sm:$0xf0] }
 0x51c   : > { %v1329_v25 = vpack.c.bf16 %v1328_v19, %v1327_v20  ;;  %v2578_v19 = vld [vmem:[#allocation7 + $0xc8] sm:$0xf]  ;;  %v2793_v20 = vld [vmem:[#allocation7 + $0xd4] sm:$0xf0] }
 0x51e   : > { %v1245_v13 = vpop.permute.xlu1 %1244 }
 0x51f   : > { %1257 = vmatpush.bf16.msra.mxu2 %v1245_v13  ;;  %v2790_v13 = vld [vmem:[#allocation7 + $0xc4] sm:$0xf]  ;;  %1754 = vmatpush.bf16.msra.mxu1 %v2599_v9  ;;  %v2516_v9 = vld [vmem:[#allocation7 + $0x58] sm:$0xf0] }
 0x520   : > { %v2519_v11 = vor.u32 %v2775_v8, %v2516_v9  ;;  %v2819_v8 = vld [vmem:[#allocation8 + $0xa8] sm:$0xff] }
 0x521   : > { %v2827_v9 = vld [vmem:[#allocation8 + $0xe8] sm:$0xff] }
 0x522   : > { %v1331_v21 = vpop.permute.xlu0 %1330  ;;  %2433 = vmatmul.msk.bf16.vlgmr.msra.gmra.mxu2 %vm1051_vm0, %v1243_v18  ;;  %v2572_v18 = vld [vmem:[#allocation7 + $0xd0] sm:$0xf0] }
 0x523   : > { %1343 = vmatpush.bf16.msra.mxu0 %v1331_v21  ;;  %1712 = vmatpush.bf16.msrb.mxu2 %v2587_v63  ;;  %v2575_v21 = vor.u32 %v2790_v13, %v2572_v18  ;;  %v2774_v63 = vld [vmem:[#allocation7 + $0x44] sm:$0xf]  ;;  %v2772_v13 = vld [vmem:[#allocation7 + $0x2c] sm:$0xf0] }
 0x524   : > { %v2491_v18 = vor.u32 %v2772_v13, %v2490_v12  ;;  %v2812_v12 = vld [vmem:[#allocation8 + $0x70] sm:$0xff]  ;;  %v2818_v13 = vld [vmem:[#allocation8 + $0xa0] sm:$0xff] }
 0x525   : > { %1727 = vmatpush.bf16.msra.mxu3 %v2575_v21  ;;  %v2773_v21 = vld [vmem:[#allocation7 + $0x34] sm:$0xf0] }
 0x526   : > { %2435 = vmatmul.msk.bf16.vlgmr.msra.gmra.mxu0 %vm1051_vm0, %v1329_v25  ;;  %v2579_v25 = vor.u32 %v2793_v20, %v2578_v19  ;;  %v2492_v19 = vld [vmem:[#allocation7 + $0x30] sm:$0xf0]  ;;  %v2498_v20 = vld [vmem:[#allocation7 + $0x28] sm:$0xf] }
 0x527   : > { %1740 = vmatpush.bf16.msrb.mxu0 %v2595_v6  ;;  %1713 = vmatpush.bf16.msrb.mxu2 %v2571_v17  ;;  %v2511_v6 = vor.u32 %v2774_v63, %v2508_v3  ;;  %v2770_v17 = vld [vmem:[#allocation7 + $0x24] sm:$0xf] }
 0x52b   : > { %1741 = vmatpush.bf16.msrb.mxu0 %v2579_v25 }
 0x592   : > { %v1173_v26 = vpop.f32.mrf.mxu0 }
 0x593   : > { %v1178_v27 = vpack.c.bf16 %v1173_v26, %v1173_v26  ;;  %v2791_v26 = vld [vmem:[#allocation7 + $0xcc] sm:$0xf] }
 0x595   : > { %1182 = vrot.lane.b32.xlu2 %v1178_v27, %s3148_s26  ;;  %v2580_v27 = vld [vmem:[#allocation7 + $0xd8] sm:$0xf0] }
 0x59a   : > { %v1175_v28 = vpop.f32.mrf.mxu0 }
 0x59b   : > { %v1179_v29 = vpack.c.bf16 %v1175_v28, %v1175_v28  ;;  %v2583_v28 = vor.u32 %v2791_v26, %v2580_v27  ;;  %v2495_v26 = vor.u32 %v2770_v17, %v2492_v19  ;;  %v2499_v27 = vor.u32 %v2773_v21, %v2498_v20  ;;  %v2826_v17 = vld [vmem:[#allocation8 + $0xe0] sm:$0xff]  ;;  %v2811_v19 = vld [vmem:[#allocation8 + $0x68] sm:$0xff]  ;;  %v2817_v20 = vld [vmem:[#allocation8 + $0x98] sm:$0xff] }
 0x59c   : > { %v2825_v21 = vld [vmem:[#allocation8 + $0xd8] sm:$0xff] }
 0x59d   : > { %1184 = vrot.lane.b32.xlu2 %v1179_v29, %s3148_s26  ;;  %v2554_v29 = vld [vmem:[#allocation7 + $0xa0] sm:$0xf]  ;;  %1755 = vmatpush.bf16.msra.mxu1 %v2583_v28  ;;  %v2771_v28 = vld [vmem:[#allocation7 + $0x2c] sm:$0xf] }
 0x5a1   : > { %1756 = vmatpush.bf16.msra.mxu1 %v2567_v36  ;;  %v2767_v36 = vld [vmem:[#allocation7 + $0xc] sm:$0xf] }
 0x5a3   : > { %v1345_v30 = vpop.f32.mrf.mxu0 }
 0x5a4   : > { %v1350_v31 = vpack.c.bf16 %v1345_v30, %v1345_v30  ;;  %v2788_v30 = vld [vmem:[#allocation7 + $0xac] sm:$0xf0] }
 0x5a5   : > { %v1259_v14 = vpop.f32.mrf.mxu2 }
 0x5a6   : > { %v1264_v32 = vpack.c.bf16 %v1259_v14, %v1259_v14  ;;  %1354 = vrot.lane.b32.xlu2 %v1350_v31, %s3147_s19  ;;  %v2786_v31 = vld [vmem:[#allocation7 + $0xa4] sm:$0xf]  ;;  %v2555_v14 = vor.u32 %v2788_v30, %v2554_v29  ;;  %v2500_v29 = vld [vmem:[#allocation7 + $0x38] sm:$0xf0]  ;;  %v2474_v30 = vld [vmem:[#allocation7] sm:$0xf] }
 0x5a8   : > { %1268 = vrot.lane.b32.xlu0 %v1264_v32, %s3146_s18  ;;  %v2556_v32 = vld [vmem:[#allocation7 + $0xb0] sm:$0xf0]  ;;  %1714 = vmatpush.bf16.msrb.mxu2 %v2555_v14  ;;  %v2503_v14 = vor.u32 %v2771_v28, %v2500_v29  ;;  %v2801_v29 = vld [vmem:[#allocation8 + $0x18] sm:$0xff] }
 0x5a9   : > { %v2824_v28 = vld [vmem:[#allocation8 + $0xd0] sm:$0xff] }
 0x5ab   : > { %v1347_v15 = vpop.f32.mrf.mxu0 }
 0x5ac   : > { %v1351_v34 = vpack.c.bf16 %v1347_v15, %v1347_v15  ;;  %v2562_v15 = vld [vmem:[#allocation7 + $0xa8] sm:$0xf] }
 0x5ad   : > { %v1261_v33 = vpop.f32.mrf.mxu2 }
 0x5ae   : > { %v1265_v16 = vpack.c.bf16 %v1261_v33, %v1261_v33  ;;  %v2789_v33 = vld [vmem:[#allocation7 + $0xb4] sm:$0xf0] }
 0x5b0   : > { %1270 = vrot.lane.b32.xlu1 %v1265_v16, %s3146_s18  ;;  %1356 = vrot.lane.b32.xlu0 %v1351_v34, %s3147_s19  ;;  %v2559_v34 = vor.u32 %v2786_v31, %v2556_v32  ;;  %v2563_v16 = vor.u32 %v2789_v33, %v2562_v15  ;;  %v2768_v32 = vld [vmem:[#allocation7 + $0xc] sm:$0xf0]  ;;  %v2766_v15 = vld [vmem:[#allocation7 + $0x4] sm:$0xf]  ;;  %v2476_v33 = vld [vmem:[#allocation7 + $0x10] sm:$0xf0] }
 0x5b2   : > { %1728 = vmatpush.bf16.msra.mxu3 %v2559_v34  ;;  %1742 = vmatpush.bf16.msrb.mxu0 %v2563_v16  ;;  %v2475_v34 = vor.u32 %v2768_v32, %v2474_v30  ;;  %v2479_v16 = vor.u32 %v2766_v15, %v2476_v33  ;;  %v2809_v30 = vld [vmem:[#allocation8 + $0x58] sm:$0xff]  ;;  %v2800_v15 = vld [vmem:[#allocation8 + $0x10] sm:$0xff] }
 0x5b3   : > { %v3478_v32 = vld [vmem:[%s3561_s21] sm:$0xf]  ;;  %v2808_v33 = vld [vmem:[#allocation8 + $0x50] sm:$0xff] }
 0x5ef   : > { %v1183_v37 = vpop.permute.xlu2 %1182 }
 0x5f0   : > { %1189 = vst.msk [vmem:[#allocation2] sm:$0xf] %vm1188_vm2, %v1183_v37  ;;  %v2538_v37 = vld [vmem:[#allocation7 + $0x80] sm:$0xf] }
 0x5f7   : > { %v1185_v38 = vpop.permute.xlu2 %1184 }
 0x5f8   : > { %1190 = vst.msk [vmem:[#allocation2 + $0x4] sm:$0xf] %vm1188_vm2, %v1185_v38  ;;  %v2784_v38 = vld [vmem:[#allocation7 + $0x8c] sm:$0xf0] }
 0x5f9   : > { %v2539_v40 = vor.u32 %v2784_v38, %v2538_v37  ;;  %v2483_v38 = vor.u32 %v2769_v35, %v2482_v22  ;;  %v1546_v22 = vperm.slane %v3478_v32, 2  ;;  %v1547_v35 = vperm.slane %v3478_v32, 3 }
 0x5fb   : > { %1715 = vmatpush.bf16.msrb.mxu2 %v2539_v40 }
 0x600   : > { %v1355_v43 = vpop.permute.xlu2 %1354 }
 0x61a   : > { %v1269_v42 = vpop.permute.xlu0 %1268 }
 0x61b   : > { %1275 = vst.msk [vmem:[#allocation2] sm:$0xf] %vm1274_vm3, %v1269_v42  ;;  %v2543_v42 = vor.u32 %v2782_v39, %v2540_v23  ;;  %v2484_v39 = vld [vmem:[#allocation7 + $0x18] sm:$0xf0] }
 0x61c   : > { %1361 = vst.msk [vmem:[#allocation2] sm:$0xf] %vm1360_vm4, %v1355_v43  ;;  %v2547_v43 = vor.u32 %v2785_v24, %v2546_v41  ;;  %v2487_v40 = vor.u32 %v2767_v36, %v2484_v39  ;;  %v2799_v36 = vld [vmem:[#allocation8 + $0x8] sm:$0xff] }
 0x61d   : > { %1729 = vmatpush.bf16.msra.mxu3 %v2543_v42 }
 0x61e   : > { %1743 = vmatpush.bf16.msrb.mxu0 %v2547_v43 }
 0x622   : > { %v1271_v44 = vpop.permute.xlu1 %1270  ;;  %v1357_v45 = vpop.permute.xlu0 %1356 }
 0x623   : > { %1276 = vst.msk [vmem:[#allocation2 + $0x4] sm:$0xf] %vm1274_vm3, %v1271_v44  ;;  %v2783_v44 = vld [vmem:[#allocation7 + $0x8c] sm:$0xf] }
 0x624   : > { %1362 = vst.msk [vmem:[#allocation2 + $0x4] sm:$0xf] %vm1360_vm4, %v1357_v45  ;;  %v2548_v45 = vld [vmem:[#allocation7 + $0x98] sm:$0xf0] }
 0x62b   : > { %v2757_v46 = vld [vmem:[#allocation2] sm:$0xff] }
 0x62c   : > { %1443 = vmatmul.bf16.vlgmr.msrb.gmra.mxu1 %v2757_v46  ;;  %v2551_v46 = vor.u32 %v2783_v44, %v2548_v45 }
 0x62e   : > { %1757 = vmatpush.bf16.msra.mxu1 %v2551_v46 }
 0x6a9   : > { %v1444_v48 = vpop.f32.mrf.mxu1 }
 0x6aa   : > { %v1449_v49 = vadd.f32 %v1444_v48, %v3319_v0  ;;  %v2780_v48 = vld [vmem:[#allocation7 + $0x6c] sm:$0xf0] }
 0x6ac   : > { %v3446_v50 = vadd.f32 %v2912_v47, %v1449_v49  ;;  %v2778_v49 = vld [vmem:[#allocation7 + $0x64] sm:$0xf] }
 0x6ae   : > { %1457 = vadd.xlane.f32.xlu1 %v3446_v50 }
 0x6b1   : > { %v1446_v51 = vpop.f32.mrf.mxu1 }
 0x6b2   : > { %v1450_v52 = vadd.f32 %v1446_v51, %v3322_v2 }
 0x6b4   : > { %v3450_v53 = vadd.f32 %v2912_v47, %v1450_v52  ;;  %v2522_v47 = vld [vmem:[#allocation7 + $0x60] sm:$0xf]  ;;  %v2524_v52 = vld [vmem:[#allocation7 + $0x70] sm:$0xf0] }
 0x6b5   : > { %v2523_v51 = vor.u32 %v2780_v48, %v2522_v47 }
 0x6b6   : > { %1459 = vadd.xlane.f32.xlu2 %v3450_v53 }
 0x6b7   : > { %1716 = vmatpush.bf16.msrb.mxu2 %v2523_v51 }
 0x6bb   : > { %1717 = vmatpush.bf16.msrb.mxu2 %v2507_v1 }
 0x6bf   : > { %1718 = vmatpush.bf16.msrb.mxu2 %v2491_v18  ;;  %v2803_v18 = vld [vmem:[#allocation8 + $0x28] sm:$0xff] }
 0x6c3   : > { %1719 = vmatpush.bf16.msrb.mxu2 %v2475_v34  ;;  %v2814_v34 = vld [vmem:[#allocation8 + $0x80] sm:$0xff] }
 0x721   : > { %v1458_v54 = vpop.xlane.xlu1 %1457 }
 0x722   : > { %v1461_v55 = vmul.f32 %v1458_v54, %v3325_v10  ;;  %v2530_v54 = vld [vmem:[#allocation7 + $0x68] sm:$0xf] }
 0x724   : > { %v3455_v56 = vsub.f32 %v3446_v50, %v1461_v55  ;;  %v2781_v55 = vld [vmem:[#allocation7 + $0x74] sm:$0xf0] }
 0x726   : > { %v1465_v0 = vmul.f32 %v3455_v56, %v3455_v56 }
 0x728   : > { %1467 = vadd.xlane.f32.xlu0 %v1465_v0  ;;  %v2527_v0 = vor.u32 %v2778_v49, %v2524_v52 }
 0x729   : > { %v1460_v57 = vpop.xlane.xlu2 %1459 }
 0x72a   : > { %v1462_v58 = vmul.f32 %v1460_v57, %v3325_v10  ;;  %v2531_v57 = vor.u32 %v2781_v55, %v2530_v54  ;;  %1730 = vmatpush.bf16.msra.mxu3 %v2527_v0  ;;  %v2913_v0 = vld [vmem:[%s3539_s9] ss:$0 sm:$0xff] }
 0x72c   : > { %v3461_v59 = vsub.f32 %v3450_v53, %v1462_v58  ;;  %v2779_v58 = vld [vmem:[#allocation7 + $0x6c] sm:$0xf]  ;;  %1744 = vmatpush.bf16.msrb.mxu0 %v2531_v57 }
 0x72e   : > { %v1466_v2 = vmul.f32 %v3461_v59, %v3461_v59  ;;  %1731 = vmatpush.bf16.msra.mxu3 %v2511_v6  ;;  %v2828_v6 = vld [vmem:[#allocation8 + $0xf0] sm:$0xff] }
 0x730   : > { %1469 = vadd.xlane.f32.xlu1 %v1466_v2  ;;  %v2532_v2 = vld [vmem:[#allocation7 + $0x78] sm:$0xf0]  ;;  %1745 = vmatpush.bf16.msrb.mxu0 %v2515_v7 }
 0x731   : > { %v2535_v60 = vor.u32 %v2779_v58, %v2532_v2  ;;  %v2813_v7 = vld [vmem:[#allocation8 + $0x78] sm:$0xff] }
 0x732   : > { %1732 = vmatpush.bf16.msra.mxu3 %v2495_v26  ;;  %v2810_v26 = vld [vmem:[#allocation8 + $0x60] sm:$0xff] }
 0x733   : > { %1758 = vmatpush.bf16.msra.mxu1 %v2535_v60 }
 0x734   : > { %1746 = vmatpush.bf16.msrb.mxu0 %v2499_v27  ;;  %v2816_v27 = vld [vmem:[#allocation8 + $0x90] sm:$0xff] }
 0x736   : > { %1733 = vmatpush.bf16.msra.mxu3 %v2479_v16  ;;  %v2822_v16 = vld [vmem:[#allocation8 + $0xc0] sm:$0xff] }
 0x737   : > { %1759 = vmatpush.bf16.msra.mxu1 %v2519_v11  ;;  %v2804_v11 = vld [vmem:[#allocation8 + $0x30] sm:$0xff] }
 0x738   : > { %1747 = vmatpush.bf16.msrb.mxu0 %v2483_v38 }
 0x73a   : > { %2118 = vmatpush.bf16.msrb.mxu3 %v2813_v7 }
 0x73b   : > { %1760 = vmatpush.bf16.msra.mxu1 %v2503_v14  ;;  %v2823_v14 = vld [vmem:[#allocation8 + $0xc8] sm:$0xff] }
 0x73e   : > { %2119 = vmatpush.bf16.msrb.mxu3 %v2812_v12 }
 0x73f   : > { %1761 = vmatpush.bf16.msra.mxu1 %v2487_v40 }
 0x742   : > { %2120 = vmatpush.bf16.msrb.mxu3 %v2811_v19 }
 0x743   : > { %2146 = vmatpush.bf16.msrb.mxu1 %v2829_v4 }
 0x746   : > { %2121 = vmatpush.bf16.msrb.mxu3 %v2810_v26 }
 0x747   : > { %2147 = vmatpush.bf16.msrb.mxu1 %v2828_v6 }
 0x74a   : > { %2122 = vmatpush.bf16.msrb.mxu3 %v2809_v30 }
 0x74b   : > { %2148 = vmatpush.bf16.msrb.mxu1 %v2827_v9 }
 0x74e   : > { %2123 = vmatpush.bf16.msrb.mxu3 %v2808_v33 }
 0x74f   : > { %2149 = vmatpush.bf16.msrb.mxu1 %v2826_v17 }
 0x753   : > { %2150 = vmatpush.bf16.msrb.mxu1 %v2825_v21 }
 0x757   : > { %2151 = vmatpush.bf16.msrb.mxu1 %v2824_v28 }
 0x75b   : > { %2152 = vmatpush.bf16.msrb.mxu1 %v2823_v14 }
 0x75f   : > { %2153 = vmatpush.bf16.msrb.mxu1 %v2822_v16 }
 0x79b   : > { %v1468_v25 = vpop.xlane.xlu0 %1467 }
 0x79c   : > { %v1471_v31 = vmul.f32 %v1468_v25, %v3325_v10  ;;  %v2802_v25 = vld [vmem:[#allocation8 + $0x20] sm:$0xff] }
 0x79e   : > { %v1473_v37 = vadd.f32 1e-05, %v1471_v31  ;;  %v2815_v31 = vld [vmem:[#allocation8 + $0x88] sm:$0xff] }
 0x7a0   : > { %2958 = vrsqrt.f32 %v1473_v37  ;;  %vm1481_vm6 = vweird.f32 %v1473_v37 }
 0x7a3   : > { %v1470_v23 = vpop.xlane.xlu1 %1469 }
 0x7a4   : > { %v1472_v41 = vmul.f32 %v1470_v23, %v3325_v10 }
 0x7a6   : > { %v2959_v24 = vpop.eup %2958  ;;  %v1474_v42 = vadd.f32 1e-05, %v1472_v41  ;;  %v1544_v41 = vperm.slane %v3478_v32, 0 }
 0x7a7   : > { %v1476_v43 = vmul.f32 %v2959_v24, %v1473_v37  ;;  %vm1482_vm5 = vweird.f32 %v2959_v24  ;;  %v2807_v37 = vld [vmem:[#allocation8 + $0x48] sm:$0xff] }
 0x7a8   : > { %2960 = vrsqrt.f32 %v1474_v42  ;;  %vm1483_vm7 = vmor %vm1481_vm6, %vm1482_vm5  ;;  %vm1491_vm9 = vweird.f32 %v1474_v42  ;;  %2124 = vmatpush.bf16.msrb.mxu3 %v2807_v37 }
 0x7a9   : > { %v1477_v44 = vmul.f32 %v2959_v24, %v1476_v43 }
 0x7ab   : > { %v1478_v45 = vmul.f32 0.5, %v1477_v44  ;;  %v2798_v44 = vld [vmem:[#allocation8] sm:$0xff] }
 0x7ad   : > { %v1479_v46 = vsub.f32 1.5, %v1478_v45  ;;  %v2806_v45 = vld [vmem:[#allocation8 + $0x40] sm:$0xff] }
 0x7ae   : > { %v2961_v47 = vpop.eup %2960  ;;  %2125 = vmatpush.bf16.msrb.mxu3 %v2806_v45 }
 0x7af   : > { %v1480_v48 = vmul.f32 %v2959_v24, %v1479_v46  ;;  %v1486_v49 = vmul.f32 %v2961_v47, %v1474_v42  ;;  %vm1492_vm8 = vweird.f32 %v2961_v47 }
 0x7b0   : > { %vm1493_vm10 = vmor %vm1491_vm9, %vm1492_vm8 }
 0x7b1   : > { %v1487_v51 = vmul.f32 %v2961_v47, %v1486_v49  ;;  %v1484_v52 = vsel %vm1483_vm7, %v2959_v24, %v1480_v48  ;;  %v1545_v24 = vperm.slane %v3478_v32, 1 }
 0x7b2   : > { %v1495_v10 = vmul.f32 %v1484_v52, %v3455_v56  ;;  %v2821_v56 = vld [vmem:[#allocation8 + $0xb8] sm:$0xff] }
 0x7b3   : > { %v1488_v54 = vmul.f32 0.5, %v1487_v51  ;;  %2132 = vmatpush.bf16.msra.mxu0 %v2821_v56 }
 0x7b4   : > { %v1501_v60 = vmul.f32 %v2913_v0, %v1495_v10 }
 0x7b5   : > { %v1489_v55 = vsub.f32 1.5, %v1488_v54 }
 0x7b6   : > { %v1507_v63 = vadd.f32 %v2914_v61, %v1501_v60 }
 0x7b7   : > { %v1490_v57 = vmul.f32 %v2961_v47, %v1489_v55  ;;  %2133 = vmatpush.bf16.msra.mxu0 %v2820_v5 }
 0x7b9   : > { %v1494_v58 = vsel %vm1493_vm10, %v2961_v47, %v1490_v57 }
 0x7ba   : > { %v1496_v2 = vmul.f32 %v1494_v58, %v3461_v59  ;;  %v2805_v59 = vld [vmem:[#allocation8 + $0x38] sm:$0xff] }
 0x7bb   : > { %2104 = vmatpush.bf16.msra.mxu2 %v2805_v59  ;;  %2134 = vmatpush.bf16.msra.mxu0 %v2819_v8 }
 0x7bc   : > { %v1502_v62 = vmul.f32 %v2913_v0, %v1496_v2 }
 0x7be   : > { %v1508_v1 = vadd.f32 %v2914_v61, %v1502_v62 }
 0x7bf   : > { %2105 = vmatpush.bf16.msra.mxu2 %v2804_v11  ;;  %2135 = vmatpush.bf16.msra.mxu0 %v2818_v13 }
 0x7c0   : > { %v1509_v3 = vpack.c.bf16 %v1508_v1, %v1507_v63 }
 0x7c2   : > { %1720 = vmatmul.bf16.vlgmr.msrb.gmra.mxu2 %v1509_v3  ;;  %1734 = vmatmul.bf16.vlgmr.msra.gmra.mxu3 %v1509_v3 }
 0x7c3   : > { %1748 = vmatmul.bf16.vlgmr.msrb.gmra.mxu0 %v1509_v3  ;;  %1762 = vmatmul.bf16.vlgmr.msra.gmra.mxu1 %v1509_v3 }
 0x7c4   : > { %2106 = vmatpush.bf16.msra.mxu2 %v2803_v18  ;;  %2136 = vmatpush.bf16.msra.mxu0 %v2817_v20 }
 0x7c8   : > { %2107 = vmatpush.bf16.msra.mxu2 %v2802_v25  ;;  %2137 = vmatpush.bf16.msra.mxu0 %v2816_v27 }
 0x7cc   : > { %2108 = vmatpush.bf16.msra.mxu2 %v2801_v29  ;;  %2138 = vmatpush.bf16.msra.mxu0 %v2815_v31 }
 0x7d0   : > { %2109 = vmatpush.bf16.msra.mxu2 %v2800_v15  ;;  %2139 = vmatpush.bf16.msra.mxu0 %v2814_v34 }
 0x7d4   : > { %2110 = vmatpush.bf16.msra.mxu2 %v2799_v36 }
 0x7d8   : > { %2111 = vmatpush.bf16.msra.mxu2 %v2798_v44 }
 0x840   : > { %v1749_v38 = vpop.f32.mrf.mxu0  ;;  %v1763_v39 = vpop.f32.mrf.mxu1 }
 0x841   : > { %v3482_v40 = vadd.f32 %v1749_v38, %v1546_v22  ;;  %v3484_v23 = vadd.f32 %v1763_v39, %v1547_v35 }
 0x843   : > { %v1778_v42 = vmul.f32 0.044715, %v3482_v40  ;;  %v1779_v43 = vmul.f32 0.044715, %v3484_v23 }
 0x845   : > { %v1786_v46 = vmul.f32 %v1778_v42, %v3482_v40  ;;  %v1787_v47 = vmul.f32 %v1779_v43, %v3484_v23  ;;  %v1721_v48 = vpop.f32.mrf.mxu2  ;;  %v1735_v49 = vpop.f32.mrf.mxu3  ;;  %v1770_v43 = vmul.f32 0.5, %v3482_v40 }
 0x846   : > { %v3492_v51 = vadd.f32 %v1721_v48, %v1544_v41  ;;  %v3494_v52 = vadd.f32 %v1735_v49, %v1545_v24 }
 0x847   : > { %v1794_v54 = vmul.f32 %v1786_v46, %v3482_v40  ;;  %v1795_v55 = vmul.f32 %v1787_v47, %v3484_v23  ;;  %v1771_v47 = vmul.f32 0.5, %v3484_v23 }
 0x848   : > { %v1776_v10 = vmul.f32 0.044715, %v3492_v51  ;;  %v1777_v0 = vmul.f32 0.044715, %v3494_v52  ;;  %v1751_v57 = vpop.f32.mrf.mxu0  ;;  %v1765_v58 = vpop.f32.mrf.mxu1 }
 0x849   : > { %v1802_v2 = vadd.f32 %v1794_v54, %v3482_v40  ;;  %v1752_v60 = vadd.f32 %v1751_v57, %v1546_v22  ;;  %v1766_v61 = vadd.f32 %v1765_v58, %v1547_v35  ;;  %v1803_v62 = vadd.f32 %v1795_v55, %v3484_v23 }
 0x84a   : > { %v1784_v63 = vmul.f32 %v1776_v10, %v3492_v51  ;;  %v1785_v1 = vmul.f32 %v1777_v0, %v3494_v52 }
 0x84b   : > { %v1782_v3 = vmul.f32 0.044715, %v1752_v60  ;;  %v1783_v5 = vmul.f32 0.044715, %v1766_v61  ;;  %v1810_v6 = vmul.f32 0.7978846, %v1802_v2 }
 0x84c   : > { %v1792_v56 = vmul.f32 %v1784_v63, %v3492_v51  ;;  %v1793_v4 = vmul.f32 %v1785_v1, %v3494_v52  ;;  %v1811_v9 = vmul.f32 0.7978846, %v1803_v62  ;;  %v1774_v44 = vmul.f32 0.5, %v1752_v60 }
 0x84d   : > { %v1790_v59 = vmul.f32 %v1782_v3, %v1752_v60  ;;  %v1723_v7 = vpop.f32.mrf.mxu2  ;;  %v1737_v8 = vpop.f32.mrf.mxu3  ;;  %v1791_v12 = vmul.f32 %v1783_v5, %v1766_v61  ;;  %2962 = vtanh.f32 %v1810_v6  ;;  %v1775_v48 = vmul.f32 0.5, %v1766_v61 }
 0x84e   : > { %v1800_v11 = vadd.f32 %v1792_v56, %v3492_v51  ;;  %v1724_v13 = vadd.f32 %v1723_v7, %v1544_v41  ;;  %v1801_v17 = vadd.f32 %v1793_v4, %v3494_v52  ;;  %v1738_v19 = vadd.f32 %v1737_v8, %v1545_v24 }
 0x84f   : > { %v1798_v18 = vmul.f32 %v1790_v59, %v1752_v60  ;;  %v1799_v21 = vmul.f32 %v1791_v12, %v1766_v61  ;;  %2964 = vtanh.f32 %v1811_v9  ;;  %v1768_v3 = vmul.f32 0.5, %v3492_v51  ;;  %v2915_v51 = vld [vmem:[%s3562_s15] ss:$0 sm:$0xff] }
 0x850   : > { %v1808_v20 = vmul.f32 0.7978846, %v1800_v11  ;;  %v1780_v25 = vmul.f32 0.044715, %v1724_v13  ;;  %v1781_v27 = vmul.f32 0.044715, %v1738_v19 }
 0x851   : > { %v1806_v26 = vadd.f32 %v1798_v18, %v1752_v60  ;;  %v1807_v28 = vadd.f32 %v1799_v21, %v1766_v61  ;;  %v1809_v30 = vmul.f32 0.7978846, %v1801_v17  ;;  %v1772_v40 = vmul.f32 0.5, %v1724_v13 }
 0x852   : > { %v1788_v29 = vmul.f32 %v1780_v25, %v1724_v13  ;;  %v1789_v14 = vmul.f32 %v1781_v27, %v1738_v19  ;;  %2966 = vtanh.f32 %v1808_v20  ;;  %v1769_v56 = vmul.f32 0.5, %v3494_v52 }
 0x853   : > { %v1814_v31 = vmul.f32 0.7978846, %v1806_v26  ;;  %v1815_v32 = vmul.f32 0.7978846, %v1807_v28  ;;  %v2963_v16 = vpop.eup %2962  ;;  %v1773_v23 = vmul.f32 0.5, %v1738_v19 }
 0x854   : > { %v1796_v15 = vmul.f32 %v1788_v29, %v1724_v13  ;;  %v1797_v33 = vmul.f32 %v1789_v14, %v1738_v19  ;;  %v1826_v39 = vadd.f32 1.0, %v2963_v16 }
 0x855   : > { %2968 = vtanh.f32 %v1814_v31  ;;  %v2965_v35 = vpop.eup %2964 }
 0x856   : > { %v1804_v34 = vadd.f32 %v1796_v15, %v1724_v13  ;;  %2970 = vtanh.f32 %v1815_v32  ;;  %v1805_v22 = vadd.f32 %v1797_v33, %v1738_v19  ;;  %v1827_v24 = vadd.f32 1.0, %v2965_v35 }
 0x857   : > { %2972 = vtanh.f32 %v1809_v30  ;;  %v1834_v54 = vmul.f32 %v1826_v39, %v1770_v43 }
 0x858   : > { %v1812_v36 = vmul.f32 0.7978846, %v1804_v34  ;;  %v1813_v37 = vmul.f32 0.7978846, %v1805_v22  ;;  %v2967_v38 = vpop.eup %2966  ;;  %v1835_v10 = vmul.f32 %v1827_v24, %v1771_v47 }
 0x859   : > { %v1824_v57 = vadd.f32 1.0, %v2967_v38 }
 0x85a   : > { %2974 = vtanh.f32 %v1812_v36 }
 0x85b   : > { %v2969_v41 = vpop.eup %2968  ;;  %2976 = vtanh.f32 %v1813_v37  ;;  %v1832_v4 = vmul.f32 %v1824_v57, %v1768_v3 }
 0x85c   : > { %v2971_v42 = vpop.eup %2970  ;;  %v1830_v45 = vadd.f32 1.0, %v2969_v41 }
 0x85d   : > { %v2973_v46 = vpop.eup %2972  ;;  %v1831_v49 = vadd.f32 1.0, %v2971_v42 }
 0x85e   : > { %v1838_v55 = vmul.f32 %v1830_v45, %v1774_v44  ;;  %v1825_v62 = vadd.f32 1.0, %v2973_v46 }
 0x85f   : > { %v1839_v0 = vmul.f32 %v1831_v49, %v1775_v48 }
 0x860   : > { %v2975_v58 = vpop.eup %2974  ;;  %v1842_v2 = vpack.c.bf16 %v1838_v55, %v1834_v54  ;;  %v1833_v6 = vmul.f32 %v1825_v62, %v1769_v56 }
 0x861   : > { %v2977_v63 = vpop.eup %2976  ;;  %v1843_v1 = vpack.c.bf16 %v1839_v0, %v1835_v10  ;;  %v1828_v60 = vadd.f32 1.0, %v2975_v58 }
 0x862   : > { %2140 = vmatmul.bf16.vlgmr.msra.gmra.mxu0 %v1842_v2  ;;  %v1829_v61 = vadd.f32 1.0, %v2977_v63 }
 0x863   : > { %2154 = vmatmul.bf16.vlgmr.msrb.gmra.mxu1 %v1843_v1  ;;  %v1836_v5 = vmul.f32 %v1828_v60, %v1772_v40 }
 0x864   : > { %v1837_v59 = vmul.f32 %v1829_v61, %v1773_v23 }
 0x865   : > { %v1840_v7 = vpack.c.bf16 %v1836_v5, %v1832_v4 }
 0x866   : > { %v1841_v8 = vpack.c.bf16 %v1837_v59, %v1833_v6 }
 0x867   : > { %2112 = vmatmul.bf16.vlgmr.msra.gmra.mxu2 %v1840_v7 }
 0x868   : > { %2126 = vmatmul.bf16.vlgmr.msrb.gmra.mxu3 %v1841_v8 }
 0x8df   : > { %v2141_v52 = vpop.f32.mrf.mxu0 }
 0x8e0   : > { %v2155_v17 = vpop.f32.mrf.mxu1 }
 0x8e7   : > { %v2143_v28 = vpop.f32.mrf.mxu0 }
 0x8e8   : > { %v2157_v30 = vpop.f32.mrf.mxu1 }
 0x8ea   : > { %v2113_v9 = vpop.f32.mrf.mxu2 }
 0x8eb   : > { %v2114_v11 = vadd.f32 %v2915_v51, %v2113_v9  ;;  %v2127_v12 = vpop.f32.mrf.mxu3 }
 0x8ed   : > { %v2128_v13 = vadd.f32 %v2127_v12, %v2114_v11 }
 0x8ef   : > { %v2142_v18 = vadd.f32 %v2141_v52, %v2128_v13 }
 0x8f1   : > { %v2156_v19 = vadd.f32 %v2155_v17, %v2142_v18 }
 0x8f2   : > { %v2115_v20 = vpop.f32.mrf.mxu2 }
 0x8f3   : > { %v2160_v21 = vadd.f32 %v2156_v19, %v3446_v50  ;;  %v2116_v25 = vadd.f32 %v2915_v51, %v2115_v20  ;;  %v2129_v26 = vpop.f32.mrf.mxu3 }
 0x8f5   : > { %2162 = vst [vmem:[%s633_s14] sm:$0xff] %v2160_v21  ;;  %v2130_v27 = vadd.f32 %v2129_v26, %v2116_v25 }
 0x8f7   : > { %v2144_v29 = vadd.f32 %v2143_v28, %v2130_v27 }
 0x8f9   : > { %v2158_v31 = vadd.f32 %v2157_v30, %v2144_v29 }
 0x8fb   : > { %v2161_v14 = vadd.f32 %v2158_v31, %v3450_v53 }
 0x8fd   : > { %2163 = vst [vmem:[%s633_s14 + $0x8] sm:$0xff] %v2161_v14 }
 0x8fe PF: > { %s3564_s18 = sld [smem:[#allocation14_spill]] }
 0x8ff   : > { %s3566_s19 = sld [smem:[#allocation15_spill]] }
 0x904   : > { %s28_s20 = sadd.s32 1, %s3564_s18   ;;  %s3565_s18 = sld [smem:[#allocation13_spill]] }
 0x905   : > { %p25_p8 = scmp.ge.s32.totalorder %s28_s20, 4  }
 0x907   :  { %27 = sbr.rel (!%p25_p8) target bundleno = 10 (0xa), region = 133 }
 0x90c   :  { %2194 = vsyncpa [#allocation4], 1 }
 0x90d   :  { %2196 = vsyncpa [#allocation4 + $0x1], 1 }
 0x90e   :  { %2197 = vsyncpa [#allocation6], 1 }
 0x90f   :  { %2198 = vsyncpa [#allocation9], 1 }

</bundles_post_ra>
